<compile_context>
chip_gen: v6e
topology: v6e:2x2x1
jax: 0.10.0
libtpu: 0.0.40
codegen_flags: <defaults>
</compile_context>

<pallas_src>
import functools
import math

import jax
import jax.numpy as jnp
from jax import lax
from jax.experimental import pallas as pl
from jax.experimental.pallas import tpu as pltpu


# ----------------------------------------------------------------------------------------------
# Fused kernel: all resnet layers of the UpBlock for one batch sample per grid step.
# ----------------------------------------------------------------------------------------------
def up_block_kernel(*refs, n_layers, eps, inv_scale):
    """refs = (x, r_0..r_{n-1}, 10 params per layer..., out).

    x: (C0, L), r_i: (Cr_i, L) f32, channel-first (channels on sublanes, length on lanes).
    Per-layer params: g1, b1, w1, wb1, g2, b2, w2, wb2, wsc, bsc; conv weights pre-flattened
    channel-first to (Cout, 3*Cin) bf16, per-channel vectors shaped (C, 1) f32.
    """
    o_ref = refs[-1]
    x_ref = refs[0]
    r_refs = refs[1:1 + n_layers]
    p_refs = refs[1 + n_layers:-1]

    h = x_ref[...]                                   # (C0, L) f32
    L = h.shape[1]

    # Lane-position masks implementing the conv's zero padding at l == 0 / l == L-1.
    pos = lax.broadcasted_iota(jnp.int32, (1, L), 1)
    not_first = pos != 0
    not_last = pos != (L - 1)

    inv_sqrt2 = 1.0 / math.sqrt(2.0)

    def gelu(v):                                     # exact (erf) GELU, f32 (EUP/VPU)
        return 0.5 * v * (1.0 + lax.erf(v * inv_sqrt2))

    def group_norm_gelu(a, g_ref, b_ref):
        # groups=1: stats over the whole (C, L) sample; two-pass variance (no cancellation).
        inv_cnt = 1.0 / float(a.shape[0] * a.shape[1])
        mu = jnp.sum(jnp.sum(a, axis=1, keepdims=True), axis=0, keepdims=True) * inv_cnt
        c = a - mu
        var = jnp.sum(jnp.sum(c * c, axis=1, keepdims=True), axis=0, keepdims=True) * inv_cnt
        return gelu(c * lax.rsqrt(var + eps) * g_ref[...] + b_ref[...])

    def taps3_bf16(a):                               # (C, L) f32 -> (3C, L) bf16: [x[l-1]; x[l]; x[l+1]]
        # Roll + boundary mask in f32 (v5e has no bf16 VALU), cast each 1x-wide tap, concat in
        # bf16 so the 3x-wide tensor / MXU operand carries half the bytes.
        prev = jnp.where(not_first, pltpu.roll(a, 1, 1), 0.0).astype(jnp.bfloat16)
        nxt = jnp.where(not_last, pltpu.roll(a, L - 1, 1), 0.0).astype(jnp.bfloat16)
        return jnp.concatenate([prev, a.astype(jnp.bfloat16), nxt], axis=0)

    def conv3(a, w_ref, b_ref):                      # Conv1d(k=3, pad=1) as one MXU contraction
        return jnp.dot(w_ref[...], taps3_bf16(a),
                       preferred_element_type=jnp.float32) + b_ref[...]

    for i in range(n_layers):
        (g1, b1, w1, wb1, g2, b2, w2, wb2, wsc, bsc) = p_refs[10 * i:10 * (i + 1)]

        # torch.cat([hidden_states, res_hidden_states], dim=1): channel (sublane) concat.
        hr = jnp.concatenate([h, r_refs[i][...]], axis=0)            # (Cin_tot, L) f32

        # norm1 -> GELU -> conv1 (single merged K = 3*Cin_tot contraction).
        y = conv3(group_norm_gelu(hr, g1, b1), w1, wb1)              # (Cout, L) f32
        # norm2 -> GELU -> dropout(p=0, identity) -> conv2.
        y = conv3(group_norm_gelu(y, g2, b2), w2, wb2)

        # 1x1 shortcut conv on the pre-norm concat; kept in f32 for accuracy (small matmul).
        sc = jnp.dot(wsc[...], hr, preferred_element_type=jnp.float32) + bsc[...]

        h = (sc + y) * inv_scale                                     # next layer's hidden states

    o_ref[...] = h.astype(o_ref.dtype)


# ----------------------------------------------------------------------------------------------
# Parameter prep (one-time): channel-first conv weights (Cout, 3*Cin) bf16 (3 taps folded into
# the contraction dim), per-channel vectors as (C, 1) columns (broadcast along the lane/L axis).
# ----------------------------------------------------------------------------------------------
def prepare_up_block_params(block_params):
    flat = []
    for p in block_params:
        _, cin, cout = p["w1"].shape                  # stored as (K=3, Cin, Cout)
        flat += [
            p["g1"].reshape(cin, 1), p["b1"].reshape(cin, 1),
            jnp.transpose(p["w1"], (2, 0, 1)).reshape(cout, 3 * cin).astype(jnp.bfloat16),
            p["wb1"].reshape(cout, 1),
            p["g2"].reshape(cout, 1), p["b2"].reshape(cout, 1),
            jnp.transpose(p["w2"], (2, 0, 1)).reshape(cout, 3 * cout).astype(jnp.bfloat16),
            p["wb2"].reshape(cout, 1),
            jnp.transpose(p["wsc"], (1, 0)),          # (Cout, Cin) f32: shortcut stays f32
            p["bsc"].reshape(cout, 1),
        ]
    return tuple(flat)


# ----------------------------------------------------------------------------------------------
# Forward wrapper: NCL in, NCL out -- no transposes anywhere; one pallas_call, grid over batch.
# ----------------------------------------------------------------------------------------------
def up_block_1d_noskip(hidden_states, res_hidden_states_tuple, prepared_params,
                       temb=None, upsample_size=None, scale=1.0,
                       eps=1e-6, output_scale_factor=1.0):
    """hidden_states: (N, C_in, L); res tensors: (N, C_res_i, L). Returns (N, C_out, L)."""
    del temb, upsample_size, scale   # temb is None for this block; scale only touches LoRA layers
    n, c0, L = hidden_states.shape
    nl = len(res_hidden_states_tuple)
    assert len(prepared_params) == 10 * nl
    cout = prepared_params[-1].shape[0]              # last layer's bsc: (C_out, 1)

    # resnet i consumes res_hidden_states_tuple[-1 - i] (the torch loop pops from the end).
    res_args = [res_hidden_states_tuple[-1 - i] for i in range(nl)]

    def sample_spec(c):                              # one sample per grid step (batch squeezed)
        return pl.BlockSpec((None, c, L), lambda b: (b, 0, 0))

    vmem = pl.BlockSpec(memory_space=pltpu.MemorySpace.VMEM)   # whole-array resident params

    # Advisory cost estimate for the XLA scheduler.
    flops, trans = 0, 0
    ch = c0
    for r in res_args:
        cin_tot = ch + r.shape[1]
        flops += 2 * n * L * cout * (3 * cin_tot + 3 * cout + cin_tot)
        trans += n * L * (cin_tot + cout)
        ch = cout
    bytes_accessed = 4 * (hidden_states.size + sum(r.size for r in res_args) + n * cout * L)
    bytes_accessed += sum(int(p.size) * p.dtype.itemsize for p in prepared_params)

    kernel = functools.partial(up_block_kernel, n_layers=nl, eps=eps,
                               inv_scale=1.0 / output_scale_factor)
    return pl.pallas_call(
        kernel,
        out_shape=jax.ShapeDtypeStruct((n, cout, L), jnp.float32),
        grid=(n,),
        in_specs=[sample_spec(c0)]
                 + [sample_spec(r.shape[1]) for r in res_args]
                 + [vmem] * len(prepared_params),
        out_specs=sample_spec(cout),
        compiler_params=pltpu.CompilerParams(
            dimension_semantics=("parallel",),        # batch samples are independent (v7x 2 TCs)
            vmem_limit_bytes=32 * 1024 * 1024),
        cost_estimate=pl.CostEstimate(flops=int(flops), transcendentals=int(trans),
                                      bytes_accessed=int(bytes_accessed)),
    )(hidden_states, *res_args, *prepared_params)


# ----------------------------------------------------------------------------------------------
# PyTorch-style parameter init (matches nn.Conv1d / GroupNorm defaults).
# ----------------------------------------------------------------------------------------------
def _init_resnet_params(key, cin, cout):
    k = jax.random.split(key, 6)
    s1 = 1.0 / math.sqrt(3 * cin)
    s2 = 1.0 / math.sqrt(3 * cout)
    ssc = 1.0 / math.sqrt(cin)
    return {
        "g1": jnp.ones((1, cin), jnp.float32),
        "b1": jnp.zeros((1, cin), jnp.float32),
        "w1": jax.random.uniform(k[0], (3, cin, cout), jnp.float32, -s1, s1),   # (K, Cin, Cout)
        "wb1": jax.random.uniform(k[1], (1, cout), jnp.float32, -s1, s1),
        "g2": jnp.ones((1, cout), jnp.float32),
        "b2": jnp.zeros((1, cout), jnp.float32),
        "w2": jax.random.uniform(k[2], (3, cout, cout), jnp.float32, -s2, s2),
        "wb2": jax.random.uniform(k[3], (1, cout), jnp.float32, -s2, s2),
        "wsc": jax.random.uniform(k[4], (cin, cout), jnp.float32, -ssc, ssc),
        "bsc": jax.random.uniform(k[5], (1, cout), jnp.float32, -ssc, ssc),
    }


def init_up_block_params(key, in_channels, skip_channels, out_channels, num_layers=3):
    keys = jax.random.split(key, num_layers)
    params = []
    for i in range(num_layers):
        is_last = i == num_layers - 1
        res_skip = skip_channels if is_last else out_channels
        cin = (in_channels if i == 0 else out_channels) + res_skip
        params.append(_init_resnet_params(keys[i], cin, out_channels))
    return params


# ----------------------------------------------------------------------------------------------
# Pure-JAX f32 reference (same assumed ResnetBlock1D structure) for a correctness check.
# ----------------------------------------------------------------------------------------------
def _resnet_block_1d_ref(x, p, eps, out_scale):
    hp = lax.Precision.HIGHEST

    def gn(v, g, b):
        mu = jnp.mean(v, axis=(1, 2), keepdims=True)
        var = jnp.mean(jnp.square(v - mu), axis=(1, 2), keepdims=True)
        return (v - mu) * lax.rsqrt(var + eps) * g + b

    def gelu(v):
        return 0.5 * v * (1.0 + lax.erf(v * (1.0 / math.sqrt(2.0))))

    def conv3(v, w, b):
        vp = jnp.pad(v, ((0, 0), (1, 1), (0, 0)))
        return (jnp.einsum("nlc,cd->nld", vp[:, :-2], w[0], precision=hp)
                + jnp.einsum("nlc,cd->nld", vp[:, 1:-1], w[1], precision=hp)
                + jnp.einsum("nlc,cd->nld", vp[:, 2:], w[2], precision=hp)) + b

    h = conv3(gelu(gn(x, p["g1"], p["b1"])), p["w1"], p["wb1"])
    h = conv3(gelu(gn(h, p["g2"], p["b2"])), p["w2"], p["wb2"])
    sc = jnp.einsum("nlc,cd->nld", x, p["wsc"], precision=hp) + p["bsc"]
    return (sc + h) / out_scale


def up_block_1d_noskip_ref(hidden_states, res_hidden_states_tuple, block_params,
                           eps=1e-6, output_scale_factor=1.0):
    h = jnp.transpose(hidden_states, (0, 2, 1))
    res = [jnp.transpose(r, (0, 2, 1)) for r in res_hidden_states_tuple]
    for p in block_params:
        r = res.pop()                                 # res_hidden_states_tuple[-1], popped per layer
        h = jnp.concatenate([h, r], axis=-1)          # channel concat (dim=1 in NCL)
        h = _resnet_block_1d_ref(h, p, eps, output_scale_factor)
    return jnp.transpose(h, (0, 2, 1))


if __name__ == "__main__":
    key = jax.random.PRNGKey(0)
    k_h, k_r0, k_r1, k_r2, k_p = jax.random.split(key, 5)

    # Small demo shapes; L=128 keeps the length (lane) axis dense so stores are unmasked.
    N, L = 2, 128
    in_ch, skip_ch, out_ch = 32, 16, 32

    hidden = jax.random.normal(k_h, (N, in_ch, L), jnp.float32)
    # Popped from the end: [-1], [-2] carry out_channels; [0] carries skip_channels (last layer).
    res_tuple = (
        jax.random.normal(k_r0, (N, skip_ch, L), jnp.float32),
        jax.random.normal(k_r1, (N, out_ch, L), jnp.float32),
        jax.random.normal(k_r2, (N, out_ch, L), jnp.float32),
    )

    params = init_up_block_params(k_p, in_ch, skip_ch, out_ch, num_layers=3)
    prepared = prepare_up_block_params(params)

    fwd = jax.jit(up_block_1d_noskip)
    out = jax.block_until_ready(fwd(hidden, res_tuple, prepared))

    assert out.shape == (N, out_ch, L), out.shape
    assert bool(jnp.all(jnp.isfinite(out)))

    # Correctness vs. pure-JAX f32 reference (kernel uses bf16 MXU operands -> loose tolerance).
    ref = up_block_1d_noskip_ref(hidden, res_tuple, params)
    err = float(jnp.max(jnp.abs(out - ref)))
    assert bool(jnp.allclose(out, ref, atol=5e-2, rtol=5e-2)), err

    print("KERNEL_OK")
</pallas_src>

<mosaic_0001>
module attributes {stable_mosaic.version = 11 : i64} {
  func.func @up_block_kernel(%arg0: i32, %arg1: memref<1x32x128xf32, #tpu.memory_space<vmem>>, %arg2: memref<1x32x128xf32, #tpu.memory_space<vmem>>, %arg3: memref<1x32x128xf32, #tpu.memory_space<vmem>>, %arg4: memref<1x16x128xf32, #tpu.memory_space<vmem>>, %arg5: memref<64x1xf32, #tpu.memory_space<vmem>>, %arg6: memref<64x1xf32, #tpu.memory_space<vmem>>, %arg7: memref<32x192xbf16, #tpu.memory_space<vmem>>, %arg8: memref<32x1xf32, #tpu.memory_space<vmem>>, %arg9: memref<32x1xf32, #tpu.memory_space<vmem>>, %arg10: memref<32x1xf32, #tpu.memory_space<vmem>>, %arg11: memref<32x96xbf16, #tpu.memory_space<vmem>>, %arg12: memref<32x1xf32, #tpu.memory_space<vmem>>, %arg13: memref<32x64xf32, #tpu.memory_space<vmem>>, %arg14: memref<32x1xf32, #tpu.memory_space<vmem>>, %arg15: memref<64x1xf32, #tpu.memory_space<vmem>>, %arg16: memref<64x1xf32, #tpu.memory_space<vmem>>, %arg17: memref<32x192xbf16, #tpu.memory_space<vmem>>, %arg18: memref<32x1xf32, #tpu.memory_space<vmem>>, %arg19: memref<32x1xf32, #tpu.memory_space<vmem>>, %arg20: memref<32x1xf32, #tpu.memory_space<vmem>>, %arg21: memref<32x96xbf16, #tpu.memory_space<vmem>>, %arg22: memref<32x1xf32, #tpu.memory_space<vmem>>, %arg23: memref<32x64xf32, #tpu.memory_space<vmem>>, %arg24: memref<32x1xf32, #tpu.memory_space<vmem>>, %arg25: memref<48x1xf32, #tpu.memory_space<vmem>>, %arg26: memref<48x1xf32, #tpu.memory_space<vmem>>, %arg27: memref<32x144xbf16, #tpu.memory_space<vmem>>, %arg28: memref<32x1xf32, #tpu.memory_space<vmem>>, %arg29: memref<32x1xf32, #tpu.memory_space<vmem>>, %arg30: memref<32x1xf32, #tpu.memory_space<vmem>>, %arg31: memref<32x96xbf16, #tpu.memory_space<vmem>>, %arg32: memref<32x1xf32, #tpu.memory_space<vmem>>, %arg33: memref<32x48xf32, #tpu.memory_space<vmem>>, %arg34: memref<32x1xf32, #tpu.memory_space<vmem>>, %arg35: memref<1x32x128xf32, #tpu.memory_space<vmem>>) attributes {dimension_semantics = [#tpu.dimension_semantics<parallel>], iteration_bounds = array<i64: 2>, scalar_prefetch = 0 : i64, scratch_operands = 0 : i64, tpu.core_type = #tpu.core_type<tc>, window_params = [{transform_indices = @transform_0, window_bounds = array<i64: 1, 32, 128>}, {transform_indices = @transform_1, window_bounds = array<i64: 1, 32, 128>}, {transform_indices = @transform_2, window_bounds = array<i64: 1, 32, 128>}, {transform_indices = @transform_3, window_bounds = array<i64: 1, 16, 128>}, {pipeline_mode = #tpu.pipeline_mode<synchronous>, transform_indices = @transform_4, window_bounds = array<i64: 64, 1>}, {pipeline_mode = #tpu.pipeline_mode<synchronous>, transform_indices = @transform_5, window_bounds = array<i64: 64, 1>}, {pipeline_mode = #tpu.pipeline_mode<synchronous>, transform_indices = @transform_6, window_bounds = array<i64: 32, 192>}, {pipeline_mode = #tpu.pipeline_mode<synchronous>, transform_indices = @transform_7, window_bounds = array<i64: 32, 1>}, {pipeline_mode = #tpu.pipeline_mode<synchronous>, transform_indices = @transform_8, window_bounds = array<i64: 32, 1>}, {pipeline_mode = #tpu.pipeline_mode<synchronous>, transform_indices = @transform_9, window_bounds = array<i64: 32, 1>}, {pipeline_mode = #tpu.pipeline_mode<synchronous>, transform_indices = @transform_10, window_bounds = array<i64: 32, 96>}, {pipeline_mode = #tpu.pipeline_mode<synchronous>, transform_indices = @transform_11, window_bounds = array<i64: 32, 1>}, {pipeline_mode = #tpu.pipeline_mode<synchronous>, transform_indices = @transform_12, window_bounds = array<i64: 32, 64>}, {pipeline_mode = #tpu.pipeline_mode<synchronous>, transform_indices = @transform_13, window_bounds = array<i64: 32, 1>}, {pipeline_mode = #tpu.pipeline_mode<synchronous>, transform_indices = @transform_14, window_bounds = array<i64: 64, 1>}, {pipeline_mode = #tpu.pipeline_mode<synchronous>, transform_indices = @transform_15, window_bounds = array<i64: 64, 1>}, {pipeline_mode = #tpu.pipeline_mode<synchronous>, transform_indices = @transform_16, window_bounds = array<i64: 32, 192>}, {pipeline_mode = #tpu.pipeline_mode<synchronous>, transform_indices = @transform_17, window_bounds = array<i64: 32, 1>}, {pipeline_mode = #tpu.pipeline_mode<synchronous>, transform_indices = @transform_18, window_bounds = array<i64: 32, 1>}, {pipeline_mode = #tpu.pipeline_mode<synchronous>, transform_indices = @transform_19, window_bounds = array<i64: 32, 1>}, {pipeline_mode = #tpu.pipeline_mode<synchronous>, transform_indices = @transform_20, window_bounds = array<i64: 32, 96>}, {pipeline_mode = #tpu.pipeline_mode<synchronous>, transform_indices = @transform_21, window_bounds = array<i64: 32, 1>}, {pipeline_mode = #tpu.pipeline_mode<synchronous>, transform_indices = @transform_22, window_bounds = array<i64: 32, 64>}, {pipeline_mode = #tpu.pipeline_mode<synchronous>, transform_indices = @transform_23, window_bounds = array<i64: 32, 1>}, {pipeline_mode = #tpu.pipeline_mode<synchronous>, transform_indices = @transform_24, window_bounds = array<i64: 48, 1>}, {pipeline_mode = #tpu.pipeline_mode<synchronous>, transform_indices = @transform_25, window_bounds = array<i64: 48, 1>}, {pipeline_mode = #tpu.pipeline_mode<synchronous>, transform_indices = @transform_26, window_bounds = array<i64: 32, 144>}, {pipeline_mode = #tpu.pipeline_mode<synchronous>, transform_indices = @transform_27, window_bounds = array<i64: 32, 1>}, {pipeline_mode = #tpu.pipeline_mode<synchronous>, transform_indices = @transform_28, window_bounds = array<i64: 32, 1>}, {pipeline_mode = #tpu.pipeline_mode<synchronous>, transform_indices = @transform_29, window_bounds = array<i64: 32, 1>}, {pipeline_mode = #tpu.pipeline_mode<synchronous>, transform_indices = @transform_30, window_bounds = array<i64: 32, 96>}, {pipeline_mode = #tpu.pipeline_mode<synchronous>, transform_indices = @transform_31, window_bounds = array<i64: 32, 1>}, {pipeline_mode = #tpu.pipeline_mode<synchronous>, transform_indices = @transform_32, window_bounds = array<i64: 32, 48>}, {pipeline_mode = #tpu.pipeline_mode<synchronous>, transform_indices = @transform_33, window_bounds = array<i64: 32, 1>}, {transform_indices = @transform_34, window_bounds = array<i64: 1, 32, 128>}]} {
    %c0 = arith.constant 0 : index
    %c0_0 = arith.constant 0 : index
    %c0_1 = arith.constant 0 : index
    %0 = vector.load %arg1[%c0, %c0_0, %c0_1] : memref<1x32x128xf32, #tpu.memory_space<vmem>>, vector<1x32x128xf32>
    %1 = vector.shape_cast %0 : vector<1x32x128xf32> to vector<32x128xf32>
    %2 = tpu.iota {dimensions = array<i32: 1>} : vector<1x128xi32>
    %c0_i32 = arith.constant 0 : i32
    %3 = vector.broadcast %c0_i32 : i32 to vector<1x128xi32>
    %4 = arith.cmpi ne, %2, %3 : vector<1x128xi32>
    %c127_i32 = arith.constant 127 : i32
    %5 = vector.broadcast %c127_i32 : i32 to vector<1x128xi32>
    %6 = arith.cmpi ne, %2, %5 : vector<1x128xi32>
    %c0_2 = arith.constant 0 : index
    %c0_3 = arith.constant 0 : index
    %c0_4 = arith.constant 0 : index
    %7 = vector.load %arg2[%c0_2, %c0_3, %c0_4] : memref<1x32x128xf32, #tpu.memory_space<vmem>>, vector<1x32x128xf32>
    %8 = vector.shape_cast %7 : vector<1x32x128xf32> to vector<32x128xf32>
    %9 = tpu.concatenate %1, %8 in 0 : vector<32x128xf32>, vector<32x128xf32> -> vector<64x128xf32>
    %cst = arith.constant dense<0.000000e+00> : vector<64xf32>
    %10 = vector.multi_reduction <add>, %9, %cst [1] : vector<64x128xf32> to vector<64xf32>
    %11 = vector.shape_cast %10 : vector<64xf32> to vector<64x1xf32>
    %cst_5 = arith.constant dense<0.000000e+00> : vector<1xf32>
    %12 = vector.multi_reduction <add>, %11, %cst_5 [0] : vector<64x1xf32> to vector<1xf32>
    %13 = vector.shape_cast %12 : vector<1xf32> to vector<1x1xf32>
    %cst_6 = arith.constant 1.22070313E-4 : f32
    %14 = vector.broadcast %cst_6 : f32 to vector<1x1xf32>
    %15 = arith.mulf %13, %14 : vector<1x1xf32>
    %16 = vector.broadcast %15 : vector<1x1xf32> to vector<64x128xf32>
    %17 = arith.subf %9, %16 : vector<64x128xf32>
    %18 = arith.mulf %17, %17 : vector<64x128xf32>
    %cst_7 = arith.constant dense<0.000000e+00> : vector<64xf32>
    %19 = vector.multi_reduction <add>, %18, %cst_7 [1] : vector<64x128xf32> to vector<64xf32>
    %20 = vector.shape_cast %19 : vector<64xf32> to vector<64x1xf32>
    %cst_8 = arith.constant dense<0.000000e+00> : vector<1xf32>
    %21 = vector.multi_reduction <add>, %20, %cst_8 [0] : vector<64x1xf32> to vector<1xf32>
    %22 = vector.shape_cast %21 : vector<1xf32> to vector<1x1xf32>
    %cst_9 = arith.constant 1.22070313E-4 : f32
    %23 = vector.broadcast %cst_9 : f32 to vector<1x1xf32>
    %24 = arith.mulf %22, %23 : vector<1x1xf32>
    %cst_10 = arith.constant 9.99999997E-7 : f32
    %25 = vector.broadcast %cst_10 : f32 to vector<1x1xf32>
    %26 = arith.addf %24, %25 : vector<1x1xf32>
    %27 = math.rsqrt %26 : vector<1x1xf32>
    %28 = vector.broadcast %27 : vector<1x1xf32> to vector<64x128xf32>
    %29 = arith.mulf %17, %28 : vector<64x128xf32>
    %c0_11 = arith.constant 0 : index
    %c0_12 = arith.constant 0 : index
    %30 = vector.load %arg5[%c0_11, %c0_12] : memref<64x1xf32, #tpu.memory_space<vmem>>, vector<64x1xf32>
    %31 = vector.broadcast %30 : vector<64x1xf32> to vector<64x128xf32>
    %32 = arith.mulf %29, %31 : vector<64x128xf32>
    %c0_13 = arith.constant 0 : index
    %c0_14 = arith.constant 0 : index
    %33 = vector.load %arg6[%c0_13, %c0_14] : memref<64x1xf32, #tpu.memory_space<vmem>>, vector<64x1xf32>
    %34 = vector.broadcast %33 : vector<64x1xf32> to vector<64x128xf32>
    %35 = arith.addf %32, %34 : vector<64x128xf32>
    %cst_15 = arith.constant 5.000000e-01 : f32
    %36 = vector.broadcast %cst_15 : f32 to vector<64x128xf32>
    %37 = arith.mulf %36, %35 : vector<64x128xf32>
    %cst_16 = arith.constant 0.707106769 : f32
    %38 = vector.broadcast %cst_16 : f32 to vector<64x128xf32>
    %39 = arith.mulf %35, %38 : vector<64x128xf32>
    %40 = math.erf %39 : vector<64x128xf32>
    %cst_17 = arith.constant 1.000000e+00 : f32
    %41 = vector.broadcast %cst_17 : f32 to vector<64x128xf32>
    %42 = arith.addf %41, %40 : vector<64x128xf32>
    %43 = arith.mulf %37, %42 : vector<64x128xf32>
    %c0_18 = arith.constant 0 : index
    %c0_19 = arith.constant 0 : index
    %44 = vector.load %arg7[%c0_18, %c0_19] : memref<32x192xbf16, #tpu.memory_space<vmem>>, vector<32x192xbf16>
    %c1_i32 = arith.constant 1 : i32
    %45 = tpu.dynamic_rotate %43 by %c1_i32 dim 1 : vector<64x128xf32>, i32 -> vector<64x128xf32>
    %cst_20 = arith.constant 0.000000e+00 : f32
    %46 = vector.shape_cast %4 : vector<1x128xi1> to vector<1x128xi1>
    %47 = vector.broadcast %46 : vector<1x128xi1> to vector<64x128xi1>
    %48 = vector.broadcast %cst_20 : f32 to vector<64x128xf32>
    %49 = arith.select %47, %45, %48 : vector<64x128xi1>, vector<64x128xf32>
    %50 = arith.truncf %49 : vector<64x128xf32> to vector<64x128xbf16>
    %c127_i32_21 = arith.constant 127 : i32
    %51 = tpu.dynamic_rotate %43 by %c127_i32_21 dim 1 : vector<64x128xf32>, i32 -> vector<64x128xf32>
    %cst_22 = arith.constant 0.000000e+00 : f32
    %52 = vector.shape_cast %6 : vector<1x128xi1> to vector<1x128xi1>
    %53 = vector.broadcast %52 : vector<1x128xi1> to vector<64x128xi1>
    %54 = vector.broadcast %cst_22 : f32 to vector<64x128xf32>
    %55 = arith.select %53, %51, %54 : vector<64x128xi1>, vector<64x128xf32>
    %56 = arith.truncf %55 : vector<64x128xf32> to vector<64x128xbf16>
    %57 = arith.truncf %43 : vector<64x128xf32> to vector<64x128xbf16>
    %58 = tpu.concatenate %50, %57, %56 in 0 : vector<64x128xbf16>, vector<64x128xbf16>, vector<64x128xbf16> -> vector<192x128xbf16>
    %cst_23 = arith.constant dense<0.000000e+00> : vector<32x128xf32>
    %59 = tpu.matmul %44, %58, %cst_23 {dimension_numbers = #tpu.dot_dimension_numbers<[1], [0], [0], [1], [0, 0, 1, 1], [], []>} : vector<32x192xbf16>, vector<192x128xbf16>, vector<32x128xf32> -> vector<32x128xf32>
    %c0_24 = arith.constant 0 : index
    %c0_25 = arith.constant 0 : index
    %60 = vector.load %arg8[%c0_24, %c0_25] : memref<32x1xf32, #tpu.memory_space<vmem>>, vector<32x1xf32>
    %61 = vector.broadcast %60 : vector<32x1xf32> to vector<32x128xf32>
    %62 = arith.addf %59, %61 : vector<32x128xf32>
    %cst_26 = arith.constant dense<0.000000e+00> : vector<32xf32>
    %63 = vector.multi_reduction <add>, %62, %cst_26 [1] : vector<32x128xf32> to vector<32xf32>
    %64 = vector.shape_cast %63 : vector<32xf32> to vector<32x1xf32>
    %cst_27 = arith.constant dense<0.000000e+00> : vector<1xf32>
    %65 = vector.multi_reduction <add>, %64, %cst_27 [0] : vector<32x1xf32> to vector<1xf32>
    %66 = vector.shape_cast %65 : vector<1xf32> to vector<1x1xf32>
    %cst_28 = arith.constant 2.44140625E-4 : f32
    %67 = vector.broadcast %cst_28 : f32 to vector<1x1xf32>
    %68 = arith.mulf %66, %67 : vector<1x1xf32>
    %69 = vector.broadcast %68 : vector<1x1xf32> to vector<32x128xf32>
    %70 = arith.subf %62, %69 : vector<32x128xf32>
    %71 = arith.mulf %70, %70 : vector<32x128xf32>
    %cst_29 = arith.constant dense<0.000000e+00> : vector<32xf32>
    %72 = vector.multi_reduction <add>, %71, %cst_29 [1] : vector<32x128xf32> to vector<32xf32>
    %73 = vector.shape_cast %72 : vector<32xf32> to vector<32x1xf32>
    %cst_30 = arith.constant dense<0.000000e+00> : vector<1xf32>
    %74 = vector.multi_reduction <add>, %73, %cst_30 [0] : vector<32x1xf32> to vector<1xf32>
    %75 = vector.shape_cast %74 : vector<1xf32> to vector<1x1xf32>
    %cst_31 = arith.constant 2.44140625E-4 : f32
    %76 = vector.broadcast %cst_31 : f32 to vector<1x1xf32>
    %77 = arith.mulf %75, %76 : vector<1x1xf32>
    %cst_32 = arith.constant 9.99999997E-7 : f32
    %78 = vector.broadcast %cst_32 : f32 to vector<1x1xf32>
    %79 = arith.addf %77, %78 : vector<1x1xf32>
    %80 = math.rsqrt %79 : vector<1x1xf32>
    %81 = vector.broadcast %80 : vector<1x1xf32> to vector<32x128xf32>
    %82 = arith.mulf %70, %81 : vector<32x128xf32>
    %c0_33 = arith.constant 0 : index
    %c0_34 = arith.constant 0 : index
    %83 = vector.load %arg9[%c0_33, %c0_34] : memref<32x1xf32, #tpu.memory_space<vmem>>, vector<32x1xf32>
    %84 = vector.broadcast %83 : vector<32x1xf32> to vector<32x128xf32>
    %85 = arith.mulf %82, %84 : vector<32x128xf32>
    %c0_35 = arith.constant 0 : index
    %c0_36 = arith.constant 0 : index
    %86 = vector.load %arg10[%c0_35, %c0_36] : memref<32x1xf32, #tpu.memory_space<vmem>>, vector<32x1xf32>
    %87 = vector.broadcast %86 : vector<32x1xf32> to vector<32x128xf32>
    %88 = arith.addf %85, %87 : vector<32x128xf32>
    %cst_37 = arith.constant 5.000000e-01 : f32
    %89 = vector.broadcast %cst_37 : f32 to vector<32x128xf32>
    %90 = arith.mulf %89, %88 : vector<32x128xf32>
    %cst_38 = arith.constant 0.707106769 : f32
    %91 = vector.broadcast %cst_38 : f32 to vector<32x128xf32>
    %92 = arith.mulf %88, %91 : vector<32x128xf32>
    %93 = math.erf %92 : vector<32x128xf32>
    %cst_39 = arith.constant 1.000000e+00 : f32
    %94 = vector.broadcast %cst_39 : f32 to vector<32x128xf32>
    %95 = arith.addf %94, %93 : vector<32x128xf32>
    %96 = arith.mulf %90, %95 : vector<32x128xf32>
    %c0_40 = arith.constant 0 : index
    %c0_41 = arith.constant 0 : index
    %97 = vector.load %arg11[%c0_40, %c0_41] : memref<32x96xbf16, #tpu.memory_space<vmem>>, vector<32x96xbf16>
    %c1_i32_42 = arith.constant 1 : i32
    %98 = tpu.dynamic_rotate %96 by %c1_i32_42 dim 1 : vector<32x128xf32>, i32 -> vector<32x128xf32>
    %cst_43 = arith.constant 0.000000e+00 : f32
    %99 = vector.shape_cast %4 : vector<1x128xi1> to vector<1x128xi1>
    %100 = vector.broadcast %99 : vector<1x128xi1> to vector<32x128xi1>
    %101 = vector.broadcast %cst_43 : f32 to vector<32x128xf32>
    %102 = arith.select %100, %98, %101 : vector<32x128xi1>, vector<32x128xf32>
    %103 = arith.truncf %102 : vector<32x128xf32> to vector<32x128xbf16>
    %c127_i32_44 = arith.constant 127 : i32
    %104 = tpu.dynamic_rotate %96 by %c127_i32_44 dim 1 : vector<32x128xf32>, i32 -> vector<32x128xf32>
    %cst_45 = arith.constant 0.000000e+00 : f32
    %105 = vector.shape_cast %6 : vector<1x128xi1> to vector<1x128xi1>
    %106 = vector.broadcast %105 : vector<1x128xi1> to vector<32x128xi1>
    %107 = vector.broadcast %cst_45 : f32 to vector<32x128xf32>
    %108 = arith.select %106, %104, %107 : vector<32x128xi1>, vector<32x128xf32>
    %109 = arith.truncf %108 : vector<32x128xf32> to vector<32x128xbf16>
    %110 = arith.truncf %96 : vector<32x128xf32> to vector<32x128xbf16>
    %111 = tpu.concatenate %103, %110, %109 in 0 : vector<32x128xbf16>, vector<32x128xbf16>, vector<32x128xbf16> -> vector<96x128xbf16>
    %cst_46 = arith.constant dense<0.000000e+00> : vector<32x128xf32>
    %112 = tpu.matmul %97, %111, %cst_46 {dimension_numbers = #tpu.dot_dimension_numbers<[1], [0], [0], [1], [0, 0, 1, 1], [], []>} : vector<32x96xbf16>, vector<96x128xbf16>, vector<32x128xf32> -> vector<32x128xf32>
    %c0_47 = arith.constant 0 : index
    %c0_48 = arith.constant 0 : index
    %113 = vector.load %arg12[%c0_47, %c0_48] : memref<32x1xf32, #tpu.memory_space<vmem>>, vector<32x1xf32>
    %114 = vector.broadcast %113 : vector<32x1xf32> to vector<32x128xf32>
    %115 = arith.addf %112, %114 : vector<32x128xf32>
    %c0_49 = arith.constant 0 : index
    %c0_50 = arith.constant 0 : index
    %116 = vector.load %arg13[%c0_49, %c0_50] : memref<32x64xf32, #tpu.memory_space<vmem>>, vector<32x64xf32>
    %cst_51 = arith.constant dense<0.000000e+00> : vector<32x128xf32>
    %117 = tpu.matmul %116, %9, %cst_51 {dimension_numbers = #tpu.dot_dimension_numbers<[1], [0], [0], [1], [0, 0, 1, 1], [], []>} : vector<32x64xf32>, vector<64x128xf32>, vector<32x128xf32> -> vector<32x128xf32>
    %c0_52 = arith.constant 0 : index
    %c0_53 = arith.constant 0 : index
    %118 = vector.load %arg14[%c0_52, %c0_53] : memref<32x1xf32, #tpu.memory_space<vmem>>, vector<32x1xf32>
    %119 = vector.broadcast %118 : vector<32x1xf32> to vector<32x128xf32>
    %120 = arith.addf %117, %119 : vector<32x128xf32>
    %121 = arith.addf %120, %115 : vector<32x128xf32>
    %cst_54 = arith.constant 1.000000e+00 : f32
    %122 = vector.broadcast %cst_54 : f32 to vector<32x128xf32>
    %123 = arith.mulf %121, %122 : vector<32x128xf32>
    %c0_55 = arith.constant 0 : index
    %c0_56 = arith.constant 0 : index
    %c0_57 = arith.constant 0 : index
    %124 = vector.load %arg3[%c0_55, %c0_56, %c0_57] : memref<1x32x128xf32, #tpu.memory_space<vmem>>, vector<1x32x128xf32>
    %125 = vector.shape_cast %124 : vector<1x32x128xf32> to vector<32x128xf32>
    %126 = tpu.concatenate %123, %125 in 0 : vector<32x128xf32>, vector<32x128xf32> -> vector<64x128xf32>
    %cst_58 = arith.constant dense<0.000000e+00> : vector<64xf32>
    %127 = vector.multi_reduction <add>, %126, %cst_58 [1] : vector<64x128xf32> to vector<64xf32>
    %128 = vector.shape_cast %127 : vector<64xf32> to vector<64x1xf32>
    %cst_59 = arith.constant dense<0.000000e+00> : vector<1xf32>
    %129 = vector.multi_reduction <add>, %128, %cst_59 [0] : vector<64x1xf32> to vector<1xf32>
    %130 = vector.shape_cast %129 : vector<1xf32> to vector<1x1xf32>
    %cst_60 = arith.constant 1.22070313E-4 : f32
    %131 = vector.broadcast %cst_60 : f32 to vector<1x1xf32>
    %132 = arith.mulf %130, %131 : vector<1x1xf32>
    %133 = vector.broadcast %132 : vector<1x1xf32> to vector<64x128xf32>
    %134 = arith.subf %126, %133 : vector<64x128xf32>
    %135 = arith.mulf %134, %134 : vector<64x128xf32>
    %cst_61 = arith.constant dense<0.000000e+00> : vector<64xf32>
    %136 = vector.multi_reduction <add>, %135, %cst_61 [1] : vector<64x128xf32> to vector<64xf32>
    %137 = vector.shape_cast %136 : vector<64xf32> to vector<64x1xf32>
    %cst_62 = arith.constant dense<0.000000e+00> : vector<1xf32>
    %138 = vector.multi_reduction <add>, %137, %cst_62 [0] : vector<64x1xf32> to vector<1xf32>
    %139 = vector.shape_cast %138 : vector<1xf32> to vector<1x1xf32>
    %cst_63 = arith.constant 1.22070313E-4 : f32
    %140 = vector.broadcast %cst_63 : f32 to vector<1x1xf32>
    %141 = arith.mulf %139, %140 : vector<1x1xf32>
    %cst_64 = arith.constant 9.99999997E-7 : f32
    %142 = vector.broadcast %cst_64 : f32 to vector<1x1xf32>
    %143 = arith.addf %141, %142 : vector<1x1xf32>
    %144 = math.rsqrt %143 : vector<1x1xf32>
    %145 = vector.broadcast %144 : vector<1x1xf32> to vector<64x128xf32>
    %146 = arith.mulf %134, %145 : vector<64x128xf32>
    %c0_65 = arith.constant 0 : index
    %c0_66 = arith.constant 0 : index
    %147 = vector.load %arg15[%c0_65, %c0_66] : memref<64x1xf32, #tpu.memory_space<vmem>>, vector<64x1xf32>
    %148 = vector.broadcast %147 : vector<64x1xf32> to vector<64x128xf32>
    %149 = arith.mulf %146, %148 : vector<64x128xf32>
    %c0_67 = arith.constant 0 : index
    %c0_68 = arith.constant 0 : index
    %150 = vector.load %arg16[%c0_67, %c0_68] : memref<64x1xf32, #tpu.memory_space<vmem>>, vector<64x1xf32>
    %151 = vector.broadcast %150 : vector<64x1xf32> to vector<64x128xf32>
    %152 = arith.addf %149, %151 : vector<64x128xf32>
    %cst_69 = arith.constant 5.000000e-01 : f32
    %153 = vector.broadcast %cst_69 : f32 to vector<64x128xf32>
    %154 = arith.mulf %153, %152 : vector<64x128xf32>
    %cst_70 = arith.constant 0.707106769 : f32
    %155 = vector.broadcast %cst_70 : f32 to vector<64x128xf32>
    %156 = arith.mulf %152, %155 : vector<64x128xf32>
    %157 = math.erf %156 : vector<64x128xf32>
    %cst_71 = arith.constant 1.000000e+00 : f32
    %158 = vector.broadcast %cst_71 : f32 to vector<64x128xf32>
    %159 = arith.addf %158, %157 : vector<64x128xf32>
    %160 = arith.mulf %154, %159 : vector<64x128xf32>
    %c0_72 = arith.constant 0 : index
    %c0_73 = arith.constant 0 : index
    %161 = vector.load %arg17[%c0_72, %c0_73] : memref<32x192xbf16, #tpu.memory_space<vmem>>, vector<32x192xbf16>
    %c1_i32_74 = arith.constant 1 : i32
    %162 = tpu.dynamic_rotate %160 by %c1_i32_74 dim 1 : vector<64x128xf32>, i32 -> vector<64x128xf32>
    %cst_75 = arith.constant 0.000000e+00 : f32
    %163 = vector.shape_cast %4 : vector<1x128xi1> to vector<1x128xi1>
    %164 = vector.broadcast %163 : vector<1x128xi1> to vector<64x128xi1>
    %165 = vector.broadcast %cst_75 : f32 to vector<64x128xf32>
    %166 = arith.select %164, %162, %165 : vector<64x128xi1>, vector<64x128xf32>
    %167 = arith.truncf %166 : vector<64x128xf32> to vector<64x128xbf16>
    %c127_i32_76 = arith.constant 127 : i32
    %168 = tpu.dynamic_rotate %160 by %c127_i32_76 dim 1 : vector<64x128xf32>, i32 -> vector<64x128xf32>
    %cst_77 = arith.constant 0.000000e+00 : f32
    %169 = vector.shape_cast %6 : vector<1x128xi1> to vector<1x128xi1>
    %170 = vector.broadcast %169 : vector<1x128xi1> to vector<64x128xi1>
    %171 = vector.broadcast %cst_77 : f32 to vector<64x128xf32>
    %172 = arith.select %170, %168, %171 : vector<64x128xi1>, vector<64x128xf32>
    %173 = arith.truncf %172 : vector<64x128xf32> to vector<64x128xbf16>
    %174 = arith.truncf %160 : vector<64x128xf32> to vector<64x128xbf16>
    %175 = tpu.concatenate %167, %174, %173 in 0 : vector<64x128xbf16>, vector<64x128xbf16>, vector<64x128xbf16> -> vector<192x128xbf16>
    %cst_78 = arith.constant dense<0.000000e+00> : vector<32x128xf32>
    %176 = tpu.matmul %161, %175, %cst_78 {dimension_numbers = #tpu.dot_dimension_numbers<[1], [0], [0], [1], [0, 0, 1, 1], [], []>} : vector<32x192xbf16>, vector<192x128xbf16>, vector<32x128xf32> -> vector<32x128xf32>
    %c0_79 = arith.constant 0 : index
    %c0_80 = arith.constant 0 : index
    %177 = vector.load %arg18[%c0_79, %c0_80] : memref<32x1xf32, #tpu.memory_space<vmem>>, vector<32x1xf32>
    %178 = vector.broadcast %177 : vector<32x1xf32> to vector<32x128xf32>
    %179 = arith.addf %176, %178 : vector<32x128xf32>
    %cst_81 = arith.constant dense<0.000000e+00> : vector<32xf32>
    %180 = vector.multi_reduction <add>, %179, %cst_81 [1] : vector<32x128xf32> to vector<32xf32>
    %181 = vector.shape_cast %180 : vector<32xf32> to vector<32x1xf32>
    %cst_82 = arith.constant dense<0.000000e+00> : vector<1xf32>
    %182 = vector.multi_reduction <add>, %181, %cst_82 [0] : vector<32x1xf32> to vector<1xf32>
    %183 = vector.shape_cast %182 : vector<1xf32> to vector<1x1xf32>
    %cst_83 = arith.constant 2.44140625E-4 : f32
    %184 = vector.broadcast %cst_83 : f32 to vector<1x1xf32>
    %185 = arith.mulf %183, %184 : vector<1x1xf32>
    %186 = vector.broadcast %185 : vector<1x1xf32> to vector<32x128xf32>
    %187 = arith.subf %179, %186 : vector<32x128xf32>
    %188 = arith.mulf %187, %187 : vector<32x128xf32>
    %cst_84 = arith.constant dense<0.000000e+00> : vector<32xf32>
    %189 = vector.multi_reduction <add>, %188, %cst_84 [1] : vector<32x128xf32> to vector<32xf32>
    %190 = vector.shape_cast %189 : vector<32xf32> to vector<32x1xf32>
    %cst_85 = arith.constant dense<0.000000e+00> : vector<1xf32>
    %191 = vector.multi_reduction <add>, %190, %cst_85 [0] : vector<32x1xf32> to vector<1xf32>
    %192 = vector.shape_cast %191 : vector<1xf32> to vector<1x1xf32>
    %cst_86 = arith.constant 2.44140625E-4 : f32
    %193 = vector.broadcast %cst_86 : f32 to vector<1x1xf32>
    %194 = arith.mulf %192, %193 : vector<1x1xf32>
    %cst_87 = arith.constant 9.99999997E-7 : f32
    %195 = vector.broadcast %cst_87 : f32 to vector<1x1xf32>
    %196 = arith.addf %194, %195 : vector<1x1xf32>
    %197 = math.rsqrt %196 : vector<1x1xf32>
    %198 = vector.broadcast %197 : vector<1x1xf32> to vector<32x128xf32>
    %199 = arith.mulf %187, %198 : vector<32x128xf32>
    %c0_88 = arith.constant 0 : index
    %c0_89 = arith.constant 0 : index
    %200 = vector.load %arg19[%c0_88, %c0_89] : memref<32x1xf32, #tpu.memory_space<vmem>>, vector<32x1xf32>
    %201 = vector.broadcast %200 : vector<32x1xf32> to vector<32x128xf32>
    %202 = arith.mulf %199, %201 : vector<32x128xf32>
    %c0_90 = arith.constant 0 : index
    %c0_91 = arith.constant 0 : index
    %203 = vector.load %arg20[%c0_90, %c0_91] : memref<32x1xf32, #tpu.memory_space<vmem>>, vector<32x1xf32>
    %204 = vector.broadcast %203 : vector<32x1xf32> to vector<32x128xf32>
    %205 = arith.addf %202, %204 : vector<32x128xf32>
    %cst_92 = arith.constant 5.000000e-01 : f32
    %206 = vector.broadcast %cst_92 : f32 to vector<32x128xf32>
    %207 = arith.mulf %206, %205 : vector<32x128xf32>
    %cst_93 = arith.constant 0.707106769 : f32
    %208 = vector.broadcast %cst_93 : f32 to vector<32x128xf32>
    %209 = arith.mulf %205, %208 : vector<32x128xf32>
    %210 = math.erf %209 : vector<32x128xf32>
    %cst_94 = arith.constant 1.000000e+00 : f32
    %211 = vector.broadcast %cst_94 : f32 to vector<32x128xf32>
    %212 = arith.addf %211, %210 : vector<32x128xf32>
    %213 = arith.mulf %207, %212 : vector<32x128xf32>
    %c0_95 = arith.constant 0 : index
    %c0_96 = arith.constant 0 : index
    %214 = vector.load %arg21[%c0_95, %c0_96] : memref<32x96xbf16, #tpu.memory_space<vmem>>, vector<32x96xbf16>
    %c1_i32_97 = arith.constant 1 : i32
    %215 = tpu.dynamic_rotate %213 by %c1_i32_97 dim 1 : vector<32x128xf32>, i32 -> vector<32x128xf32>
    %cst_98 = arith.constant 0.000000e+00 : f32
    %216 = vector.shape_cast %4 : vector<1x128xi1> to vector<1x128xi1>
    %217 = vector.broadcast %216 : vector<1x128xi1> to vector<32x128xi1>
    %218 = vector.broadcast %cst_98 : f32 to vector<32x128xf32>
    %219 = arith.select %217, %215, %218 : vector<32x128xi1>, vector<32x128xf32>
    %220 = arith.truncf %219 : vector<32x128xf32> to vector<32x128xbf16>
    %c127_i32_99 = arith.constant 127 : i32
    %221 = tpu.dynamic_rotate %213 by %c127_i32_99 dim 1 : vector<32x128xf32>, i32 -> vector<32x128xf32>
    %cst_100 = arith.constant 0.000000e+00 : f32
    %222 = vector.shape_cast %6 : vector<1x128xi1> to vector<1x128xi1>
    %223 = vector.broadcast %222 : vector<1x128xi1> to vector<32x128xi1>
    %224 = vector.broadcast %cst_100 : f32 to vector<32x128xf32>
    %225 = arith.select %223, %221, %224 : vector<32x128xi1>, vector<32x128xf32>
    %226 = arith.truncf %225 : vector<32x128xf32> to vector<32x128xbf16>
    %227 = arith.truncf %213 : vector<32x128xf32> to vector<32x128xbf16>
    %228 = tpu.concatenate %220, %227, %226 in 0 : vector<32x128xbf16>, vector<32x128xbf16>, vector<32x128xbf16> -> vector<96x128xbf16>
    %cst_101 = arith.constant dense<0.000000e+00> : vector<32x128xf32>
    %229 = tpu.matmul %214, %228, %cst_101 {dimension_numbers = #tpu.dot_dimension_numbers<[1], [0], [0], [1], [0, 0, 1, 1], [], []>} : vector<32x96xbf16>, vector<96x128xbf16>, vector<32x128xf32> -> vector<32x128xf32>
    %c0_102 = arith.constant 0 : index
    %c0_103 = arith.constant 0 : index
    %230 = vector.load %arg22[%c0_102, %c0_103] : memref<32x1xf32, #tpu.memory_space<vmem>>, vector<32x1xf32>
    %231 = vector.broadcast %230 : vector<32x1xf32> to vector<32x128xf32>
    %232 = arith.addf %229, %231 : vector<32x128xf32>
    %c0_104 = arith.constant 0 : index
    %c0_105 = arith.constant 0 : index
    %233 = vector.load %arg23[%c0_104, %c0_105] : memref<32x64xf32, #tpu.memory_space<vmem>>, vector<32x64xf32>
    %cst_106 = arith.constant dense<0.000000e+00> : vector<32x128xf32>
    %234 = tpu.matmul %233, %126, %cst_106 {dimension_numbers = #tpu.dot_dimension_numbers<[1], [0], [0], [1], [0, 0, 1, 1], [], []>} : vector<32x64xf32>, vector<64x128xf32>, vector<32x128xf32> -> vector<32x128xf32>
    %c0_107 = arith.constant 0 : index
    %c0_108 = arith.constant 0 : index
    %235 = vector.load %arg24[%c0_107, %c0_108] : memref<32x1xf32, #tpu.memory_space<vmem>>, vector<32x1xf32>
    %236 = vector.broadcast %235 : vector<32x1xf32> to vector<32x128xf32>
    %237 = arith.addf %234, %236 : vector<32x128xf32>
    %238 = arith.addf %237, %232 : vector<32x128xf32>
    %cst_109 = arith.constant 1.000000e+00 : f32
    %239 = vector.broadcast %cst_109 : f32 to vector<32x128xf32>
    %240 = arith.mulf %238, %239 : vector<32x128xf32>
    %c0_110 = arith.constant 0 : index
    %c0_111 = arith.constant 0 : index
    %c0_112 = arith.constant 0 : index
    %241 = vector.load %arg4[%c0_110, %c0_111, %c0_112] : memref<1x16x128xf32, #tpu.memory_space<vmem>>, vector<1x16x128xf32>
    %242 = vector.shape_cast %241 : vector<1x16x128xf32> to vector<16x128xf32>
    %243 = tpu.concatenate %240, %242 in 0 : vector<32x128xf32>, vector<16x128xf32> -> vector<48x128xf32>
    %cst_113 = arith.constant dense<0.000000e+00> : vector<48xf32>
    %244 = vector.multi_reduction <add>, %243, %cst_113 [1] : vector<48x128xf32> to vector<48xf32>
    %245 = vector.shape_cast %244 : vector<48xf32> to vector<48x1xf32>
    %cst_114 = arith.constant dense<0.000000e+00> : vector<1xf32>
    %246 = vector.multi_reduction <add>, %245, %cst_114 [0] : vector<48x1xf32> to vector<1xf32>
    %247 = vector.shape_cast %246 : vector<1xf32> to vector<1x1xf32>
    %cst_115 = arith.constant 1.62760422E-4 : f32
    %248 = vector.broadcast %cst_115 : f32 to vector<1x1xf32>
    %249 = arith.mulf %247, %248 : vector<1x1xf32>
    %250 = vector.broadcast %249 : vector<1x1xf32> to vector<48x128xf32>
    %251 = arith.subf %243, %250 : vector<48x128xf32>
    %252 = arith.mulf %251, %251 : vector<48x128xf32>
    %cst_116 = arith.constant dense<0.000000e+00> : vector<48xf32>
    %253 = vector.multi_reduction <add>, %252, %cst_116 [1] : vector<48x128xf32> to vector<48xf32>
    %254 = vector.shape_cast %253 : vector<48xf32> to vector<48x1xf32>
    %cst_117 = arith.constant dense<0.000000e+00> : vector<1xf32>
    %255 = vector.multi_reduction <add>, %254, %cst_117 [0] : vector<48x1xf32> to vector<1xf32>
    %256 = vector.shape_cast %255 : vector<1xf32> to vector<1x1xf32>
    %cst_118 = arith.constant 1.62760422E-4 : f32
    %257 = vector.broadcast %cst_118 : f32 to vector<1x1xf32>
    %258 = arith.mulf %256, %257 : vector<1x1xf32>
    %cst_119 = arith.constant 9.99999997E-7 : f32
    %259 = vector.broadcast %cst_119 : f32 to vector<1x1xf32>
    %260 = arith.addf %258, %259 : vector<1x1xf32>
    %261 = math.rsqrt %260 : vector<1x1xf32>
    %262 = vector.broadcast %261 : vector<1x1xf32> to vector<48x128xf32>
    %263 = arith.mulf %251, %262 : vector<48x128xf32>
    %c0_120 = arith.constant 0 : index
    %c0_121 = arith.constant 0 : index
    %264 = vector.load %arg25[%c0_120, %c0_121] : memref<48x1xf32, #tpu.memory_space<vmem>>, vector<48x1xf32>
    %265 = vector.broadcast %264 : vector<48x1xf32> to vector<48x128xf32>
    %266 = arith.mulf %263, %265 : vector<48x128xf32>
    %c0_122 = arith.constant 0 : index
    %c0_123 = arith.constant 0 : index
    %267 = vector.load %arg26[%c0_122, %c0_123] : memref<48x1xf32, #tpu.memory_space<vmem>>, vector<48x1xf32>
    %268 = vector.broadcast %267 : vector<48x1xf32> to vector<48x128xf32>
    %269 = arith.addf %266, %268 : vector<48x128xf32>
    %cst_124 = arith.constant 5.000000e-01 : f32
    %270 = vector.broadcast %cst_124 : f32 to vector<48x128xf32>
    %271 = arith.mulf %270, %269 : vector<48x128xf32>
    %cst_125 = arith.constant 0.707106769 : f32
    %272 = vector.broadcast %cst_125 : f32 to vector<48x128xf32>
    %273 = arith.mulf %269, %272 : vector<48x128xf32>
    %274 = math.erf %273 : vector<48x128xf32>
    %cst_126 = arith.constant 1.000000e+00 : f32
    %275 = vector.broadcast %cst_126 : f32 to vector<48x128xf32>
    %276 = arith.addf %275, %274 : vector<48x128xf32>
    %277 = arith.mulf %271, %276 : vector<48x128xf32>
    %c0_127 = arith.constant 0 : index
    %c0_128 = arith.constant 0 : index
    %278 = vector.load %arg27[%c0_127, %c0_128] : memref<32x144xbf16, #tpu.memory_space<vmem>>, vector<32x144xbf16>
    %c1_i32_129 = arith.constant 1 : i32
    %279 = tpu.dynamic_rotate %277 by %c1_i32_129 dim 1 : vector<48x128xf32>, i32 -> vector<48x128xf32>
    %cst_130 = arith.constant 0.000000e+00 : f32
    %280 = vector.shape_cast %4 : vector<1x128xi1> to vector<1x128xi1>
    %281 = vector.broadcast %280 : vector<1x128xi1> to vector<48x128xi1>
    %282 = vector.broadcast %cst_130 : f32 to vector<48x128xf32>
    %283 = arith.select %281, %279, %282 : vector<48x128xi1>, vector<48x128xf32>
    %284 = arith.truncf %283 : vector<48x128xf32> to vector<48x128xbf16>
    %c127_i32_131 = arith.constant 127 : i32
    %285 = tpu.dynamic_rotate %277 by %c127_i32_131 dim 1 : vector<48x128xf32>, i32 -> vector<48x128xf32>
    %cst_132 = arith.constant 0.000000e+00 : f32
    %286 = vector.shape_cast %6 : vector<1x128xi1> to vector<1x128xi1>
    %287 = vector.broadcast %286 : vector<1x128xi1> to vector<48x128xi1>
    %288 = vector.broadcast %cst_132 : f32 to vector<48x128xf32>
    %289 = arith.select %287, %285, %288 : vector<48x128xi1>, vector<48x128xf32>
    %290 = arith.truncf %289 : vector<48x128xf32> to vector<48x128xbf16>
    %291 = arith.truncf %277 : vector<48x128xf32> to vector<48x128xbf16>
    %292 = tpu.concatenate %284, %291, %290 in 0 : vector<48x128xbf16>, vector<48x128xbf16>, vector<48x128xbf16> -> vector<144x128xbf16>
    %cst_133 = arith.constant dense<0.000000e+00> : vector<32x128xf32>
    %293 = tpu.matmul %278, %292, %cst_133 {dimension_numbers = #tpu.dot_dimension_numbers<[1], [0], [0], [1], [0, 0, 1, 1], [], []>} : vector<32x144xbf16>, vector<144x128xbf16>, vector<32x128xf32> -> vector<32x128xf32>
    %c0_134 = arith.constant 0 : index
    %c0_135 = arith.constant 0 : index
    %294 = vector.load %arg28[%c0_134, %c0_135] : memref<32x1xf32, #tpu.memory_space<vmem>>, vector<32x1xf32>
    %295 = vector.broadcast %294 : vector<32x1xf32> to vector<32x128xf32>
    %296 = arith.addf %293, %295 : vector<32x128xf32>
    %cst_136 = arith.constant dense<0.000000e+00> : vector<32xf32>
    %297 = vector.multi_reduction <add>, %296, %cst_136 [1] : vector<32x128xf32> to vector<32xf32>
    %298 = vector.shape_cast %297 : vector<32xf32> to vector<32x1xf32>
    %cst_137 = arith.constant dense<0.000000e+00> : vector<1xf32>
    %299 = vector.multi_reduction <add>, %298, %cst_137 [0] : vector<32x1xf32> to vector<1xf32>
    %300 = vector.shape_cast %299 : vector<1xf32> to vector<1x1xf32>
    %cst_138 = arith.constant 2.44140625E-4 : f32
    %301 = vector.broadcast %cst_138 : f32 to vector<1x1xf32>
    %302 = arith.mulf %300, %301 : vector<1x1xf32>
    %303 = vector.broadcast %302 : vector<1x1xf32> to vector<32x128xf32>
    %304 = arith.subf %296, %303 : vector<32x128xf32>
    %305 = arith.mulf %304, %304 : vector<32x128xf32>
    %cst_139 = arith.constant dense<0.000000e+00> : vector<32xf32>
    %306 = vector.multi_reduction <add>, %305, %cst_139 [1] : vector<32x128xf32> to vector<32xf32>
    %307 = vector.shape_cast %306 : vector<32xf32> to vector<32x1xf32>
    %cst_140 = arith.constant dense<0.000000e+00> : vector<1xf32>
    %308 = vector.multi_reduction <add>, %307, %cst_140 [0] : vector<32x1xf32> to vector<1xf32>
    %309 = vector.shape_cast %308 : vector<1xf32> to vector<1x1xf32>
    %cst_141 = arith.constant 2.44140625E-4 : f32
    %310 = vector.broadcast %cst_141 : f32 to vector<1x1xf32>
    %311 = arith.mulf %309, %310 : vector<1x1xf32>
    %cst_142 = arith.constant 9.99999997E-7 : f32
    %312 = vector.broadcast %cst_142 : f32 to vector<1x1xf32>
    %313 = arith.addf %311, %312 : vector<1x1xf32>
    %314 = math.rsqrt %313 : vector<1x1xf32>
    %315 = vector.broadcast %314 : vector<1x1xf32> to vector<32x128xf32>
    %316 = arith.mulf %304, %315 : vector<32x128xf32>
    %c0_143 = arith.constant 0 : index
    %c0_144 = arith.constant 0 : index
    %317 = vector.load %arg29[%c0_143, %c0_144] : memref<32x1xf32, #tpu.memory_space<vmem>>, vector<32x1xf32>
    %318 = vector.broadcast %317 : vector<32x1xf32> to vector<32x128xf32>
    %319 = arith.mulf %316, %318 : vector<32x128xf32>
    %c0_145 = arith.constant 0 : index
    %c0_146 = arith.constant 0 : index
    %320 = vector.load %arg30[%c0_145, %c0_146] : memref<32x1xf32, #tpu.memory_space<vmem>>, vector<32x1xf32>
    %321 = vector.broadcast %320 : vector<32x1xf32> to vector<32x128xf32>
    %322 = arith.addf %319, %321 : vector<32x128xf32>
    %cst_147 = arith.constant 5.000000e-01 : f32
    %323 = vector.broadcast %cst_147 : f32 to vector<32x128xf32>
    %324 = arith.mulf %323, %322 : vector<32x128xf32>
    %cst_148 = arith.constant 0.707106769 : f32
    %325 = vector.broadcast %cst_148 : f32 to vector<32x128xf32>
    %326 = arith.mulf %322, %325 : vector<32x128xf32>
    %327 = math.erf %326 : vector<32x128xf32>
    %cst_149 = arith.constant 1.000000e+00 : f32
    %328 = vector.broadcast %cst_149 : f32 to vector<32x128xf32>
    %329 = arith.addf %328, %327 : vector<32x128xf32>
    %330 = arith.mulf %324, %329 : vector<32x128xf32>
    %c0_150 = arith.constant 0 : index
    %c0_151 = arith.constant 0 : index
    %331 = vector.load %arg31[%c0_150, %c0_151] : memref<32x96xbf16, #tpu.memory_space<vmem>>, vector<32x96xbf16>
    %c1_i32_152 = arith.constant 1 : i32
    %332 = tpu.dynamic_rotate %330 by %c1_i32_152 dim 1 : vector<32x128xf32>, i32 -> vector<32x128xf32>
    %cst_153 = arith.constant 0.000000e+00 : f32
    %333 = vector.shape_cast %4 : vector<1x128xi1> to vector<1x128xi1>
    %334 = vector.broadcast %333 : vector<1x128xi1> to vector<32x128xi1>
    %335 = vector.broadcast %cst_153 : f32 to vector<32x128xf32>
    %336 = arith.select %334, %332, %335 : vector<32x128xi1>, vector<32x128xf32>
    %337 = arith.truncf %336 : vector<32x128xf32> to vector<32x128xbf16>
    %c127_i32_154 = arith.constant 127 : i32
    %338 = tpu.dynamic_rotate %330 by %c127_i32_154 dim 1 : vector<32x128xf32>, i32 -> vector<32x128xf32>
    %cst_155 = arith.constant 0.000000e+00 : f32
    %339 = vector.shape_cast %6 : vector<1x128xi1> to vector<1x128xi1>
    %340 = vector.broadcast %339 : vector<1x128xi1> to vector<32x128xi1>
    %341 = vector.broadcast %cst_155 : f32 to vector<32x128xf32>
    %342 = arith.select %340, %338, %341 : vector<32x128xi1>, vector<32x128xf32>
    %343 = arith.truncf %342 : vector<32x128xf32> to vector<32x128xbf16>
    %344 = arith.truncf %330 : vector<32x128xf32> to vector<32x128xbf16>
    %345 = tpu.concatenate %337, %344, %343 in 0 : vector<32x128xbf16>, vector<32x128xbf16>, vector<32x128xbf16> -> vector<96x128xbf16>
    %cst_156 = arith.constant dense<0.000000e+00> : vector<32x128xf32>
    %346 = tpu.matmul %331, %345, %cst_156 {dimension_numbers = #tpu.dot_dimension_numbers<[1], [0], [0], [1], [0, 0, 1, 1], [], []>} : vector<32x96xbf16>, vector<96x128xbf16>, vector<32x128xf32> -> vector<32x128xf32>
    %c0_157 = arith.constant 0 : index
    %c0_158 = arith.constant 0 : index
    %347 = vector.load %arg32[%c0_157, %c0_158] : memref<32x1xf32, #tpu.memory_space<vmem>>, vector<32x1xf32>
    %348 = vector.broadcast %347 : vector<32x1xf32> to vector<32x128xf32>
    %349 = arith.addf %346, %348 : vector<32x128xf32>
    %c0_159 = arith.constant 0 : index
    %c0_160 = arith.constant 0 : index
    %350 = vector.load %arg33[%c0_159, %c0_160] : memref<32x48xf32, #tpu.memory_space<vmem>>, vector<32x48xf32>
    %cst_161 = arith.constant dense<0.000000e+00> : vector<32x128xf32>
    %351 = tpu.matmul %350, %243, %cst_161 {dimension_numbers = #tpu.dot_dimension_numbers<[1], [0], [0], [1], [0, 0, 1, 1], [], []>} : vector<32x48xf32>, vector<48x128xf32>, vector<32x128xf32> -> vector<32x128xf32>
    %c0_162 = arith.constant 0 : index
    %c0_163 = arith.constant 0 : index
    %352 = vector.load %arg34[%c0_162, %c0_163] : memref<32x1xf32, #tpu.memory_space<vmem>>, vector<32x1xf32>
    %353 = vector.broadcast %352 : vector<32x1xf32> to vector<32x128xf32>
    %354 = arith.addf %351, %353 : vector<32x128xf32>
    %355 = arith.addf %354, %349 : vector<32x128xf32>
    %cst_164 = arith.constant 1.000000e+00 : f32
    %356 = vector.broadcast %cst_164 : f32 to vector<32x128xf32>
    %357 = arith.mulf %355, %356 : vector<32x128xf32>
    %c0_165 = arith.constant 0 : index
    %c0_166 = arith.constant 0 : index
    %c0_167 = arith.constant 0 : index
    %358 = vector.load %arg35[%c0_165, %c0_166, %c0_167] : memref<1x32x128xf32, #tpu.memory_space<vmem>>, vector<1x32x128xf32>
    %359 = vector.shape_cast %358 : vector<1x32x128xf32> to vector<32x128xf32>
    %360 = vector.shape_cast %357 : vector<32x128xf32> to vector<1x32x128xf32>
    tpu.vector_store %arg35[%c0_165, %c0_166, %c0_167], %360 {strides = array<i32>} : memref<1x32x128xf32, #tpu.memory_space<vmem>>, vector<1x32x128xf32>,
    return
  }
  func.func @transform_0(%arg0: i32) -> (i32, i32, i32) {
    %c0_i32 = arith.constant 0 : i32
    %c0_i32_0 = arith.constant 0 : i32
    %c0_i32_1 = arith.constant 0 : i32
    return %arg0, %c0_i32, %c0_i32_0 : i32, i32, i32
  }
  func.func @transform_1(%arg0: i32) -> (i32, i32, i32) {
    %c0_i32 = arith.constant 0 : i32
    %c0_i32_0 = arith.constant 0 : i32
    %c0_i32_1 = arith.constant 0 : i32
    return %arg0, %c0_i32, %c0_i32_0 : i32, i32, i32
  }
  func.func @transform_2(%arg0: i32) -> (i32, i32, i32) {
    %c0_i32 = arith.constant 0 : i32
    %c0_i32_0 = arith.constant 0 : i32
    %c0_i32_1 = arith.constant 0 : i32
    return %arg0, %c0_i32, %c0_i32_0 : i32, i32, i32
  }
  func.func @transform_3(%arg0: i32) -> (i32, i32, i32) {
    %c0_i32 = arith.constant 0 : i32
    %c0_i32_0 = arith.constant 0 : i32
    %c0_i32_1 = arith.constant 0 : i32
    return %arg0, %c0_i32, %c0_i32_0 : i32, i32, i32
  }
  func.func @transform_4(%arg0: i32) -> (i32, i32) {
    %c0_i32 = arith.constant 0 : i32
    %c0_i32_0 = arith.constant 0 : i32
    %c0_i32_1 = arith.constant 0 : i32
    return %c0_i32, %c0_i32_0 : i32, i32
  }
  func.func @transform_5(%arg0: i32) -> (i32, i32) {
    %c0_i32 = arith.constant 0 : i32
    %c0_i32_0 = arith.constant 0 : i32
    %c0_i32_1 = arith.constant 0 : i32
    return %c0_i32, %c0_i32_0 : i32, i32
  }
  func.func @transform_6(%arg0: i32) -> (i32, i32) {
    %c0_i32 = arith.constant 0 : i32
    %c0_i32_0 = arith.constant 0 : i32
    %c0_i32_1 = arith.constant 0 : i32
    return %c0_i32, %c0_i32_0 : i32, i32
  }
  func.func @transform_7(%arg0: i32) -> (i32, i32) {
    %c0_i32 = arith.constant 0 : i32
    %c0_i32_0 = arith.constant 0 : i32
    %c0_i32_1 = arith.constant 0 : i32
    return %c0_i32, %c0_i32_0 : i32, i32
  }
  func.func @transform_8(%arg0: i32) -> (i32, i32) {
    %c0_i32 = arith.constant 0 : i32
    %c0_i32_0 = arith.constant 0 : i32
    %c0_i32_1 = arith.constant 0 : i32
    return %c0_i32, %c0_i32_0 : i32, i32
  }
  func.func @transform_9(%arg0: i32) -> (i32, i32) {
    %c0_i32 = arith.constant 0 : i32
    %c0_i32_0 = arith.constant 0 : i32
    %c0_i32_1 = arith.constant 0 : i32
    return %c0_i32, %c0_i32_0 : i32, i32
  }
  func.func @transform_10(%arg0: i32) -> (i32, i32) {
    %c0_i32 = arith.constant 0 : i32
    %c0_i32_0 = arith.constant 0 : i32
    %c0_i32_1 = arith.constant 0 : i32
    return %c0_i32, %c0_i32_0 : i32, i32
  }
  func.func @transform_11(%arg0: i32) -> (i32, i32) {
    %c0_i32 = arith.constant 0 : i32
    %c0_i32_0 = arith.constant 0 : i32
    %c0_i32_1 = arith.constant 0 : i32
    return %c0_i32, %c0_i32_0 : i32, i32
  }
  func.func @transform_12(%arg0: i32) -> (i32, i32) {
    %c0_i32 = arith.constant 0 : i32
    %c0_i32_0 = arith.constant 0 : i32
    %c0_i32_1 = arith.constant 0 : i32
    return %c0_i32, %c0_i32_0 : i32, i32
  }
  func.func @transform_13(%arg0: i32) -> (i32, i32) {
    %c0_i32 = arith.constant 0 : i32
    %c0_i32_0 = arith.constant 0 : i32
    %c0_i32_1 = arith.constant 0 : i32
    return %c0_i32, %c0_i32_0 : i32, i32
  }
  func.func @transform_14(%arg0: i32) -> (i32, i32) {
    %c0_i32 = arith.constant 0 : i32
    %c0_i32_0 = arith.constant 0 : i32
    %c0_i32_1 = arith.constant 0 : i32
    return %c0_i32, %c0_i32_0 : i32, i32
  }
  func.func @transform_15(%arg0: i32) -> (i32, i32) {
    %c0_i32 = arith.constant 0 : i32
    %c0_i32_0 = arith.constant 0 : i32
    %c0_i32_1 = arith.constant 0 : i32
    return %c0_i32, %c0_i32_0 : i32, i32
  }
  func.func @transform_16(%arg0: i32) -> (i32, i32) {
    %c0_i32 = arith.constant 0 : i32
    %c0_i32_0 = arith.constant 0 : i32
    %c0_i32_1 = arith.constant 0 : i32
    return %c0_i32, %c0_i32_0 : i32, i32
  }
  func.func @transform_17(%arg0: i32) -> (i32, i32) {
    %c0_i32 = arith.constant 0 : i32
    %c0_i32_0 = arith.constant 0 : i32
    %c0_i32_1 = arith.constant 0 : i32
    return %c0_i32, %c0_i32_0 : i32, i32
  }
  func.func @transform_18(%arg0: i32) -> (i32, i32) {
    %c0_i32 = arith.constant 0 : i32
    %c0_i32_0 = arith.constant 0 : i32
    %c0_i32_1 = arith.constant 0 : i32
    return %c0_i32, %c0_i32_0 : i32, i32
  }
  func.func @transform_19(%arg0: i32) -> (i32, i32) {
    %c0_i32 = arith.constant 0 : i32
    %c0_i32_0 = arith.constant 0 : i32
    %c0_i32_1 = arith.constant 0 : i32
    return %c0_i32, %c0_i32_0 : i32, i32
  }
  func.func @transform_20(%arg0: i32) -> (i32, i32) {
    %c0_i32 = arith.constant 0 : i32
    %c0_i32_0 = arith.constant 0 : i32
    %c0_i32_1 = arith.constant 0 : i32
    return %c0_i32, %c0_i32_0 : i32, i32
  }
  func.func @transform_21(%arg0: i32) -> (i32, i32) {
    %c0_i32 = arith.constant 0 : i32
    %c0_i32_0 = arith.constant 0 : i32
    %c0_i32_1 = arith.constant 0 : i32
    return %c0_i32, %c0_i32_0 : i32, i32
  }
  func.func @transform_22(%arg0: i32) -> (i32, i32) {
    %c0_i32 = arith.constant 0 : i32
    %c0_i32_0 = arith.constant 0 : i32
    %c0_i32_1 = arith.constant 0 : i32
    return %c0_i32, %c0_i32_0 : i32, i32
  }
  func.func @transform_23(%arg0: i32) -> (i32, i32) {
    %c0_i32 = arith.constant 0 : i32
    %c0_i32_0 = arith.constant 0 : i32
    %c0_i32_1 = arith.constant 0 : i32
    return %c0_i32, %c0_i32_0 : i32, i32
  }
  func.func @transform_24(%arg0: i32) -> (i32, i32) {
    %c0_i32 = arith.constant 0 : i32
    %c0_i32_0 = arith.constant 0 : i32
    %c0_i32_1 = arith.constant 0 : i32
    return %c0_i32, %c0_i32_0 : i32, i32
  }
  func.func @transform_25(%arg0: i32) -> (i32, i32) {
    %c0_i32 = arith.constant 0 : i32
    %c0_i32_0 = arith.constant 0 : i32
    %c0_i32_1 = arith.constant 0 : i32
    return %c0_i32, %c0_i32_0 : i32, i32
  }
  func.func @transform_26(%arg0: i32) -> (i32, i32) {
    %c0_i32 = arith.constant 0 : i32
    %c0_i32_0 = arith.constant 0 : i32
    %c0_i32_1 = arith.constant 0 : i32
    return %c0_i32, %c0_i32_0 : i32, i32
  }
  func.func @transform_27(%arg0: i32) -> (i32, i32) {
    %c0_i32 = arith.constant 0 : i32
    %c0_i32_0 = arith.constant 0 : i32
    %c0_i32_1 = arith.constant 0 : i32
    return %c0_i32, %c0_i32_0 : i32, i32
  }
  func.func @transform_28(%arg0: i32) -> (i32, i32) {
    %c0_i32 = arith.constant 0 : i32
    %c0_i32_0 = arith.constant 0 : i32
    %c0_i32_1 = arith.constant 0 : i32
    return %c0_i32, %c0_i32_0 : i32, i32
  }
  func.func @transform_29(%arg0: i32) -> (i32, i32) {
    %c0_i32 = arith.constant 0 : i32
    %c0_i32_0 = arith.constant 0 : i32
    %c0_i32_1 = arith.constant 0 : i32
    return %c0_i32, %c0_i32_0 : i32, i32
  }
  func.func @transform_30(%arg0: i32) -> (i32, i32) {
    %c0_i32 = arith.constant 0 : i32
    %c0_i32_0 = arith.constant 0 : i32
    %c0_i32_1 = arith.constant 0 : i32
    return %c0_i32, %c0_i32_0 : i32, i32
  }
  func.func @transform_31(%arg0: i32) -> (i32, i32) {
    %c0_i32 = arith.constant 0 : i32
    %c0_i32_0 = arith.constant 0 : i32
    %c0_i32_1 = arith.constant 0 : i32
    return %c0_i32, %c0_i32_0 : i32, i32
  }
  func.func @transform_32(%arg0: i32) -> (i32, i32) {
    %c0_i32 = arith.constant 0 : i32
    %c0_i32_0 = arith.constant 0 : i32
    %c0_i32_1 = arith.constant 0 : i32
    return %c0_i32, %c0_i32_0 : i32, i32
  }
  func.func @transform_33(%arg0: i32) -> (i32, i32) {
    %c0_i32 = arith.constant 0 : i32
    %c0_i32_0 = arith.constant 0 : i32
    %c0_i32_1 = arith.constant 0 : i32
    return %c0_i32, %c0_i32_0 : i32, i32
  }
  func.func @transform_34(%arg0: i32) -> (i32, i32, i32) {
    %c0_i32 = arith.constant 0 : i32
    %c0_i32_0 = arith.constant 0 : i32
    %c0_i32_1 = arith.constant 0 : i32
    return %arg0, %c0_i32, %c0_i32_0 : i32, i32, i32
  }
}

</mosaic_0001>

<bundles_post_ra>
// kernel: up_block_1d_noskip.1
= control target key start
LH: loop header
LB: loop body
LE: loop exit
PB: predicated region body
PF: predicated region fallthrough
CT: control target
= control target key end

     0   :  { %s4291_s6 = smov 1   ;;  %s4292_s10 = smov 2   ;;  %s5181_s0 = inlined_call_operand.smem [shape: u32[35], index: -1, kind: input, shape index: {}] }
   0x1   :  { %s4339_s5 = sld [smem:[%s5181_s0]]   ;;  %s4293_s14 = smov 3  }
   0x2   :  { %s4344_s9 = sld [smem:[%s5181_s0 + %s4291_s6]]   ;;  %s4294_s18 = smov 4  }
   0x3   :  { %s4349_s13 = sld [smem:[%s5181_s0 + %s4292_s10]]   ;;  %s4295_s22 = smov 5  }
   0x4   :  { %s4354_s17 = sld [smem:[%s5181_s0 + %s4293_s14]]   ;;  %s4296_s26 = smov 6  }
   0x5   :  { %s4359_s21 = sld [smem:[%s5181_s0 + %s4294_s18]]   ;;  %s4297_s30 = smov 7  }
   0x6   :  { %s4364_s25 = sld [smem:[%s5181_s0 + %s4295_s22]]   ;;  %s4298_s4 = smov 8  }
   0x7   :  { %5222 = sst [smem:[#allocation5_spill]] %s4339_s5  ;;  %s4299_s10 = smov 9  }
   0x8   :  { %5223 = sst [smem:[#allocation6_spill]] %s4344_s9  ;;  %s4300_s15 = smov 10  }
   0x9   :  { %s4369_s29 = sld [smem:[%s5181_s0 + %s4296_s26]]   ;;  %s4301_s20 = smov 11  }
   0xa   :  { %5224 = sst [smem:[#allocation7_spill]] %s4354_s17  ;;  %s4302_s26 = smov 12  }
   0xb   :  { %s4374_s3 = sld [smem:[%s5181_s0 + %s4297_s30]]   ;;  %s4303_s1 = smov 13  }
   0xc   :  { %s4379_s8 = sld [smem:[%s5181_s0 + %s4298_s4]]   ;;  %s4304_s7 = smov 14  }
   0xd   :  { %s4384_s14 = sld [smem:[%s5181_s0 + %s4299_s10]]   ;;  %s4306_s22 = smov 16  }
   0xe   :  { %s4389_s19 = sld [smem:[%s5181_s0 + %s4300_s15]]   ;;  %s4305_s15 = smov 15  }
   0xf   :  { %s4394_s24 = sld [smem:[%s5181_s0 + %s4301_s20]]   ;;  %s4307_s28 = smov 17  }
  0x10   :  { %s4399_s30 = sld [smem:[%s5181_s0 + %s4302_s26]]  }
  0x11   :  { %5225 = sst [smem:[#allocation8_spill]] %s4374_s3 }
  0x12   :  { %5226 = sst [smem:[#allocation9_spill]] %s4379_s8 }
  0x13   :  { %s4404_s6 = sld [smem:[%s5181_s0 + %s4303_s1]]  }
  0x14   :  { %s4409_s12 = sld [smem:[%s5181_s0 + %s4304_s7]]   ;;  %s4308_s7 = smov 18  }
  0x15   :  { %s4414_s20 = sld [smem:[%s5181_s0 + %s4305_s15]]   ;;  %s4309_s15 = smov 19  }
  0x16   :  { %s4419_s27 = sld [smem:[%s5181_s0 + %s4306_s22]]   ;;  %s4310_s22 = smov 20  }
  0x17   :  { %s4424_s4 = sld [smem:[%s5181_s0 + %s4307_s28]]   ;;  %s4311_s28 = smov 21  }
  0x18   :  { %s4429_s17 = sld [smem:[%s5181_s0 + %s4308_s7]]   ;;  %s4312_s7 = smov 22  }
  0x19   :  { %5227 = sst [smem:[#allocation10_spill]] %s4404_s6 }
  0x1a   :  { %5228 = sst [smem:[#allocation11_spill]] %s4409_s12 }
  0x1b   :  { %5229 = sst [smem:[#allocation12_spill]] %s4414_s20 }
  0x1c   :  { %5230 = sst [smem:[#allocation13_spill]] %s4419_s27 }
  0x1d   :  { %5231 = sst [smem:[#allocation14_spill]] %s4424_s4 }
  0x1e   :  { %5232 = sst [smem:[#allocation15_spill]] %s4429_s17 }
  0x1f   :  { %s4434_s20 = sld [smem:[%s5181_s0 + %s4309_s15]]   ;;  %s4313_s15 = smov 23  }
  0x20   :  { %s4439_s27 = sld [smem:[%s5181_s0 + %s4310_s22]]   ;;  %s4314_s22 = smov 24  }
  0x21   :  { %s4444_s4 = sld [smem:[%s5181_s0 + %s4311_s28]]   ;;  %s4315_s28 = smov 25  }
  0x22   :  { %s4449_s17 = sld [smem:[%s5181_s0 + %s4312_s7]]   ;;  %s4316_s7 = smov 26  }
  0x25   :  { %5233 = sst [smem:[#allocation16_spill]] %s4434_s20 }
  0x26   :  { %5234 = sst [smem:[#allocation17_spill]] %s4439_s27 }
  0x27   :  { %5235 = sst [smem:[#allocation18_spill]] %s4444_s4 }
  0x28   :  { %5236 = sst [smem:[#allocation19_spill]] %s4449_s17 }
  0x29   :  { %s4454_s20 = sld [smem:[%s5181_s0 + %s4313_s15]]   ;;  %s4317_s15 = smov 27  }
  0x2a   :  { %s4459_s27 = sld [smem:[%s5181_s0 + %s4314_s22]]   ;;  %s4318_s22 = smov 28  }
  0x2b   :  { %s4464_s4 = sld [smem:[%s5181_s0 + %s4315_s28]]   ;;  %s4319_s28 = smov 29  }
  0x2c   :  { %s4469_s17 = sld [smem:[%s5181_s0 + %s4316_s7]]   ;;  %s4320_s7 = smov 30  }
  0x2f   :  { %5237 = sst [smem:[#allocation20_spill]] %s4454_s20 }
  0x30   :  { %5238 = sst [smem:[#allocation21_spill]] %s4459_s27 }
  0x31   :  { %5239 = sst [smem:[#allocation22_spill]] %s4464_s4 }
  0x32   :  { %5240 = sst [smem:[#allocation23_spill]] %s4469_s17 }
  0x33   :  { %s4474_s20 = sld [smem:[%s5181_s0 + %s4317_s15]]   ;;  %s4321_s15 = smov 31  }
  0x34   :  { %s4479_s27 = sld [smem:[%s5181_s0 + %s4318_s22]]   ;;  %s4322_s22 = smov 32  }
  0x35   :  { %s4484_s4 = sld [smem:[%s5181_s0 + %s4319_s28]]   ;;  %s4323_s28 = smov 33  }
  0x36   :  { %s4489_s17 = sld [smem:[%s5181_s0 + %s4320_s7]]   ;;  %s4324_s7 = smov 34  }
  0x39   :  { %5241 = sst [smem:[#allocation24_spill]] %s4474_s20 }
  0x3a   :  { %5242 = sst [smem:[#allocation25_spill]] %s4479_s27 }
  0x3b   :  { %5243 = sst [smem:[#allocation26_spill]] %s4484_s4 }
  0x3c   :  { %5244 = sst [smem:[#allocation27_spill]] %s4489_s17 }
  0x3d   :  { %s4494_s20 = sld [smem:[%s5181_s0 + %s4321_s15]]  }
  0x3e   :  { %s4499_s27 = sld [smem:[%s5181_s0 + %s4322_s22]]  }
  0x3f   :  { %s4504_s4 = sld [smem:[%s5181_s0 + %s4323_s28]]  }
  0x40   :  { %s4509_s17 = sld [smem:[%s5181_s0 + %s4324_s7]]  }
  0x45   :  { %5245 = sst [smem:[#allocation28_spill]] %s4504_s4 }
  0x46   :  { %74 = vsyncpa [#allocation3], 0 }
  0x47   :  { %76 = vsyncpa [#allocation3 + $0x1], 0  ;;  %s4511_s15 = smov 0   ;;  %s4513_s16 = smov 0  }
  0x48   :  { %s4515_s18 = smov 0   ;;  %s4517_s22 = smov 0  }
  0x49 LB: > { %s5246_s12 = sld [smem:[#allocation11_spill]]  ;;  %s4532_s0 = sadd.s32 4294967295, %s4289_s22   ;;  %s4277_s15 = sphi %s4511_s15, %s5279_s15   ;;  %s4289_s22 = sphi %s4517_s22, %s5282_s22   ;;  %s4285_s18 = sphi %s4515_s18, %s5281_s18   ;;  %s4281_s16 = sphi %s4513_s16, %s5280_s16  }
  0x4a   : > { %s5247_s4 = sld [smem:[#allocation28_spill]]  ;;  %s3538_s23 = sadd.s32 4294967294, %s4289_s22  }
  0x4b   : > { %s5248_s8 = sld [smem:[#allocation9_spill]]  ;;  %s4536_s26 = sadd.s32 1, %s4289_s22  }
  0x4c   : > { %s5249_s6 = sld [smem:[#allocation10_spill]]  ;;  %s823_s28 = sadd.s32 1, %s4285_s18 }
  0x4d   : > { %s5250_s3 = sld [smem:[#allocation8_spill]]  ;;  %s820_s1 = ssub.s32 %s4289_s22, %s4536_s26 }
  0x4e   : > { %p833_p0 = scmp.ne.s32.totalorder %s4285_s18, %s4281_s16  ;;  %p821_p1 = scmp.eq.s32.totalorder %s820_s1, 0 }
  0x4f   : > { %p834_p2 = scmp.eq.s32.totalorder %s4532_s0, 1  ;;  %p839_p3 = scmp.ne.s32.totalorder %s4281_s16, %s4277_s15 }
  0x50   : > { %p840_p4 = scmp.eq.s32.totalorder %s3538_s23, 1  ;;  %p3541_p7 = scmp.ge.s32.totalorder %s4289_s22, 1 }
  0x51   : > { %s4547_s2 = scalar_select %p821_p1, %s4285_s18, %s823_s28  }
  0x52   : > { %p4549_p5 = por %p834_p2, %p833_p0  ;;  %p4553_p6 = por %p840_p4, %p839_p3 }
  0x53   : > { %p980_p8 = scmp.lt.s32.totalorder %s4289_s22, 3 }
  0x55   : > { %p981_p9 = pnand %p3541_p7, %p980_p8 }
  0x56   : > { %s5253_s5 = sld [smem:[#allocation5_spill]] (!%p981_p9)  ;;  %p1081_p10 = scmp.lt.s32.totalorder (!%p981_p9), %s4532_s0, 1 }
  0x57   : > { %984 = sbr.rel (%p981_p9) target bundleno = 4621 (0x120d), region = 156  ;;  %s5254_s9 = sld [smem:[#allocation6_spill]] (!%p981_p9) }
  0x5c   : > { %s4561_s11 = scalar_select %p1081_p10, %s4532_s0, 1  ;;  %v4325_v8 = vmov 0   ;;  %v1207_v45 = vld [vmem:[%s4359_s21 + $0x38] sm:$0xff]  ;;  %v1262_v46 = vld [vmem:[%s4364_s25 + $0x30] sm:$0xff]  ;;  %v1204_v49 = vld [vmem:[%s4359_s21 + $0x20] sm:$0xff]  ;;  %vm1462_vm0 = vcmask 523264  }
  0x5d   : > { %3952 = vset.pattern.permute.xlu1 %v4325_v8  ;;  %3951 = vset.pattern.permute.xlu0 %v4325_v8  ;;  %v1263_v47 = vld [vmem:[%s4364_s25 + $0x38] sm:$0xff]  ;;  %v1206_v48 = vld [vmem:[%s4359_s21 + $0x30] sm:$0xff]  ;;  %v1205_v51 = vld [vmem:[%s4359_s21 + $0x28] sm:$0xff]  ;;  %vm1712_vm5 = vcmask 785408   ;;  %vm2953_vm6 = vcmask 130048   ;;  %vm3286_vm7 = vcmask 392192  }
  0x5e   : > { %s4564_s23 = sshll.u32 %s4561_s11, 5  ;;  %1469 = vmatprep.subr.bf16.mxu0 %v4325_v8  ;;  %v1203_v50 = vld [vmem:[%s4359_s21 + $0x18] sm:$0xff]  ;;  %v1201_v53 = vld [vmem:[%s4359_s21 + $0x8] sm:$0xff]  ;;  %v1260_v57 = vld [vmem:[%s4364_s25 + $0x20] sm:$0xff] }
  0x5f   : > { %s4568_s28 = scalar_lea.vmem %s5253_s5, %s4564_s23  ;;  %s1090_s1 = scalar_lea.vmem %s5254_s9, %s4564_s23  ;;  %v1259_v52 = vld [vmem:[%s4364_s25 + $0x18] sm:$0xff]  ;;  %v1257_v54 = vld [vmem:[%s4364_s25 + $0x8] sm:$0xff]  ;;  %v1202_v59 = vld [vmem:[%s4359_s21 + $0x10] sm:$0xff] }
  0x60   : > { %v1102_v0 = vld [vmem:[%s4568_s28] sm:$0xff]  ;;  %v4572_v1 = vld [vmem:[%s4568_s28 + $0x10] sm:$0xff]  ;;  %v4576_v2 = vld [vmem:[%s4568_s28 + $0x8] sm:$0xff]  ;;  %s5201_s5 = smov 127  }
  0x61   : > { %1114 = vadd.xlane.f32.xlu0 %v1102_v0  ;;  %1118 = vadd.xlane.f32.xlu1 %v4572_v1  ;;  %v4579_v3 = vld [vmem:[%s4568_s28 + $0x18] sm:$0xff]  ;;  %v4585_v4 = vld [vmem:[%s1090_s1] sm:$0xff]  ;;  %v4587_v5 = vld [vmem:[%s1090_s1 + $0x8] sm:$0xff] }
  0x62   : > { %v4591_v6 = vld [vmem:[%s1090_s1 + $0x10] sm:$0xff]  ;;  %v4593_v7 = vld [vmem:[%s1090_s1 + $0x18] sm:$0xff]  ;;  %v1261_v58 = vld [vmem:[%s4364_s25 + $0x28] sm:$0xff]  ;;  %s5199_s1 = smov 1  }
  0x63   : > { %v1258_v60 = vld [vmem:[%s4364_s25 + $0x10] sm:$0xff]  ;;  %v1200_v61 = vld [vmem:[%s4359_s21] sm:$0xff] }
  0x64   : > { %v1256_v62 = vld [vmem:[%s4364_s25] sm:$0xff] }
  0x65   : > { %1116 = vadd.xlane.f32.xlu0 %v4576_v2  ;;  %1120 = vadd.xlane.f32.xlu1 %v4579_v3 }
  0x69   : > { %1122 = vadd.xlane.f32.xlu0 %v4585_v4  ;;  %1124 = vadd.xlane.f32.xlu1 %v4587_v5 }
  0x6d   : > { %1126 = vadd.xlane.f32.xlu0 %v4591_v6  ;;  %1128 = vadd.xlane.f32.xlu1 %v4593_v7 }
  0xea   : > { %v1115_v9 = vpop.xlane.xlu0 %1114  ;;  %v1119_v10 = vpop.xlane.xlu1 %1118 }
  0xee   : > { %v1117_v11 = vpop.xlane.xlu0 %1116  ;;  %v1121_v12 = vpop.xlane.xlu1 %1120 }
  0xef   : > { %v1130_v13 = vadd.f32 %v1117_v11, %v1115_v9 }
  0xf1   : > { %v1131_v14 = vadd.f32 %v1130_v13, %v1119_v10 }
  0xf2   : > { %v1123_v15 = vpop.xlane.xlu0 %1122  ;;  %v1125_v16 = vpop.xlane.xlu1 %1124 }
  0xf3   : > { %v1132_v17 = vadd.f32 %v1131_v14, %v1121_v12 }
  0xf5   : > { %v1133_v18 = vadd.f32 %v1132_v17, %v1123_v15 }
  0xf6   : > { %v1127_v19 = vpop.xlane.xlu0 %1126  ;;  %v1129_v21 = vpop.xlane.xlu1 %1128 }
  0xf7   : > { %v1134_v20 = vadd.f32 %v1133_v18, %v1125_v16 }
  0xf9   : > { %v1135_v22 = vadd.f32 %v1134_v20, %v1127_v19 }
  0xfb   : > { %v1136_v23 = vadd.f32 %v1135_v22, %v1129_v21 }
  0xfd   : > { %v1137_v24 = vrot.slane %v1136_v23, 4 }
  0xff   : > { %v1138_v25 = vadd.f32 %v1137_v24, %v1136_v23 }
 0x101   : > { %v1139_v26 = vrot.slane %v1138_v25, 2 }
 0x103   : > { %v1140_v27 = vadd.f32 %v1139_v26, %v1138_v25 }
 0x105   : > { %v1141_v28 = vrot.slane %v1140_v27, 1 }
 0x107   : > { %v1142_v29 = vadd.f32 %v1141_v28, %v1140_v27 }
 0x109   : > { %v1143_v30 = vmul.f32 0.00012207031, %v1142_v29 }
 0x10b   : > { %v4601_v31 = vsub.f32 %v4576_v2, %v1143_v30  ;;  %v4603_v32 = vsub.f32 %v1102_v0, %v1143_v30  ;;  %v4610_v35 = vsub.f32 %v4579_v3, %v1143_v30  ;;  %v4613_v36 = vsub.f32 %v4572_v1, %v1143_v30 }
 0x10c   : > { %v4620_v39 = vsub.f32 %v4587_v5, %v1143_v30  ;;  %v4623_v40 = vsub.f32 %v4585_v4, %v1143_v30  ;;  %v4630_v43 = vsub.f32 %v4591_v6, %v1143_v30  ;;  %v1151_v55 = vsub.f32 %v4593_v7, %v1143_v30 }
 0x10d   : > { %v1153_v33 = vmul.f32 %v4601_v31, %v4601_v31  ;;  %v1152_v34 = vmul.f32 %v4603_v32, %v4603_v32  ;;  %v1155_v37 = vmul.f32 %v4610_v35, %v4610_v35  ;;  %v1154_v38 = vmul.f32 %v4613_v36, %v4613_v36 }
 0x10e   : > { %v1157_v41 = vmul.f32 %v4620_v39, %v4620_v39  ;;  %v1156_v42 = vmul.f32 %v4623_v40, %v4623_v40  ;;  %v1158_v44 = vmul.f32 %v4630_v43, %v4630_v43  ;;  %v1159_v56 = vmul.f32 %v1151_v55, %v1151_v55 }
 0x10f   : > { %1162 = vadd.xlane.f32.xlu1 %v1153_v33  ;;  %1160 = vadd.xlane.f32.xlu0 %v1152_v34 }
 0x113   : > { %1166 = vadd.xlane.f32.xlu1 %v1155_v37  ;;  %1164 = vadd.xlane.f32.xlu0 %v1154_v38 }
 0x117   : > { %1170 = vadd.xlane.f32.xlu1 %v1157_v41  ;;  %1168 = vadd.xlane.f32.xlu0 %v1156_v42 }
 0x11b   : > { %1172 = vadd.xlane.f32.xlu0 %v1158_v44 }
 0x128   : > { %1245 = vperm.xlu1 %3952, %v1207_v45  }
 0x12c   : > { %1296 = vperm.xlu1 %3952, %v1262_v46  }
 0x130   : > { %1301 = vperm.xlu1 %3952, %v1263_v47  }
 0x131   : > { %1240 = vperm.xlu0 %3951, %v1206_v48  }
 0x134   : > { %1230 = vperm.xlu1 %3952, %v1204_v49  }
 0x135   : > { %1225 = vperm.xlu0 %3951, %v1203_v50  }
 0x138   : > { %1235 = vperm.xlu1 %3952, %v1205_v51  }
 0x139   : > { %1281 = vperm.xlu0 %3951, %v1259_v52  }
 0x13d   : > { %1215 = vperm.xlu0 %3951, %v1201_v53  }
 0x141   : > { %1271 = vperm.xlu0 %3951, %v1257_v54  }
 0x15c   : > { %1174 = vadd.xlane.f32.xlu1 %v1159_v56 }
 0x16d   : > { %1286 = vperm.xlu1 %3952, %v1260_v57  }
 0x171   : > { %1291 = vperm.xlu1 %3952, %v1261_v58  }
 0x175   : > { %1220 = vperm.xlu1 %3952, %v1202_v59  }
 0x179   : > { %1276 = vperm.xlu1 %3952, %v1258_v60  }
 0x17d   : > { %1210 = vperm.xlu1 %3952, %v1200_v61  }
 0x181   : > { %1266 = vperm.xlu1 %3952, %v1256_v62  }
 0x198   : > { %v1163_v63 = vpop.xlane.xlu1 %1162  ;;  %v1161_v11 = vpop.xlane.xlu0 %1160 }
 0x199   : > { %v1176_v14 = vadd.f32 %v1163_v63, %v1161_v11 }
 0x19c   : > { %v1167_v0 = vpop.xlane.xlu1 %1166  ;;  %v1165_v13 = vpop.xlane.xlu0 %1164 }
 0x19d   : > { %v1177_v15 = vadd.f32 %v1176_v14, %v1165_v13 }
 0x19f   : > { %v1178_v17 = vadd.f32 %v1177_v15, %v1167_v0 }
 0x1a0   : > { %v1171_v9 = vpop.xlane.xlu1 %1170  ;;  %v1169_v18 = vpop.xlane.xlu0 %1168 }
 0x1a1   : > { %v1179_v20 = vadd.f32 %v1178_v17, %v1169_v18 }
 0x1a3   : > { %v1180_v21 = vadd.f32 %v1179_v20, %v1171_v9 }
 0x1a4   : > { %v1246_v10 = vpop.permute.xlu1 %1245  ;;  %v1173_v22 = vpop.xlane.xlu0 %1172 }
 0x1a5   : > { %v1181_v24 = vadd.f32 %v1180_v21, %v1173_v22 }
 0x1a8   : > { %v1297_v12 = vpop.permute.xlu1 %1296 }
 0x1ac   : > { %v1302_v16 = vpop.permute.xlu1 %1301  ;;  %v1241_v41 = vpop.permute.xlu0 %1240 }
 0x1b0   : > { %v1231_v19 = vpop.permute.xlu1 %1230  ;;  %v1226_v46 = vpop.permute.xlu0 %1225 }
 0x1b4   : > { %v1236_v23 = vpop.permute.xlu1 %1235  ;;  %v1282_v48 = vpop.permute.xlu0 %1281 }
 0x1b8   : > { %v1216_v51 = vpop.permute.xlu0 %1215 }
 0x1bc   : > { %v1272_v18 = vpop.permute.xlu0 %1271 }
 0x1e5   : > { %v1175_v25 = vpop.xlane.xlu1 %1174 }
 0x1e6   : > { %v1182_v26 = vadd.f32 %v1181_v24, %v1175_v25 }
 0x1e8   : > { %v1183_v27 = vrot.slane %v1182_v26, 4 }
 0x1e9   : > { %v1287_v30 = vpop.permute.xlu1 %1286 }
 0x1ea   : > { %v1184_v28 = vadd.f32 %v1183_v27, %v1182_v26 }
 0x1ec   : > { %v1185_v29 = vrot.slane %v1184_v28, 2 }
 0x1ed   : > { %v1292_v38 = vpop.permute.xlu1 %1291 }
 0x1ee   : > { %v1186_v33 = vadd.f32 %v1185_v29, %v1184_v28 }
 0x1f0   : > { %v1187_v34 = vrot.slane %v1186_v33, 1 }
 0x1f1   : > { %v1221_v45 = vpop.permute.xlu1 %1220 }
 0x1f2   : > { %v1188_v37 = vadd.f32 %v1187_v34, %v1186_v33 }
 0x1f4   : > { %v1189_v42 = vmul.f32 0.00012207031, %v1188_v37 }
 0x1f5   : > { %v1277_v47 = vpop.permute.xlu1 %1276 }
 0x1f6   : > { %v1190_v44 = vadd.f32 1e-06, %v1189_v42 }
 0x1f8   : > { %4147 = vrsqrt.f32 %v1190_v44 }
 0x1f9   : > { %v1211_v49 = vpop.permute.xlu1 %1210 }
 0x205   : > { %v4148_v50 = vpop.eup %4147 }
 0x206   : > { %v1196_v52 = vmul.f32 %v4148_v50, %v4623_v40  ;;  %v1197_v53 = vmul.f32 %v4148_v50, %v4620_v39  ;;  %v1194_v54 = vmul.f32 %v4148_v50, %v4613_v36  ;;  %v1198_v56 = vmul.f32 %v4148_v50, %v4630_v43  ;;  %v1267_v43 = vpop.permute.xlu1 %1266 }
 0x207   : > { %v1192_v57 = vmul.f32 %v4148_v50, %v4603_v32  ;;  %v1195_v58 = vmul.f32 %v4148_v50, %v4610_v35  ;;  %v1193_v59 = vmul.f32 %v4148_v50, %v4601_v31  ;;  %v1199_v60 = vmul.f32 %v4148_v50, %v1151_v55 }
 0x208   : > { %v1252_v61 = vmul.f32 %v1231_v19, %v1196_v52  ;;  %v1253_v62 = vmul.f32 %v1236_v23, %v1197_v53  ;;  %v1250_v63 = vmul.f32 %v1221_v45, %v1194_v54  ;;  %v1254_v0 = vmul.f32 %v1241_v41, %v1198_v56 }
 0x209   : > { %v1248_v9 = vmul.f32 %v1211_v49, %v1192_v57  ;;  %v1251_v11 = vmul.f32 %v1226_v46, %v1195_v58  ;;  %v1249_v40 = vmul.f32 %v1216_v51, %v1193_v59  ;;  %v1255_v13 = vmul.f32 %v1246_v10, %v1199_v60 }
 0x20a   : > { %v1308_v39 = vadd.f32 %v1287_v30, %v1252_v61  ;;  %v1309_v14 = vadd.f32 %v1292_v38, %v1253_v62  ;;  %v1306_v36 = vadd.f32 %v1277_v47, %v1250_v63  ;;  %v1310_v15 = vadd.f32 %v1297_v12, %v1254_v0 }
 0x20b   : > { %v1304_v17 = vadd.f32 %v1267_v43, %v1248_v9  ;;  %v1307_v32 = vadd.f32 %v1282_v48, %v1251_v11  ;;  %v1305_v31 = vadd.f32 %v1272_v18, %v1249_v40  ;;  %v1311_v21 = vadd.f32 %v1302_v16, %v1255_v13  ;;  %v1420_v43 = vld [vmem:[%s5250_s3] sm:$0xff] }
 0x20c   : > { %v1324_v35 = vmul.f32 0.70710677, %v1308_v39  ;;  %v1325_v20 = vmul.f32 0.70710677, %v1309_v14  ;;  %v1322_v55 = vmul.f32 0.70710677, %v1306_v36  ;;  %v1106_v18 = vlaneseq }
 0x20d   : > { %v1326_v19 = vmul.f32 0.70710677, %v1310_v15  ;;  %v1320_v22 = vmul.f32 0.70710677, %v1304_v17  ;;  %v1323_v23 = vmul.f32 0.70710677, %v1307_v32 }
 0x20e   : > { %4149 = verf.f32 %v1324_v35  ;;  %v1321_v10 = vmul.f32 0.70710677, %v1305_v31  ;;  %v1327_v24 = vmul.f32 0.70710677, %v1311_v21  ;;  %v1316_v26 = vmul.f32 0.5, %v1308_v39 }
 0x20f   : > { %4151 = verf.f32 %v1325_v20  ;;  %v1317_v29 = vmul.f32 0.5, %v1309_v14  ;;  %v1312_v42 = vmul.f32 0.5, %v1304_v17  ;;  %v1318_v46 = vmul.f32 0.5, %v1310_v15  ;;  %v1421_v14 = vld [vmem:[%s5250_s3 + $0x8] sm:$0xff]  ;;  %v1423_v15 = vld [vmem:[%s5250_s3 + $0x18] sm:$0xff]  ;;  %v1422_v17 = vld [vmem:[%s5250_s3 + $0x10] sm:$0xff] }
 0x210   : > { %4153 = verf.f32 %v1322_v55  ;;  %v1313_v50 = vmul.f32 0.5, %v1305_v31  ;;  %v1319_v52 = vmul.f32 0.5, %v1311_v21  ;;  %v1314_v59 = vmul.f32 0.5, %v1306_v36  ;;  %s5261_s3 = sld [smem:[#allocation13_spill]]  ;;  %v3259_v21 = vld [vmem:[%s4499_s27 + $0x8] sm:$0xff] }
 0x211   : > { %4155 = verf.f32 %v1326_v19  ;;  %v1315_v60 = vmul.f32 0.5, %v1307_v32  ;;  %v4125_v32 = vld [vmem:[%s4369_s29 + $0x4] ss:$8 sps:$4 sm:$0xff]   ;;  %v1107_v35 = vand.u32 127, %v1106_v18 }
 0x212   : > { %4157 = verf.f32 %v1320_v22  ;;  %3579 = vmatprep.mubr.msk.bf16.mxu0 %vm1462_vm0, %v4125_v32 }
 0x213   : > { %4159 = verf.f32 %v1323_v23  ;;  %vm1108_vm1 = vcmp.ne.s32.totalorder %v1107_v35, 0  ;;  %vm1109_vm3 = vcmp.ne.s32.totalorder %v1107_v35, 127 }
 0x214   : > { %4161 = verf.f32 %v1321_v10  ;;  %vm4676_vm2 = vmpackc.low %vm1108_vm1, %vm1108_vm1 }
 0x215   : > { %4163 = verf.f32 %v1327_v24  ;;  %vm4692_vm4 = vmpackc.low %vm1109_vm3, %vm1109_vm3 }
 0x21b   : > { %v4150_v12 = vpop.eup %4149 }
 0x21c   : > { %v4152_v25 = vpop.eup %4151  ;;  %v1340_v27 = vadd.f32 1.0, %v4150_v12 }
 0x21d   : > { %v4154_v28 = vpop.eup %4153  ;;  %v1341_v30 = vadd.f32 1.0, %v4152_v25 }
 0x21e   : > { %v4156_v16 = vpop.eup %4155  ;;  %v1348_v33 = vmul.f32 %v1340_v27, %v1316_v26  ;;  %v1338_v53 = vadd.f32 1.0, %v4154_v28 }
 0x21f   : > { %v4158_v34 = vpop.eup %4157  ;;  %v1349_v37 = vmul.f32 %v1341_v30, %v1317_v29  ;;  %v1342_v38 = vadd.f32 1.0, %v4156_v16 }
 0x220   : > { %v4160_v41 = vpop.eup %4159  ;;  %v1336_v44 = vadd.f32 1.0, %v4158_v34  ;;  %v1346_v63 = vmul.f32 %v1338_v53, %v1314_v59 }
 0x221   : > { %v4162_v45 = vpop.eup %4161  ;;  %v3958_v47 = vpack.i.bf16 %v1349_v37, %v1348_v33  ;;  %v1350_v54 = vmul.f32 %v1342_v38, %v1318_v46  ;;  %v1339_v56 = vadd.f32 1.0, %v4160_v41  ;;  %v1418_v40 = vpack.c.bf16 %v1349_v37, %v1348_v33 }
 0x222   : > { %v4164_v48 = vpop.eup %4163  ;;  %v1344_v49 = vmul.f32 %v1336_v44, %v1312_v42  ;;  %v1337_v51 = vadd.f32 1.0, %v4162_v45 }
 0x223   : > { %3959 = vrot.lane.b32.xlu0 %v3958_v47, %s5199_s1  ;;  %v1343_v57 = vadd.f32 1.0, %v4164_v48  ;;  %v1347_v0 = vmul.f32 %v1339_v56, %v1315_v60  ;;  %v4123_v56 = vld [vmem:[%s4369_s29] ss:$8 sps:$4 sm:$0xff]  }
 0x224   : > { %v1345_v58 = vmul.f32 %v1337_v51, %v1313_v50 }
 0x225   : > { %v1351_v61 = vmul.f32 %v1343_v57, %v1319_v52  ;;  %v3963_v13 = vpack.i.bf16 %v1347_v0, %v1346_v63  ;;  %v1417_v39 = vpack.c.bf16 %v1347_v0, %v1346_v63  ;;  %v4126_v57 = vld [vmem:[%s4369_s29 + $0x14] ss:$8 sps:$4 sm:$0xff]  }
 0x226   : > { %v3968_v62 = vpack.i.bf16 %v1345_v58, %v1344_v49  ;;  %v1416_v36 = vpack.c.bf16 %v1345_v58, %v1344_v49  ;;  %v4128_v58 = vld [vmem:[%s4369_s29 + $0x10] ss:$8 sps:$4 sm:$0xff]  }
 0x227   : > { %v3953_v9 = vpack.i.bf16 %v1351_v61, %v1350_v54  ;;  %v1419_v11 = vpack.c.bf16 %v1351_v61, %v1350_v54 }
 0x228   : > { %3969 = vrot.lane.b32.xlu0 %v3968_v62, %s5199_s1 }
 0x229   : > { %3954 = vrot.lane.b32.xlu1 %v3953_v9, %s5199_s1  ;;  %1470 = vmatpush1.bf16.msra.mxu0 %v1419_v11 }
 0x22a   : > { %1471 = vmatprep.subr.bf16.mxu0 %v4325_v8 }
 0x22c   : > { %3979 = vrot.lane.b32.xlu0 %v3958_v47, %s5201_s5 }
 0x22d   : > { %1472 = vmatpush1.bf16.msra.mxu0 %v1418_v40  ;;  %3964 = vrot.lane.b32.xlu1 %v3963_v13, %s5199_s1 }
 0x22e   : > { %1473 = vmatprep.subr.bf16.mxu0 %v4325_v8 }
 0x230   : > { %3989 = vrot.lane.b32.xlu0 %v3968_v62, %s5201_s5 }
 0x231   : > { %3974 = vrot.lane.b32.xlu1 %v3953_v9, %s5201_s5  ;;  %1474 = vmatpush1.bf16.msra.mxu0 %v1417_v39 }
 0x232   : > { %1475 = vmatprep.subr.bf16.mxu0 %v4325_v8 }
 0x234   : > { %1431 = vperm.xlu0 %3951, %v1421_v14  }
 0x235   : > { %3984 = vrot.lane.b32.xlu1 %v3963_v13, %s5201_s5  ;;  %1476 = vmatpush1.bf16.msra.mxu0 %v1416_v36 }
 0x236   : > { %1477 = vmatprep.subr.bf16.mxu0 %v4325_v8 }
 0x238   : > { %1441 = vperm.xlu0 %3951, %v1423_v15  }
 0x239   : > { %1426 = vperm.xlu1 %3952, %v1420_v43  }
 0x23d   : > { %1436 = vperm.xlu1 %3952, %v1422_v17  }
 0x295   : > { %v3960_v31 = vpop.permute.xlu0 %3959 }
 0x296   : > { %v3962_v23 = vunpack.i.h.bf16 %v3960_v31  ;;  %v3961_v10 = vunpack.i.l.bf16 %v3960_v31 }
 0x298   : > { %v3559_v12 = vpack.c.bf16 %v3962_v23, %v3961_v10 }
 0x29a   : > { %v3970_v27 = vpop.permute.xlu0 %3969 }
 0x29b   : > { %v3955_v20 = vpop.permute.xlu1 %3954  ;;  %v3972_v29 = vunpack.i.h.bf16 %v3970_v27  ;;  %v3971_v30 = vunpack.i.l.bf16 %v3970_v27 }
 0x29c   : > { %v3957_v55 = vunpack.i.h.bf16 %v3955_v20  ;;  %v3956_v19 = vunpack.i.l.bf16 %v3955_v20 }
 0x29d   : > { %v3565_v33 = vpack.c.bf16 %v3972_v29, %v3971_v30 }
 0x29e   : > { %v3556_v22 = vpack.c.bf16 %v3957_v55, %v3956_v19  ;;  %v3980_v38 = vpop.permute.xlu0 %3979 }
 0x29f   : > { %v3965_v24 = vpop.permute.xlu1 %3964  ;;  %v3982_v44 = vunpack.i.h.bf16 %v3980_v38  ;;  %v3981_v45 = vunpack.i.l.bf16 %v3980_v38  ;;  %v1571_v38 = vld [vmem:[%s5248_s8 + $0x18] sm:$0xff] }
 0x2a0   : > { %3557 = vmatpush1.bf16.msk.msra.mxu0 %vm4676_vm2, %v3556_v22  ;;  %v3967_v25 = vunpack.i.h.bf16 %v3965_v24  ;;  %v3966_v26 = vunpack.i.l.bf16 %v3965_v24 }
 0x2a1   : > { %1479 = vmatprep.subr.bf16.mxu0 %v4325_v8  ;;  %v3571_v47 = vpack.c.bf16 %v3982_v44, %v3981_v45  ;;  %v1570_v44 = vld [vmem:[%s5248_s8 + $0x10] sm:$0xff]  ;;  %v1568_v45 = vld [vmem:[%s5248_s8] sm:$0xff] }
 0x2a2   : > { %v3562_v28 = vpack.c.bf16 %v3967_v25, %v3966_v26  ;;  %v3990_v50 = vpop.permute.xlu0 %3989 }
 0x2a3   : > { %v3975_v16 = vpop.permute.xlu1 %3974  ;;  %v3992_v52 = vunpack.i.h.bf16 %v3990_v50  ;;  %v3991_v53 = vunpack.i.l.bf16 %v3990_v50 }
 0x2a4   : > { %3560 = vmatpush1.bf16.msk.msra.mxu0 %vm4676_vm2, %v3559_v12  ;;  %v3977_v34 = vunpack.i.h.bf16 %v3975_v16  ;;  %v3976_v37 = vunpack.i.l.bf16 %v3975_v16 }
 0x2a5   : > { %1481 = vmatprep.subr.bf16.mxu0 %v4325_v8  ;;  %v3577_v54 = vpack.c.bf16 %v3992_v52, %v3991_v53 }
 0x2a6   : > { %v3568_v42 = vpack.c.bf16 %v3977_v34, %v3976_v37 }
 0x2a7   : > { %v3985_v46 = vpop.permute.xlu1 %3984 }
 0x2a8   : > { %3563 = vmatpush1.bf16.msk.msra.mxu0 %vm4676_vm2, %v3562_v28  ;;  %v3987_v48 = vunpack.i.h.bf16 %v3985_v46  ;;  %v3986_v49 = vunpack.i.l.bf16 %v3985_v46  ;;  %v1599_v46 = vld [vmem:[%s4384_s14 + $0x18] sm:$0xff] }
 0x2a9   : > { %1483 = vmatprep.subr.bf16.mxu0 %v4325_v8 }
 0x2aa   : > { %v3574_v51 = vpack.c.bf16 %v3987_v48, %v3986_v49  ;;  %v1569_v48 = vld [vmem:[%s5248_s8 + $0x8] sm:$0xff]  ;;  %s5268_s8 = smov 1  }
 0x2ab   : > { %v1597_v49 = vld [vmem:[%s4384_s14 + $0x8] sm:$0xff] }
 0x2ac   : > { %3566 = vmatpush1.bf16.msk.msra.mxu0 %vm4676_vm2, %v3565_v33 }
 0x2ad   : > { %1493 = vmatprep.subr.bf16.mxu0 %v4325_v8 }
 0x2af   : > { %v1432_v63 = vpop.permute.xlu0 %1431 }
 0x2b0   : > { %3569 = vmatpush2.bf16.msk.msra.mxu0 %vm4692_vm4, %v3568_v42  ;;  %v1598_v42 = vld [vmem:[%s4384_s14 + $0x10] sm:$0xff] }
 0x2b1   : > { %1495 = vmatprep.subr.bf16.mxu0 %v4325_v8 }
 0x2b3   : > { %v1442_v36 = vpop.permute.xlu0 %1441 }
 0x2b4   : > { %3572 = vmatpush2.bf16.msk.msra.mxu0 %vm4692_vm4, %v3571_v47  ;;  %v1427_v59 = vpop.permute.xlu1 %1426  ;;  %v1596_v47 = vld [vmem:[%s4384_s14] sm:$0xff] }
 0x2b5   : > { %1497 = vmatprep.subr.bf16.mxu0 %v4325_v8 }
 0x2b8   : > { %3575 = vmatpush2.bf16.msk.msra.mxu0 %vm4692_vm4, %v3574_v51  ;;  %v1437_v40 = vpop.permute.xlu1 %1436 }
 0x2b9   : > { %1499 = vmatprep.subr.bf16.mxu0 %v4325_v8 }
 0x2bc   : > { %3578 = vmatpush2.bf16.msk.msra.mxu0 %vm4692_vm4, %v3577_v54 }
 0x2bf   : > { %1502 = vmatmul.mubr.bf16.vlgmr.msra.gmra.mxu0 %v4123_v56 }
 0x2c0   : > { %3580 = vmatprep.mubr.msk.bf16.mxu0 %vm1462_vm0, %v4126_v57 }
 0x2c7   : > { %1510 = vmatmul.mubr.bf16.gmra.mxu0 %v4128_v58 }
 0x37f   : > { %v1503_v60 = vpop.f32.mrf.mxu0 }
 0x380   : > { %v1504_v61 = vadd.f32 %v1503_v60, %v1427_v59 }
 0x381   : > { %v1505_v62 = vpop.f32.mrf.mxu0 }
 0x382   : > { %1518 = vadd.xlane.f32.xlu1 %v1504_v61 }
 0x383   : > { %v1506_v0 = vpop.f32.mrf.mxu0 }
 0x384   : > { %v1507_v9 = vadd.f32 %v1506_v0, %v1432_v63 }
 0x385   : > { %v1508_v11 = vpop.f32.mrf.mxu0 }
 0x386   : > { %1520 = vadd.xlane.f32.xlu0 %v1507_v9 }
 0x387   : > { %v1511_v13 = vpop.f32.mrf.mxu0 }
 0x388   : > { %v1512_v39 = vadd.f32 %v1511_v13, %v1437_v40 }
 0x389   : > { %v1513_v14 = vpop.f32.mrf.mxu0 }
 0x38a   : > { %1522 = vadd.xlane.f32.xlu0 %v1512_v39 }
 0x38b   : > { %v1514_v15 = vpop.f32.mrf.mxu0 }
 0x38c   : > { %v1515_v43 = vadd.f32 %v1514_v15, %v1442_v36 }
 0x38d   : > { %v1516_v17 = vpop.f32.mrf.mxu0 }
 0x38e   : > { %1524 = vadd.xlane.f32.xlu1 %v1515_v43 }
 0x40b   : > { %v1519_v18 = vpop.xlane.xlu1 %1518 }
 0x40f   : > { %v1521_v32 = vpop.xlane.xlu0 %1520 }
 0x410   : > { %v1526_v20 = vadd.f32 %v1521_v32, %v1519_v18 }
 0x413   : > { %v1523_v35 = vpop.xlane.xlu0 %1522 }
 0x414   : > { %v1527_v31 = vadd.f32 %v1526_v20, %v1523_v35 }
 0x417   : > { %v1525_v55 = vpop.xlane.xlu1 %1524 }
 0x418   : > { %v1528_v19 = vadd.f32 %v1527_v31, %v1525_v55 }
 0x41a   : > { %v1529_v22 = vrot.slane %v1528_v19, 4 }
 0x41c   : > { %v1530_v23 = vadd.f32 %v1529_v22, %v1528_v19 }
 0x41e   : > { %v1531_v10 = vrot.slane %v1530_v23, 2 }
 0x420   : > { %v1532_v24 = vadd.f32 %v1531_v10, %v1530_v23 }
 0x422   : > { %v1533_v12 = vrot.slane %v1532_v24, 1 }
 0x424   : > { %v1534_v25 = vadd.f32 %v1533_v12, %v1532_v24 }
 0x426   : > { %v1535_v26 = vmul.f32 0.00024414063, %v1534_v25 }
 0x428   : > { %v1537_v27 = vsub.f32 %v1507_v9, %v1535_v26  ;;  %v1536_v28 = vsub.f32 %v1504_v61, %v1535_v26  ;;  %v1539_v16 = vsub.f32 %v1515_v43, %v1535_v26  ;;  %v1538_v33 = vsub.f32 %v1512_v39, %v1535_v26 }
 0x42a   : > { %v1541_v29 = vmul.f32 %v1537_v27, %v1537_v27  ;;  %v1540_v30 = vmul.f32 %v1536_v28, %v1536_v28  ;;  %v1543_v34 = vmul.f32 %v1539_v16, %v1539_v16  ;;  %v1542_v37 = vmul.f32 %v1538_v33, %v1538_v33 }
 0x42c   : > { %1546 = vadd.xlane.f32.xlu1 %v1541_v29  ;;  %1544 = vadd.xlane.f32.xlu0 %v1540_v30 }
 0x430   : > { %1550 = vadd.xlane.f32.xlu1 %v1543_v34  ;;  %1548 = vadd.xlane.f32.xlu0 %v1542_v37 }
 0x441   : > { %1589 = vperm.xlu1 %3952, %v1571_v38  }
 0x445   : > { %1612 = vperm.xlu1 %3952, %v1598_v42  }
 0x446   : > { %1584 = vperm.xlu0 %3951, %v1570_v44  }
 0x449   : > { %1574 = vperm.xlu1 %3952, %v1568_v45  }
 0x44a   : > { %1617 = vperm.xlu0 %3951, %v1599_v46  }
 0x44d   : > { %1602 = vperm.xlu1 %3952, %v1596_v47  }
 0x44e   : > { %1579 = vperm.xlu0 %3951, %v1569_v48  }
 0x452   : > { %1607 = vperm.xlu0 %3951, %v1597_v49  }
 0x4b5   : > { %v1547_v50 = vpop.xlane.xlu1 %1546  ;;  %v1545_v51 = vpop.xlane.xlu0 %1544 }
 0x4b6   : > { %v1552_v52 = vadd.f32 %v1547_v50, %v1545_v51 }
 0x4b9   : > { %v1549_v53 = vpop.xlane.xlu0 %1548  ;;  %v1551_v56 = vpop.xlane.xlu1 %1550 }
 0x4ba   : > { %v1553_v54 = vadd.f32 %v1552_v52, %v1549_v53 }
 0x4bc   : > { %v1554_v57 = vadd.f32 %v1553_v54, %v1551_v56 }
 0x4bd   : > { %v1590_v11 = vpop.permute.xlu1 %1589 }
 0x4be   : > { %v1555_v58 = vrot.slane %v1554_v57, 4 }
 0x4c0   : > { %v1556_v59 = vadd.f32 %v1555_v58, %v1554_v57  ;;  %v1678_v57 = vld [vmem:[%s4394_s24] sm:$0xff]  ;;  %v1679_v58 = vld [vmem:[%s4394_s24 + $0x8] sm:$0xff] }
 0x4c1   : > { %v1585_v40 = vpop.permute.xlu0 %1584  ;;  %v1613_v13 = vpop.permute.xlu1 %1612 }
 0x4c2   : > { %v1557_v60 = vrot.slane %v1556_v59, 2 }
 0x4c4   : > { %v1558_v61 = vadd.f32 %v1557_v60, %v1556_v59  ;;  %v1772_v59 = vld [vmem:[%s5249_s6] sm:$0xff]  ;;  %v1773_v60 = vld [vmem:[%s5249_s6 + $0x8] sm:$0xff] }
 0x4c5   : > { %v1618_v39 = vpop.permute.xlu0 %1617  ;;  %v1575_v14 = vpop.permute.xlu1 %1574 }
 0x4c6   : > { %v1559_v62 = vrot.slane %v1558_v61, 1 }
 0x4c8   : > { %v1560_v63 = vadd.f32 %v1559_v62, %v1558_v61  ;;  %v1680_v61 = vld [vmem:[%s4394_s24 + $0x10] sm:$0xff]  ;;  %v4129_v62 = vld [vmem:[%s4389_s19] sm:$0xff]  }
 0x4c9   : > { %v1580_v36 = vpop.permute.xlu0 %1579  ;;  %v1603_v19 = vpop.permute.xlu1 %1602  ;;  %3775 = vmatprep.mubr.msk.bf16.mxu1 %vm1712_vm5, %v4129_v62 }
 0x4ca   : > { %v1561_v0 = vmul.f32 0.00024414063, %v1560_v63  ;;  %v1774_v63 = vld [vmem:[%s5249_s6 + $0x10] sm:$0xff] }
 0x4cc   : > { %v1562_v9 = vadd.f32 1e-06, %v1561_v0  ;;  %v1681_v0 = vld [vmem:[%s4394_s24 + $0x18] sm:$0xff] }
 0x4cd   : > { %v1608_v22 = vpop.permute.xlu0 %1607 }
 0x4ce   : > { %4165 = vrsqrt.f32 %v1562_v9  ;;  %v1775_v9 = vld [vmem:[%s5249_s6 + $0x18] sm:$0xff]  ;;  %s5267_s6 = smov 127  }
 0x4db   : > { %v4166_v15 = vpop.eup %4165 }
 0x4dc   : > { %v1567_v43 = vmul.f32 %v4166_v15, %v1539_v16  ;;  %v1566_v17 = vmul.f32 %v4166_v15, %v1538_v33  ;;  %v1564_v32 = vmul.f32 %v4166_v15, %v1536_v28  ;;  %v1565_v18 = vmul.f32 %v4166_v15, %v1537_v27 }
 0x4de   : > { %v1595_v35 = vmul.f32 %v1590_v11, %v1567_v43  ;;  %v1594_v20 = vmul.f32 %v1585_v40, %v1566_v17  ;;  %v1592_v31 = vmul.f32 %v1575_v14, %v1564_v32  ;;  %v1593_v55 = vmul.f32 %v1580_v36, %v1565_v18 }
 0x4e0   : > { %v1622_v23 = vadd.f32 %v1613_v13, %v1594_v20  ;;  %v1623_v10 = vadd.f32 %v1618_v39, %v1595_v35  ;;  %v1620_v24 = vadd.f32 %v1603_v19, %v1592_v31  ;;  %v1621_v12 = vadd.f32 %v1608_v22, %v1593_v55  ;;  %v4130_v22 = vld [vmem:[%s4389_s19 + $0x8] sm:$0xff]  }
 0x4e2   : > { %v1630_v25 = vmul.f32 0.70710677, %v1622_v23  ;;  %v1631_v26 = vmul.f32 0.70710677, %v1623_v10  ;;  %v1628_v29 = vmul.f32 0.70710677, %v1620_v24 }
 0x4e3   : > { %v1629_v30 = vmul.f32 0.70710677, %v1621_v12  ;;  %v1626_v16 = vmul.f32 0.5, %v1622_v23  ;;  %v1627_v37 = vmul.f32 0.5, %v1623_v10  ;;  %v1624_v45 = vmul.f32 0.5, %v1620_v24  ;;  %v1768_v23 = vld [vmem:[%s4399_s30] sm:$0xff] }
 0x4e4   : > { %4167 = verf.f32 %v1630_v25  ;;  %v1625_v48 = vmul.f32 0.5, %v1621_v12  ;;  %v4228_v10 = vld [vmem:[%s4568_s28] sm:$0xff] }
 0x4e5   : > { %4169 = verf.f32 %v1631_v26 }
 0x4e6   : > { %4171 = verf.f32 %v1628_v29 }
 0x4e7   : > { %4173 = verf.f32 %v1629_v30 }
 0x4f1   : > { %v4168_v28 = vpop.eup %4167 }
 0x4f2   : > { %v4170_v27 = vpop.eup %4169  ;;  %v1638_v33 = vadd.f32 1.0, %v4168_v28 }
 0x4f3   : > { %v4172_v34 = vpop.eup %4171  ;;  %v1639_v38 = vadd.f32 1.0, %v4170_v27 }
 0x4f4   : > { %v4174_v42 = vpop.eup %4173  ;;  %v1642_v44 = vmul.f32 %v1638_v33, %v1626_v16  ;;  %v1636_v46 = vadd.f32 1.0, %v4172_v34 }
 0x4f5   : > { %v1643_v47 = vmul.f32 %v1639_v38, %v1627_v37  ;;  %v1637_v49 = vadd.f32 1.0, %v4174_v42 }
 0x4f6   : > { %v1640_v50 = vmul.f32 %v1636_v46, %v1624_v45 }
 0x4f7   : > { %v1641_v51 = vmul.f32 %v1637_v49, %v1625_v48  ;;  %v3993_v52 = vpack.i.bf16 %v1643_v47, %v1642_v44  ;;  %v1677_v53 = vpack.c.bf16 %v1643_v47, %v1642_v44 }
 0x4f9   : > { %3994 = vrot.lane.b32.xlu1 %v3993_v52, %s5201_s5  ;;  %v3998_v54 = vpack.i.bf16 %v1641_v51, %v1640_v50  ;;  %v1676_v56 = vpack.c.bf16 %v1641_v51, %v1640_v50 }
 0x4fb   : > { %3999 = vrot.lane.b32.xlu0 %v3998_v54, %s5201_s5 }
 0x4fd   : > { %4004 = vrot.lane.b32.xlu1 %v3993_v52, %s5199_s1 }
 0x4ff   : > { %4009 = vrot.lane.b32.xlu0 %v3998_v54, %s5199_s1 }
 0x501   : > { %1684 = vperm.xlu1 %3952, %v1678_v57  }
 0x503   : > { %1689 = vperm.xlu0 %3951, %v1679_v58  }
 0x505   : > { %1778 = vperm.xlu1 %3952, %v1772_v59  }
 0x507   : > { %1783 = vperm.xlu0 %3951, %v1773_v60  }
 0x509   : > { %1694 = vperm.xlu1 %3952, %v1680_v61  }
 0x50b   : > { %1788 = vperm.xlu0 %3951, %v1774_v63  }
 0x50d   : > { %1699 = vperm.xlu1 %3952, %v1681_v0  }
 0x50f   : > { %1793 = vperm.xlu0 %3951, %v1775_v9  }
 0x56b   : > { %v3995_v11 = vpop.permute.xlu1 %3994 }
 0x56c   : > { %v3997_v40 = vunpack.i.h.bf16 %v3995_v11  ;;  %v3996_v13 = vunpack.i.l.bf16 %v3995_v11 }
 0x56d   : > { %v4000_v39 = vpop.permute.xlu0 %3999 }
 0x56e   : > { %v4002_v14 = vunpack.i.h.bf16 %v4000_v39  ;;  %v4001_v36 = vunpack.i.l.bf16 %v4000_v39  ;;  %v3584_v15 = vpack.c.bf16 %v3997_v40, %v3996_v13 }
 0x56f   : > { %v4005_v17 = vpop.permute.xlu1 %4004 }
 0x570   : > { %v3587_v43 = vpack.c.bf16 %v4002_v14, %v4001_v36  ;;  %3763 = vmatprep.subr.msk.bf16.mxu1 %vm4692_vm4, %v3584_v15  ;;  %v4007_v32 = vunpack.i.h.bf16 %v4005_v17  ;;  %v4006_v18 = vunpack.i.l.bf16 %v4005_v17 }
 0x571   : > { %3764 = vmatpush3.bf16.msk.msra.mxu1 %vm4692_vm4, %v3584_v15  ;;  %v4010_v35 = vpop.permute.xlu0 %4009 }
 0x572   : > { %3765 = vmatprep.subr.msk.bf16.mxu1 %vm4692_vm4, %v3587_v43  ;;  %v3590_v20 = vpack.c.bf16 %v4007_v32, %v4006_v18  ;;  %v4012_v31 = vunpack.i.h.bf16 %v4010_v35  ;;  %v4011_v55 = vunpack.i.l.bf16 %v4010_v35 }
 0x574   : > { %v3593_v19 = vpack.c.bf16 %v4012_v31, %v4011_v55 }
 0x575   : > { %3766 = vmatpush3.bf16.msk.msra.mxu1 %vm4692_vm4, %v3587_v43 }
 0x576   : > { %3767 = vmatprep.subr.bf16.mxu1 %v1677_v53 }
 0x579   : > { %3768 = vmatpush3.bf16.msra.mxu1 %v1677_v53 }
 0x57a   : > { %3769 = vmatprep.subr.bf16.mxu1 %v1676_v56 }
 0x57c   : > { %v1685_v24 = vpop.permute.xlu1 %1684 }
 0x57d   : > { %3770 = vmatpush3.bf16.msra.mxu1 %v1676_v56 }
 0x57e   : > { %3771 = vmatprep.subr.msk.bf16.mxu1 %vm4676_vm2, %v3590_v20 }
 0x581   : > { %3772 = vmatpush3.bf16.msk.msra.mxu1 %vm4676_vm2, %v3590_v20 }
 0x582   : > { %3773 = vmatprep.subr.msk.bf16.mxu1 %vm4676_vm2, %v3593_v19 }
 0x585   : > { %3774 = vmatpush3.bf16.msk.msra.mxu1 %vm4676_vm2, %v3593_v19 }
 0x586   : > { %3779 = vmatprep.subr.mxu1 %v4593_v7 }
 0x588   : > { %3776 = vmatmul.mubr.msk.bf16.vlgmr.msra.gmra.mxu1 %vm1712_vm5, %v4130_v22 }
 0x589   : > { %3780 = vmatpush3.msra.mxu1 %v4593_v7  ;;  %3795 = vmatprep.mubr.msk.f32.mxu1 %vm1462_vm0, %v1768_v23  ;;  %v4227_v7 = vld [vmem:[%s4568_s28 + $0x10] sm:$0xff]  ;;  %s1095_s28 = scalar_lea.vmem %s4349_s13, %s4564_s23  ;;  %s5259_s23 = sld [smem:[#allocation12_spill]] }
 0x58a   : > { %3781 = vmatprep.subr.mxu1 %v4591_v6  ;;  %v4789_v56 = vld [vmem:[%s1095_s28] sm:$0xff]  ;;  %v4791_v57 = vld [vmem:[%s1095_s28 + $0x8] sm:$0xff]  ;;  %v4795_v58 = vld [vmem:[%s1095_s28 + $0x10] sm:$0xff] }
 0x58b   : > { %3782 = vmatpush3.msra.mxu1 %v4591_v6  ;;  %v1769_v6 = vld [vmem:[%s4399_s30 + $0x8] sm:$0xff]  ;;  %v4797_v59 = vld [vmem:[%s1095_s28 + $0x18] sm:$0xff]  ;;  %s5260_s28 = sld [smem:[#allocation14_spill]] }
 0x58c   : > { %3783 = vmatprep.subr.mxu1 %v4587_v5 }
 0x58d   : > { %3784 = vmatpush3.msra.mxu1 %v4587_v5  ;;  %v1770_v5 = vld [vmem:[%s4399_s30 + $0x10] sm:$0xff] }
 0x58e   : > { %3785 = vmatprep.subr.mxu1 %v4585_v4 }
 0x58f   : > { %3786 = vmatpush3.msra.mxu1 %v4585_v4 }
 0x590   : > { %3787 = vmatprep.subr.mxu1 %v4579_v3 }
 0x591   : > { %3788 = vmatpush3.msra.mxu1 %v4579_v3  ;;  %v1771_v3 = vld [vmem:[%s4399_s30 + $0x18] sm:$0xff] }
 0x592   : > { %3789 = vmatprep.subr.mxu1 %v4572_v1  ;;  %v1690_v1 = vpop.permute.xlu0 %1689 }
 0x593   : > { %3790 = vmatpush3.msra.mxu1 %v4227_v7 }
 0x594   : > { %3791 = vmatprep.subr.mxu1 %v4576_v2 }
 0x595   : > { %3792 = vmatpush3.msra.mxu1 %v4576_v2  ;;  %v1779_v2 = vpop.permute.xlu1 %1778 }
 0x596   : > { %3793 = vmatprep.subr.mxu1 %v4228_v10  ;;  %v1784_v25 = vpop.permute.xlu0 %1783 }
 0x597   : > { %3794 = vmatpush3.msra.mxu1 %v4228_v10 }
 0x598   : > { %3796 = vmatmul.mubr.msk.f32.vlgmr.msra.gmra.mxu1 %vm1462_vm0, %v1769_v6  ;;  %2251 = vmatprep.subr.bf16.mxu1 %v4325_v8 }
 0x599   : > { %3798 = vmatprep.mubr.msk.f32.mxu1 %vm1462_vm0, %v1770_v5  ;;  %v1695_v28 = vpop.permute.xlu1 %1694 }
 0x59a   : > { %v1789_v29 = vpop.permute.xlu0 %1788 }
 0x59c   : > { %3799 = vmatmul.mubr.msk.f32.gmra.mxu1 %vm1462_vm0, %v1771_v3 }
 0x59d   : > { %v1700_v48 = vpop.permute.xlu1 %1699 }
 0x59e   : > { %v1794_v44 = vpop.permute.xlu0 %1793 }
 0x648   : > { %v3777_v4 = vpop.f32.mrf.mxu1 }
 0x649   : > { %v1762_v50 = vadd.f32 %v3777_v4, %v1695_v28  ;;  %v1993_v28 = vld [vmem:[%s5246_s12 + $0x30] sm:$0xff] }
 0x64a   : > { %v1753_v12 = vpop.f32.mrf.mxu1 }
 0x64b   : > { %v1754_v37 = vadd.f32 %v1753_v12, %v1685_v24 }
 0x64c   : > { %v3778_v26 = vpop.f32.mrf.mxu1 }
 0x64d   : > { %v1765_v51 = vadd.f32 %v3778_v26, %v1700_v48  ;;  %v1991_v48 = vld [vmem:[%s5246_s12 + $0x20] sm:$0xff] }
 0x64e   : > { %v1756_v30 = vpop.f32.mrf.mxu1 }
 0x64f   : > { %v1757_v16 = vadd.f32 %v1756_v30, %v1690_v1  ;;  %v2049_v30 = vld [vmem:[%s5259_s23 + $0x30] sm:$0xff] }
 0x658   : > { %v3797_v27 = vpop.f32.mrf.mxu1 }
 0x659   : > { %v1880_v33 = vadd.f32 %v3797_v27, %v1784_v25  ;;  %v2050_v27 = vld [vmem:[%s5259_s23 + $0x38] sm:$0xff] }
 0x65a   : > { %v1874_v34 = vpop.f32.mrf.mxu1 }
 0x65b   : > { %v4775_v38 = vadd.f32 %v1880_v33, %v1757_v16  ;;  %v1875_v42 = vadd.f32 %v1874_v34, %v1779_v2  ;;  %v1992_v16 = vld [vmem:[%s5246_s12 + $0x28] sm:$0xff]  ;;  %v1990_v34 = vld [vmem:[%s5246_s12 + $0x18] sm:$0xff] }
 0x65c   : > { %v3800_v45 = vpop.f32.mrf.mxu1  ;;  %v2048_v33 = vld [vmem:[%s5259_s23 + $0x28] sm:$0xff] }
 0x65d   : > { %v4777_v46 = vadd.f32 %v1875_v42, %v1754_v37  ;;  %v1890_v47 = vadd.f32 %v3800_v45, %v1794_v44  ;;  %1903 = vadd.xlane.f32.xlu0 %v4775_v38  ;;  %v2046_v37 = vld [vmem:[%s5259_s23 + $0x18] sm:$0xff]  ;;  %v1988_v42 = vld [vmem:[%s5246_s12 + $0x8] sm:$0xff] }
 0x65e   : > { %v1884_v49 = vpop.f32.mrf.mxu1  ;;  %v2044_v44 = vld [vmem:[%s5259_s23 + $0x8] sm:$0xff] }
 0x65f   : > { %v1885_v52 = vadd.f32 %v1884_v49, %v1789_v29  ;;  %1901 = vadd.xlane.f32.xlu1 %v4777_v46  ;;  %v4781_v53 = vadd.f32 %v1890_v47, %v1765_v51  ;;  %v1994_v29 = vld [vmem:[%s5246_s12 + $0x38] sm:$0xff]  ;;  %v2047_v49 = vld [vmem:[%s5259_s23 + $0x20] sm:$0xff]  ;;  %v2045_v51 = vld [vmem:[%s5259_s23 + $0x10] sm:$0xff] }
 0x661   : > { %v4783_v54 = vadd.f32 %v1885_v52, %v1762_v50  ;;  %v1989_v50 = vld [vmem:[%s5246_s12 + $0x10] sm:$0xff]  ;;  %v1987_v52 = vld [vmem:[%s5246_s12] sm:$0xff] }
 0x663   : > { %1905 = vadd.xlane.f32.xlu0 %v4783_v54  ;;  %1907 = vadd.xlane.f32.xlu1 %v4781_v53 }
 0x667   : > { %1909 = vadd.xlane.f32.xlu0 %v4789_v56  ;;  %1911 = vadd.xlane.f32.xlu1 %v4791_v57 }
 0x66b   : > { %1913 = vadd.xlane.f32.xlu0 %v4795_v58  ;;  %1915 = vadd.xlane.f32.xlu1 %v4797_v59 }
 0x6e6   : > { %v1904_v60 = vpop.xlane.xlu0 %1903 }
 0x6e8   : > { %v1902_v61 = vpop.xlane.xlu1 %1901 }
 0x6e9   : > { %v1917_v62 = vadd.f32 %v1904_v60, %v1902_v61  ;;  %v2043_v60 = vld [vmem:[%s5259_s23] sm:$0xff] }
 0x6ec   : > { %v1906_v63 = vpop.xlane.xlu0 %1905  ;;  %v1908_v0 = vpop.xlane.xlu1 %1907 }
 0x6ed   : > { %v1918_v9 = vadd.f32 %v1917_v62, %v1906_v63 }
 0x6ef   : > { %v1919_v11 = vadd.f32 %v1918_v9, %v1908_v0 }
 0x6f0   : > { %v1910_v40 = vpop.xlane.xlu0 %1909  ;;  %v1912_v13 = vpop.xlane.xlu1 %1911 }
 0x6f1   : > { %v1920_v39 = vadd.f32 %v1919_v11, %v1910_v40 }
 0x6f3   : > { %v1921_v14 = vadd.f32 %v1920_v39, %v1912_v13 }
 0x6f4   : > { %v1914_v36 = vpop.xlane.xlu0 %1913  ;;  %v1916_v15 = vpop.xlane.xlu1 %1915 }
 0x6f5   : > { %v1922_v43 = vadd.f32 %v1921_v14, %v1914_v36 }
 0x6f7   : > { %v1923_v17 = vadd.f32 %v1922_v43, %v1916_v15 }
 0x6f9   : > { %v1924_v32 = vrot.slane %v1923_v17, 4 }
 0x6fb   : > { %v1925_v18 = vadd.f32 %v1924_v32, %v1923_v17 }
 0x6fd   : > { %v1926_v35 = vrot.slane %v1925_v18, 2 }
 0x6ff   : > { %v1927_v20 = vadd.f32 %v1926_v35, %v1925_v18 }
 0x701   : > { %v1928_v31 = vrot.slane %v1927_v20, 1 }
 0x703   : > { %v1929_v55 = vadd.f32 %v1928_v31, %v1927_v20 }
 0x705   : > { %v1930_v19 = vmul.f32 0.00012207031, %v1929_v55 }
 0x707   : > { %v4802_v22 = vsub.f32 %v4775_v38, %v1930_v19  ;;  %v4805_v23 = vsub.f32 %v4777_v46, %v1930_v19  ;;  %v4812_v10 = vsub.f32 %v4781_v53, %v1930_v19  ;;  %v4815_v5 = vsub.f32 %v4783_v54, %v1930_v19 }
 0x708   : > { %v4822_v4 = vsub.f32 %v4791_v57, %v1930_v19  ;;  %v4825_v24 = vsub.f32 %v4789_v56, %v1930_v19  ;;  %v4832_v2 = vsub.f32 %v4795_v58, %v1930_v19  ;;  %v1938_v45 = vsub.f32 %v4797_v59, %v1930_v19 }
 0x709   : > { %v1940_v7 = vmul.f32 %v4802_v22, %v4802_v22  ;;  %v1939_v6 = vmul.f32 %v4805_v23, %v4805_v23  ;;  %v1942_v3 = vmul.f32 %v4812_v10, %v4812_v10  ;;  %v1941_v1 = vmul.f32 %v4815_v5, %v4815_v5 }
 0x70a   : > { %v1944_v12 = vmul.f32 %v4822_v4, %v4822_v4  ;;  %v1943_v25 = vmul.f32 %v4825_v24, %v4825_v24  ;;  %v1945_v26 = vmul.f32 %v4832_v2, %v4832_v2  ;;  %v1946_v47 = vmul.f32 %v1938_v45, %v1938_v45 }
 0x70b   : > { %1949 = vadd.xlane.f32.xlu1 %v1940_v7  ;;  %1947 = vadd.xlane.f32.xlu0 %v1939_v6 }
 0x70f   : > { %1953 = vadd.xlane.f32.xlu1 %v1942_v3  ;;  %1951 = vadd.xlane.f32.xlu0 %v1941_v1 }
 0x713   : > { %1957 = vadd.xlane.f32.xlu1 %v1944_v12  ;;  %1955 = vadd.xlane.f32.xlu0 %v1943_v25 }
 0x717   : > { %1959 = vadd.xlane.f32.xlu0 %v1945_v26 }
 0x724   : > { %2032 = vperm.xlu1 %3952, %v1994_v29  }
 0x728   : > { %2083 = vperm.xlu1 %3952, %v2049_v30  }
 0x72d   : > { %2027 = vperm.xlu0 %3951, %v1993_v28  }
 0x731   : > { %2088 = vperm.xlu0 %3951, %v2050_v27  }
 0x735   : > { %2022 = vperm.xlu0 %3951, %v1992_v16  }
 0x739   : > { %2078 = vperm.xlu0 %3951, %v2048_v33  }
 0x73d   : > { %2012 = vperm.xlu0 %3951, %v1990_v34  }
 0x741   : > { %2068 = vperm.xlu0 %3951, %v2046_v37  }
 0x745   : > { %2002 = vperm.xlu0 %3951, %v1988_v42  }
 0x749   : > { %2058 = vperm.xlu0 %3951, %v2044_v44  }
 0x74c   : > { %1961 = vadd.xlane.f32.xlu1 %v1946_v47 }
 0x75d   : > { %2017 = vperm.xlu1 %3952, %v1991_v48  }
 0x761   : > { %2073 = vperm.xlu1 %3952, %v2047_v49  }
 0x765   : > { %2007 = vperm.xlu1 %3952, %v1989_v50  }
 0x769   : > { %2063 = vperm.xlu1 %3952, %v2045_v51  }
 0x76d   : > { %1997 = vperm.xlu1 %3952, %v1987_v52  }
 0x771   : > { %2053 = vperm.xlu1 %3952, %v2043_v60  }
 0x794   : > { %v1950_v61 = vpop.xlane.xlu1 %1949  ;;  %v1948_v62 = vpop.xlane.xlu0 %1947 }
 0x795   : > { %v1963_v9 = vadd.f32 %v1950_v61, %v1948_v62 }
 0x798   : > { %v1954_v63 = vpop.xlane.xlu1 %1953  ;;  %v1952_v0 = vpop.xlane.xlu0 %1951 }
 0x799   : > { %v1964_v11 = vadd.f32 %v1963_v9, %v1952_v0 }
 0x79b   : > { %v1965_v13 = vadd.f32 %v1964_v11, %v1954_v63 }
 0x79c   : > { %v1958_v40 = vpop.xlane.xlu1 %1957  ;;  %v1956_v39 = vpop.xlane.xlu0 %1955 }
 0x79d   : > { %v1966_v36 = vadd.f32 %v1965_v13, %v1956_v39 }
 0x79f   : > { %v1967_v43 = vadd.f32 %v1966_v36, %v1958_v40 }
 0x7a0   : > { %v2033_v14 = vpop.permute.xlu1 %2032  ;;  %v1960_v15 = vpop.xlane.xlu0 %1959 }
 0x7a1   : > { %v1968_v18 = vadd.f32 %v1967_v43, %v1960_v15 }
 0x7a4   : > { %v2084_v17 = vpop.permute.xlu1 %2083 }
 0x7a8   : > { %v2028_v32 = vpop.permute.xlu0 %2027 }
 0x7ac   : > { %v2089_v31 = vpop.permute.xlu0 %2088 }
 0x7b0   : > { %v2023_v3 = vpop.permute.xlu0 %2022 }
 0x7b4   : > { %v2079_v29 = vpop.permute.xlu0 %2078 }
 0x7b8   : > { %v2013_v16 = vpop.permute.xlu0 %2012 }
 0x7bc   : > { %v2069_v34 = vpop.permute.xlu0 %2068 }
 0x7c0   : > { %v2003_v44 = vpop.permute.xlu0 %2002 }
 0x7d5   : > { %v1962_v35 = vpop.xlane.xlu1 %1961 }
 0x7d6   : > { %v1969_v20 = vadd.f32 %v1968_v18, %v1962_v35 }
 0x7d8   : > { %v1970_v55 = vrot.slane %v1969_v20, 4 }
 0x7d9   : > { %v2018_v7 = vpop.permute.xlu1 %2017 }
 0x7da   : > { %v1971_v19 = vadd.f32 %v1970_v55, %v1969_v20 }
 0x7dc   : > { %v1972_v6 = vrot.slane %v1971_v19, 2 }
 0x7dd   : > { %v2074_v25 = vpop.permute.xlu1 %2073 }
 0x7de   : > { %v1973_v1 = vadd.f32 %v1972_v6, %v1971_v19 }
 0x7e0   : > { %v1974_v12 = vrot.slane %v1973_v1, 1 }
 0x7e1   : > { %v2008_v27 = vpop.permute.xlu1 %2007 }
 0x7e2   : > { %v1975_v26 = vadd.f32 %v1974_v12, %v1973_v1 }
 0x7e4   : > { %v1976_v30 = vmul.f32 0.00012207031, %v1975_v26 }
 0x7e5   : > { %v2064_v33 = vpop.permute.xlu1 %2063 }
 0x7e6   : > { %v1977_v28 = vadd.f32 1e-06, %v1976_v30 }
 0x7e8   : > { %4175 = vrsqrt.f32 %v1977_v28 }
 0x7e9   : > { %v1998_v37 = vpop.permute.xlu1 %1997 }
 0x7ed   : > { %v2054_v11 = vpop.permute.xlu1 %2053 }
 0x7f5   : > { %v4176_v42 = vpop.eup %4175 }
 0x7f6   : > { %v1983_v47 = vmul.f32 %v4176_v42, %v4825_v24  ;;  %v1981_v48 = vmul.f32 %v4176_v42, %v4815_v5  ;;  %v1979_v49 = vmul.f32 %v4176_v42, %v4805_v23  ;;  %v1985_v50 = vmul.f32 %v4176_v42, %v4832_v2 }
 0x7f7   : > { %v1986_v51 = vmul.f32 %v4176_v42, %v1938_v45  ;;  %v1984_v52 = vmul.f32 %v4176_v42, %v4822_v4  ;;  %v1982_v60 = vmul.f32 %v4176_v42, %v4812_v10  ;;  %v1980_v61 = vmul.f32 %v4176_v42, %v4802_v22  ;;  %v2059_v4 = vpop.permute.xlu0 %2058 }
 0x7f8   : > { %v2039_v62 = vmul.f32 %v2018_v7, %v1983_v47  ;;  %v2037_v63 = vmul.f32 %v2008_v27, %v1981_v48  ;;  %v2035_v0 = vmul.f32 %v1998_v37, %v1979_v49  ;;  %v2041_v9 = vmul.f32 %v2028_v32, %v1985_v50 }
 0x7f9   : > { %v2042_v40 = vmul.f32 %v2033_v14, %v1986_v51  ;;  %v2040_v24 = vmul.f32 %v2023_v3, %v1984_v52  ;;  %v2038_v13 = vmul.f32 %v2013_v16, %v1982_v60  ;;  %v2036_v5 = vmul.f32 %v2003_v44, %v1980_v61 }
 0x7fa   : > { %v2095_v39 = vadd.f32 %v2074_v25, %v2039_v62  ;;  %v2093_v23 = vadd.f32 %v2064_v33, %v2037_v63  ;;  %v2091_v36 = vadd.f32 %v2054_v11, %v2035_v0  ;;  %v2097_v2 = vadd.f32 %v2084_v17, %v2041_v9 }
 0x7fb   : > { %v2098_v45 = vadd.f32 %v2089_v31, %v2042_v40  ;;  %v2096_v15 = vadd.f32 %v2079_v29, %v2040_v24  ;;  %v2094_v18 = vadd.f32 %v2069_v34, %v2038_v13  ;;  %v2092_v35 = vadd.f32 %v2059_v4, %v2036_v5  ;;  %v2205_v4 = vld [vmem:[%s5260_s28 + $0x10] sm:$0xff] }
 0x7fc   : > { %v2111_v43 = vmul.f32 0.70710677, %v2095_v39  ;;  %v2109_v10 = vmul.f32 0.70710677, %v2093_v23  ;;  %v2107_v22 = vmul.f32 0.70710677, %v2091_v36 }
 0x7fd   : > { %v2113_v20 = vmul.f32 0.70710677, %v2097_v2  ;;  %v2114_v32 = vmul.f32 0.70710677, %v2098_v45  ;;  %v2112_v14 = vmul.f32 0.70710677, %v2096_v15 }
 0x7fe   : > { %4177 = verf.f32 %v2111_v43  ;;  %v2110_v55 = vmul.f32 0.70710677, %v2094_v18  ;;  %v2108_v19 = vmul.f32 0.70710677, %v2092_v35  ;;  %v2103_v12 = vmul.f32 0.5, %v2095_v39  ;;  %v2206_v43 = vld [vmem:[%s5260_s28 + $0x18] sm:$0xff] }
 0x7ff   : > { %4179 = verf.f32 %v2109_v10  ;;  %v2105_v25 = vmul.f32 0.5, %v2097_v2  ;;  %v2106_v28 = vmul.f32 0.5, %v2098_v45  ;;  %v2104_v16 = vmul.f32 0.5, %v2096_v15  ;;  %v2203_v45 = vld [vmem:[%s5260_s28] sm:$0xff]  ;;  %v2204_v15 = vld [vmem:[%s5260_s28 + $0x8] sm:$0xff] }
 0x800   : > { %4181 = verf.f32 %v2107_v22  ;;  %v2101_v48 = vmul.f32 0.5, %v2093_v23  ;;  %v2102_v50 = vmul.f32 0.5, %v2094_v18  ;;  %v2099_v52 = vmul.f32 0.5, %v2091_v36  ;;  %v4133_v10 = vld [vmem:[%s5261_s3 + $0x4] ss:$8 sps:$4 sm:$0xff]  }
 0x801   : > { %4183 = verf.f32 %v2113_v20  ;;  %v2100_v61 = vmul.f32 0.5, %v2092_v35  ;;  %3629 = vmatprep.mubr.msk.bf16.mxu1 %vm1462_vm0, %v4133_v10 }
 0x802   : > { %4185 = verf.f32 %v2114_v32 }
 0x803   : > { %4187 = verf.f32 %v2112_v14 }
 0x804   : > { %4189 = verf.f32 %v2110_v55 }
 0x805   : > { %4191 = verf.f32 %v2108_v19 }
 0x80b   : > { %v4178_v17 = vpop.eup %4177 }
 0x80c   : > { %v4180_v31 = vpop.eup %4179  ;;  %v2127_v6 = vadd.f32 1.0, %v4178_v17 }
 0x80d   : > { %v4182_v7 = vpop.eup %4181  ;;  %v2125_v30 = vadd.f32 1.0, %v4180_v31 }
 0x80e   : > { %v4184_v3 = vpop.eup %4183  ;;  %v2135_v34 = vmul.f32 %v2127_v6, %v2103_v12  ;;  %v2123_v37 = vadd.f32 1.0, %v4182_v7 }
 0x80f   : > { %v4186_v1 = vpop.eup %4185  ;;  %v2129_v26 = vadd.f32 1.0, %v4184_v3  ;;  %v2133_v63 = vmul.f32 %v2125_v30, %v2101_v48 }
 0x810   : > { %v4188_v29 = vpop.eup %4187  ;;  %v2130_v27 = vadd.f32 1.0, %v4186_v1  ;;  %v2131_v40 = vmul.f32 %v2123_v37, %v2099_v52  ;;  %v4131_v52 = vld [vmem:[%s5261_s3] ss:$8 sps:$4 sm:$0xff]  }
 0x811   : > { %v4190_v33 = vpop.eup %4189  ;;  %v2137_v42 = vmul.f32 %v2129_v26, %v2105_v25  ;;  %v2128_v44 = vadd.f32 1.0, %v4188_v29 }
 0x812   : > { %v4192_v47 = vpop.eup %4191  ;;  %v2138_v49 = vmul.f32 %v2130_v27, %v2106_v28  ;;  %v2126_v51 = vadd.f32 1.0, %v4190_v33 }
 0x813   : > { %v2136_v60 = vmul.f32 %v2128_v44, %v2104_v16  ;;  %v2124_v62 = vadd.f32 1.0, %v4192_v47 }
 0x814   : > { %v4013_v0 = vpack.i.bf16 %v2138_v49, %v2137_v42  ;;  %v2202_v9 = vpack.c.bf16 %v2138_v49, %v2137_v42  ;;  %v2134_v11 = vmul.f32 %v2126_v51, %v2102_v50 }
 0x815   : > { %v4018_v24 = vpack.i.bf16 %v2136_v60, %v2135_v34  ;;  %v2132_v13 = vmul.f32 %v2124_v62, %v2100_v61  ;;  %v2201_v5 = vpack.c.bf16 %v2136_v60, %v2135_v34  ;;  %v4134_v60 = vld [vmem:[%s5261_s3 + $0x14] ss:$8 sps:$4 sm:$0xff]   ;;  %v4136_v61 = vld [vmem:[%s5261_s3 + $0x10] ss:$8 sps:$4 sm:$0xff]   ;;  %s5265_s3 = sld [smem:[#allocation20_spill]] }
 0x816   : > { %4014 = vrot.lane.b32.xlu1 %v4013_v0, %s5199_s1  ;;  %2252 = vmatpush1.bf16.msra.mxu1 %v2202_v9  ;;  %v4023_v39 = vpack.i.bf16 %v2134_v11, %v2133_v63  ;;  %v2200_v36 = vpack.c.bf16 %v2134_v11, %v2133_v63 }
 0x817   : > { %4019 = vrot.lane.b32.xlu0 %v4018_v24, %s5199_s1  ;;  %2253 = vmatprep.subr.bf16.mxu1 %v4325_v8  ;;  %v4028_v23 = vpack.i.bf16 %v2132_v13, %v2131_v40  ;;  %v2199_v2 = vpack.c.bf16 %v2132_v13, %v2131_v40 }
 0x81a   : > { %2254 = vmatpush1.bf16.msra.mxu1 %v2201_v5  ;;  %4024 = vrot.lane.b32.xlu1 %v4023_v39, %s5199_s1 }
 0x81b   : > { %4029 = vrot.lane.b32.xlu0 %v4028_v23, %s5199_s1  ;;  %2255 = vmatprep.subr.bf16.mxu1 %v4325_v8  ;;  %s5262_s1 = sld [smem:[#allocation15_spill]] }
 0x81e   : > { %4034 = vrot.lane.b32.xlu1 %v4013_v0, %s5201_s5  ;;  %2256 = vmatpush1.bf16.msra.mxu1 %v2200_v36 }
 0x81f   : > { %4039 = vrot.lane.b32.xlu0 %v4018_v24, %s5201_s5  ;;  %2257 = vmatprep.subr.bf16.mxu1 %v4325_v8 }
 0x822   : > { %4044 = vrot.lane.b32.xlu1 %v4023_v39, %s5201_s5  ;;  %2258 = vmatpush1.bf16.msra.mxu1 %v2199_v2 }
 0x823   : > { %4049 = vrot.lane.b32.xlu0 %v4028_v23, %s5201_s5  ;;  %2259 = vmatprep.subr.bf16.mxu1 %v4325_v8  ;;  %s5263_s5 = sld [smem:[#allocation16_spill]] }
 0x826   : > { %2209 = vperm.xlu1 %3952, %v2203_v45  }
 0x827   : > { %2214 = vperm.xlu0 %3951, %v2204_v15  }
 0x82a   : > { %2219 = vperm.xlu1 %3952, %v2205_v4  }
 0x82b   : > { %2224 = vperm.xlu0 %3951, %v2206_v43  }
 0x888   : > { %v4015_v18 = vpop.permute.xlu1 %4014 }
 0x889   : > { %v4017_v22 = vunpack.i.h.bf16 %v4015_v18  ;;  %v4016_v35 = vunpack.i.l.bf16 %v4015_v18  ;;  %v4020_v20 = vpop.permute.xlu0 %4019 }
 0x88a   : > { %v4022_v14 = vunpack.i.h.bf16 %v4020_v20  ;;  %v4021_v55 = vunpack.i.l.bf16 %v4020_v20 }
 0x88b   : > { %v3606_v32 = vpack.c.bf16 %v4017_v22, %v4016_v35 }
 0x88c   : > { %v4025_v19 = vpop.permute.xlu1 %4024  ;;  %v3609_v17 = vpack.c.bf16 %v4022_v14, %v4021_v55 }
 0x88d   : > { %3607 = vmatpush1.bf16.msk.msra.mxu1 %vm4676_vm2, %v3606_v32  ;;  %v4027_v31 = vunpack.i.h.bf16 %v4025_v19  ;;  %v4026_v7 = vunpack.i.l.bf16 %v4025_v19  ;;  %v4030_v6 = vpop.permute.xlu0 %4029 }
 0x88e   : > { %2261 = vmatprep.subr.bf16.mxu1 %v4325_v8  ;;  %v4032_v1 = vunpack.i.h.bf16 %v4030_v6  ;;  %v4031_v12 = vunpack.i.l.bf16 %v4030_v6 }
 0x88f   : > { %v3612_v3 = vpack.c.bf16 %v4027_v31, %v4026_v7 }
 0x890   : > { %v4035_v25 = vpop.permute.xlu1 %4034  ;;  %v3615_v26 = vpack.c.bf16 %v4032_v1, %v4031_v12 }
 0x891   : > { %3610 = vmatpush1.bf16.msk.msra.mxu1 %vm4676_vm2, %v3609_v17  ;;  %v4037_v29 = vunpack.i.h.bf16 %v4035_v25  ;;  %v4036_v30 = vunpack.i.l.bf16 %v4035_v25  ;;  %v4040_v28 = vpop.permute.xlu0 %4039 }
 0x892   : > { %2263 = vmatprep.subr.bf16.mxu1 %v4325_v8  ;;  %v4042_v16 = vunpack.i.h.bf16 %v4040_v28  ;;  %v4041_v33 = vunpack.i.l.bf16 %v4040_v28 }
 0x893   : > { %v3618_v27 = vpack.c.bf16 %v4037_v29, %v4036_v30 }
 0x894   : > { %v4045_v34 = vpop.permute.xlu1 %4044  ;;  %v3621_v37 = vpack.c.bf16 %v4042_v16, %v4041_v33  ;;  %v2380_v16 = vld [vmem:[%s5263_s5 + $0x10] sm:$0xff] }
 0x895   : > { %3613 = vmatpush1.bf16.msk.msra.mxu1 %vm4676_vm2, %v3612_v3  ;;  %v4047_v42 = vunpack.i.h.bf16 %v4045_v34  ;;  %v4046_v44 = vunpack.i.l.bf16 %v4045_v34  ;;  %v4050_v47 = vpop.permute.xlu0 %4049  ;;  %v2352_v33 = vld [vmem:[%s5262_s1 + $0x10] sm:$0xff]  ;;  %v2350_v34 = vld [vmem:[%s5262_s1] sm:$0xff] }
 0x896   : > { %2265 = vmatprep.subr.bf16.mxu1 %v4325_v8  ;;  %v4052_v49 = vunpack.i.h.bf16 %v4050_v47  ;;  %v4051_v50 = vunpack.i.l.bf16 %v4050_v47  ;;  %v2379_v47 = vld [vmem:[%s5263_s5 + $0x8] sm:$0xff] }
 0x897   : > { %v3624_v48 = vpack.c.bf16 %v4047_v42, %v4046_v44  ;;  %v2378_v42 = vld [vmem:[%s5263_s5] sm:$0xff]  ;;  %v2351_v44 = vld [vmem:[%s5262_s1 + $0x8] sm:$0xff] }
 0x898   : > { %v3627_v51 = vpack.c.bf16 %v4052_v49, %v4051_v50 }
 0x899   : > { %3616 = vmatpush1.bf16.msk.msra.mxu1 %vm4676_vm2, %v3615_v26 }
 0x89a   : > { %2275 = vmatprep.subr.bf16.mxu1 %v4325_v8 }
 0x89d   : > { %3619 = vmatpush2.bf16.msk.msra.mxu1 %vm4692_vm4, %v3618_v27  ;;  %v2353_v27 = vld [vmem:[%s5262_s1 + $0x18] sm:$0xff]  ;;  %s5264_s1 = sld [smem:[#allocation18_spill]] }
 0x89e   : > { %2277 = vmatprep.subr.bf16.mxu1 %v4325_v8 }
 0x8a1   : > { %3622 = vmatpush2.bf16.msk.msra.mxu1 %vm4692_vm4, %v3621_v37  ;;  %v2210_v62 = vpop.permute.xlu1 %2209  ;;  %v2381_v37 = vld [vmem:[%s5263_s5 + $0x18] sm:$0xff]  ;;  %s5266_s5 = sld [smem:[#allocation17_spill]] }
 0x8a2   : > { %2279 = vmatprep.subr.bf16.mxu1 %v4325_v8  ;;  %v2215_v11 = vpop.permute.xlu0 %2214 }
 0x8a5   : > { %3625 = vmatpush2.bf16.msk.msra.mxu1 %vm4692_vm4, %v3624_v48  ;;  %v2220_v5 = vpop.permute.xlu1 %2219 }
 0x8a6   : > { %2281 = vmatprep.subr.bf16.mxu1 %v4325_v8  ;;  %v2225_v2 = vpop.permute.xlu0 %2224 }
 0x8a9   : > { %3628 = vmatpush2.bf16.msk.msra.mxu1 %vm4692_vm4, %v3627_v51 }
 0x8ac   : > { %2284 = vmatmul.mubr.bf16.vlgmr.msra.gmra.mxu1 %v4131_v52 }
 0x8ad   : > { %3630 = vmatprep.mubr.msk.bf16.mxu1 %vm1462_vm0, %v4134_v60 }
 0x8b4   : > { %2292 = vmatmul.mubr.bf16.gmra.mxu1 %v4136_v61 }
 0x96c   : > { %v2285_v63 = vpop.f32.mrf.mxu1 }
 0x96d   : > { %v2286_v0 = vadd.f32 %v2285_v63, %v2210_v62 }
 0x96e   : > { %v2287_v9 = vpop.f32.mrf.mxu1 }
 0x96f   : > { %2300 = vadd.xlane.f32.xlu1 %v2286_v0 }
 0x970   : > { %v2288_v40 = vpop.f32.mrf.mxu1 }
 0x971   : > { %v2289_v24 = vadd.f32 %v2288_v40, %v2215_v11 }
 0x972   : > { %v2290_v13 = vpop.f32.mrf.mxu1 }
 0x973   : > { %2302 = vadd.xlane.f32.xlu0 %v2289_v24 }
 0x974   : > { %v2293_v39 = vpop.f32.mrf.mxu1 }
 0x975   : > { %v2294_v23 = vadd.f32 %v2293_v39, %v2220_v5 }
 0x976   : > { %v2295_v36 = vpop.f32.mrf.mxu1 }
 0x977   : > { %2304 = vadd.xlane.f32.xlu0 %v2294_v23 }
 0x978   : > { %v2296_v45 = vpop.f32.mrf.mxu1 }
 0x979   : > { %v2297_v15 = vadd.f32 %v2296_v45, %v2225_v2 }
 0x97a   : > { %v2298_v4 = vpop.f32.mrf.mxu1 }
 0x97b   : > { %2306 = vadd.xlane.f32.xlu1 %v2297_v15 }
 0x9f8   : > { %v2301_v10 = vpop.xlane.xlu1 %2300 }
 0x9fc   : > { %v2303_v43 = vpop.xlane.xlu0 %2302 }
 0x9fd   : > { %v2308_v22 = vadd.f32 %v2303_v43, %v2301_v10 }
 0xa00   : > { %v2305_v18 = vpop.xlane.xlu0 %2304 }
 0xa01   : > { %v2309_v35 = vadd.f32 %v2308_v22, %v2305_v18 }
 0xa04   : > { %v2307_v20 = vpop.xlane.xlu1 %2306 }
 0xa05   : > { %v2310_v32 = vadd.f32 %v2309_v35, %v2307_v20 }
 0xa07   : > { %v2311_v14 = vrot.slane %v2310_v32, 4 }
 0xa09   : > { %v2312_v55 = vadd.f32 %v2311_v14, %v2310_v32 }
 0xa0b   : > { %v2313_v19 = vrot.slane %v2312_v55, 2 }
 0xa0d   : > { %v2314_v17 = vadd.f32 %v2313_v19, %v2312_v55 }
 0xa0f   : > { %v2315_v31 = vrot.slane %v2314_v17, 1 }
 0xa11   : > { %v2316_v7 = vadd.f32 %v2315_v31, %v2314_v17 }
 0xa13   : > { %v2317_v6 = vmul.f32 0.00024414063, %v2316_v7 }
 0xa15   : > { %v2319_v3 = vsub.f32 %v2289_v24, %v2317_v6  ;;  %v2318_v1 = vsub.f32 %v2286_v0, %v2317_v6  ;;  %v2321_v26 = vsub.f32 %v2297_v15, %v2317_v6  ;;  %v2320_v29 = vsub.f32 %v2294_v23, %v2317_v6 }
 0xa17   : > { %v2323_v12 = vmul.f32 %v2319_v3, %v2319_v3  ;;  %v2322_v25 = vmul.f32 %v2318_v1, %v2318_v1  ;;  %v2325_v30 = vmul.f32 %v2321_v26, %v2321_v26  ;;  %v2324_v28 = vmul.f32 %v2320_v29, %v2320_v29 }
 0xa19   : > { %2328 = vadd.xlane.f32.xlu1 %v2323_v12  ;;  %2326 = vadd.xlane.f32.xlu0 %v2322_v25 }
 0xa1d   : > { %2332 = vadd.xlane.f32.xlu1 %v2325_v30  ;;  %2330 = vadd.xlane.f32.xlu0 %v2324_v28 }
 0xa2e   : > { %2371 = vperm.xlu1 %3952, %v2353_v27  }
 0xa32   : > { %2394 = vperm.xlu1 %3952, %v2380_v16  }
 0xa33   : > { %2366 = vperm.xlu0 %3951, %v2352_v33  }
 0xa36   : > { %2356 = vperm.xlu1 %3952, %v2350_v34  }
 0xa37   : > { %2399 = vperm.xlu0 %3951, %v2381_v37  }
 0xa3a   : > { %2384 = vperm.xlu1 %3952, %v2378_v42  }
 0xa3b   : > { %2361 = vperm.xlu0 %3951, %v2351_v44  }
 0xa3f   : > { %2389 = vperm.xlu0 %3951, %v2379_v47  }
 0xaa2   : > { %v2329_v48 = vpop.xlane.xlu1 %2328  ;;  %v2327_v49 = vpop.xlane.xlu0 %2326 }
 0xaa3   : > { %v2334_v50 = vadd.f32 %v2329_v48, %v2327_v49 }
 0xaa6   : > { %v2331_v51 = vpop.xlane.xlu0 %2330  ;;  %v2333_v60 = vpop.xlane.xlu1 %2332 }
 0xaa7   : > { %v2335_v52 = vadd.f32 %v2334_v50, %v2331_v51 }
 0xaa9   : > { %v2336_v61 = vadd.f32 %v2335_v52, %v2333_v60 }
 0xaaa   : > { %v2372_v5 = vpop.permute.xlu1 %2371 }
 0xaab   : > { %v2337_v62 = vrot.slane %v2336_v61, 4 }
 0xaad   : > { %v2338_v63 = vadd.f32 %v2337_v62, %v2336_v61  ;;  %v2460_v62 = vld [vmem:[%s5264_s1] sm:$0xff] }
 0xaae   : > { %v2367_v39 = vpop.permute.xlu0 %2366  ;;  %v2395_v23 = vpop.permute.xlu1 %2394 }
 0xaaf   : > { %v2339_v0 = vrot.slane %v2338_v63, 2 }
 0xab1   : > { %v2340_v9 = vadd.f32 %v2339_v0, %v2338_v63  ;;  %v2461_v63 = vld [vmem:[%s5264_s1 + $0x8] sm:$0xff]  ;;  %v2553_v0 = vld [vmem:[%s5265_s3] sm:$0xff] }
 0xab2   : > { %v2400_v36 = vpop.permute.xlu0 %2399  ;;  %v2357_v2 = vpop.permute.xlu1 %2356 }
 0xab3   : > { %v2341_v11 = vrot.slane %v2340_v9, 1 }
 0xab5   : > { %v2342_v40 = vadd.f32 %v2341_v11, %v2340_v9  ;;  %v2554_v9 = vld [vmem:[%s5265_s3 + $0x8] sm:$0xff]  ;;  %v2462_v11 = vld [vmem:[%s5264_s1 + $0x10] sm:$0xff] }
 0xab6   : > { %v2362_v45 = vpop.permute.xlu0 %2361  ;;  %v2385_v14 = vpop.permute.xlu1 %2384 }
 0xab7   : > { %v2343_v24 = vmul.f32 0.00024414063, %v2342_v40  ;;  %v4137_v40 = vld [vmem:[%s5266_s5] sm:$0xff]  }
 0xab8   : > { %3813 = vmatprep.mubr.msk.bf16.mxu0 %vm1712_vm5, %v4137_v40 }
 0xab9   : > { %v2344_v13 = vadd.f32 1e-06, %v2343_v24  ;;  %v2555_v24 = vld [vmem:[%s5265_s3 + $0x10] sm:$0xff] }
 0xaba   : > { %v2390_v55 = vpop.permute.xlu0 %2389 }
 0xabb   : > { %4193 = vrsqrt.f32 %v2344_v13  ;;  %v2463_v13 = vld [vmem:[%s5264_s1 + $0x18] sm:$0xff]  ;;  %s5269_s1 = sld [smem:[#allocation19_spill]] }
 0xac8   : > { %v4194_v15 = vpop.eup %4193 }
 0xac9   : > { %v2349_v4 = vmul.f32 %v4194_v15, %v2321_v26  ;;  %v2348_v43 = vmul.f32 %v4194_v15, %v2320_v29  ;;  %v2346_v10 = vmul.f32 %v4194_v15, %v2318_v1  ;;  %v2347_v18 = vmul.f32 %v4194_v15, %v2319_v3 }
 0xacb   : > { %v2377_v22 = vmul.f32 %v2372_v5, %v2349_v4  ;;  %v2376_v35 = vmul.f32 %v2367_v39, %v2348_v43  ;;  %v2374_v20 = vmul.f32 %v2357_v2, %v2346_v10  ;;  %v2375_v32 = vmul.f32 %v2362_v45, %v2347_v18  ;;  %v2556_v5 = vld [vmem:[%s5265_s3 + $0x18] sm:$0xff]  ;;  %s3703_s3 = sshll.u32 %s4561_s11, 4  ;;  %s5273_s11 = sld [smem:[#allocation24_spill]] }
 0xacd   : > { %v2404_v19 = vadd.f32 %v2395_v23, %v2376_v35  ;;  %v2405_v17 = vadd.f32 %v2400_v36, %v2377_v22  ;;  %v2402_v31 = vadd.f32 %v2385_v14, %v2374_v20  ;;  %v2403_v7 = vadd.f32 %v2390_v55, %v2375_v32 }
 0xacf   : > { %v2412_v6 = vmul.f32 0.70710677, %v2404_v19  ;;  %v2413_v12 = vmul.f32 0.70710677, %v2405_v17  ;;  %v2410_v25 = vmul.f32 0.70710677, %v2402_v31 }
 0xad0   : > { %v2411_v30 = vmul.f32 0.70710677, %v2403_v7  ;;  %v2408_v26 = vmul.f32 0.5, %v2404_v19  ;;  %v2409_v27 = vmul.f32 0.5, %v2405_v17  ;;  %v2406_v37 = vmul.f32 0.5, %v2402_v31  ;;  %v4138_v19 = vld [vmem:[%s5266_s5 + $0x8] sm:$0xff]  }
 0xad1   : > { %4195 = verf.f32 %v2412_v6  ;;  %v2407_v47 = vmul.f32 0.5, %v2403_v7  ;;  %v2549_v17 = vld [vmem:[%s5269_s1] sm:$0xff] }
 0xad2   : > { %4197 = verf.f32 %v2413_v12 }
 0xad3   : > { %4199 = verf.f32 %v2410_v25 }
 0xad4   : > { %4201 = verf.f32 %v2411_v30 }
 0xade   : > { %v4196_v1 = vpop.eup %4195 }
 0xadf   : > { %v4198_v3 = vpop.eup %4197  ;;  %v2420_v29 = vadd.f32 1.0, %v4196_v1 }
 0xae0   : > { %v4200_v28 = vpop.eup %4199  ;;  %v2421_v16 = vadd.f32 1.0, %v4198_v3 }
 0xae1   : > { %v4202_v33 = vpop.eup %4201  ;;  %v2424_v34 = vmul.f32 %v2420_v29, %v2408_v26  ;;  %v2418_v42 = vadd.f32 1.0, %v4200_v28 }
 0xae2   : > { %v2425_v44 = vmul.f32 %v2421_v16, %v2409_v27  ;;  %v2419_v48 = vadd.f32 1.0, %v4202_v33 }
 0xae3   : > { %v2422_v49 = vmul.f32 %v2418_v42, %v2406_v37 }
 0xae4   : > { %v2423_v50 = vmul.f32 %v2419_v48, %v2407_v47  ;;  %v4053_v51 = vpack.i.bf16 %v2425_v44, %v2424_v34  ;;  %v2459_v52 = vpack.c.bf16 %v2425_v44, %v2424_v34 }
 0xae6   : > { %4054 = vrot.lane.b32.xlu1 %v4053_v51, %s5267_s6  ;;  %v4058_v60 = vpack.i.bf16 %v2423_v50, %v2422_v49  ;;  %v2458_v61 = vpack.c.bf16 %v2423_v50, %v2422_v49 }
 0xae8   : > { %4059 = vrot.lane.b32.xlu0 %v4058_v60, %s5267_s6 }
 0xaea   : > { %4064 = vrot.lane.b32.xlu1 %v4053_v51, %s5268_s8 }
 0xaec   : > { %4069 = vrot.lane.b32.xlu0 %v4058_v60, %s5268_s8 }
 0xaee   : > { %2466 = vperm.xlu1 %3952, %v2460_v62  }
 0xaf0   : > { %2471 = vperm.xlu0 %3951, %v2461_v63  }
 0xaf2   : > { %2559 = vperm.xlu1 %3952, %v2553_v0  }
 0xaf4   : > { %2564 = vperm.xlu0 %3951, %v2554_v9  }
 0xaf6   : > { %2476 = vperm.xlu1 %3952, %v2462_v11  }
 0xaf8   : > { %2569 = vperm.xlu0 %3951, %v2555_v24  }
 0xafa   : > { %2481 = vperm.xlu1 %3952, %v2463_v13  }
 0xafc   : > { %2574 = vperm.xlu0 %3951, %v2556_v5  }
 0xb58   : > { %v4055_v39 = vpop.permute.xlu1 %4054 }
 0xb59   : > { %v4057_v23 = vunpack.i.h.bf16 %v4055_v39  ;;  %v4056_v36 = vunpack.i.l.bf16 %v4055_v39 }
 0xb5a   : > { %v4060_v2 = vpop.permute.xlu0 %4059 }
 0xb5b   : > { %v3634_v45 = vpack.c.bf16 %v4057_v23, %v4056_v36  ;;  %v4062_v15 = vunpack.i.h.bf16 %v4060_v2  ;;  %v4061_v4 = vunpack.i.l.bf16 %v4060_v2 }
 0xb5c   : > { %v4065_v10 = vpop.permute.xlu1 %4064 }
 0xb5d   : > { %v3637_v43 = vpack.c.bf16 %v4062_v15, %v4061_v4  ;;  %3801 = vmatprep.subr.msk.bf16.mxu0 %vm4692_vm4, %v3634_v45  ;;  %v4067_v18 = vunpack.i.h.bf16 %v4065_v10  ;;  %v4066_v22 = vunpack.i.l.bf16 %v4065_v10 }
 0xb5e   : > { %3802 = vmatpush3.bf16.msk.msra.mxu0 %vm4692_vm4, %v3634_v45  ;;  %v4070_v35 = vpop.permute.xlu0 %4069 }
 0xb5f   : > { %3803 = vmatprep.subr.msk.bf16.mxu0 %vm4692_vm4, %v3637_v43  ;;  %v3640_v20 = vpack.c.bf16 %v4067_v18, %v4066_v22  ;;  %v4072_v32 = vunpack.i.h.bf16 %v4070_v35  ;;  %v4071_v14 = vunpack.i.l.bf16 %v4070_v35 }
 0xb61   : > { %v3643_v55 = vpack.c.bf16 %v4072_v32, %v4071_v14 }
 0xb62   : > { %3804 = vmatpush3.bf16.msk.msra.mxu0 %vm4692_vm4, %v3637_v43 }
 0xb63   : > { %3805 = vmatprep.subr.bf16.mxu0 %v2459_v52 }
 0xb66   : > { %3806 = vmatpush3.bf16.msra.mxu0 %v2459_v52 }
 0xb67   : > { %3807 = vmatprep.subr.bf16.mxu0 %v2458_v61 }
 0xb6a   : > { %3808 = vmatpush3.bf16.msra.mxu0 %v2458_v61 }
 0xb6b   : > { %3809 = vmatprep.subr.msk.bf16.mxu0 %vm4676_vm2, %v3640_v20 }
 0xb6e   : > { %3810 = vmatpush3.bf16.msk.msra.mxu0 %vm4676_vm2, %v3640_v20 }
 0xb6f   : > { %3811 = vmatprep.subr.msk.bf16.mxu0 %vm4676_vm2, %v3643_v55 }
 0xb72   : > { %3812 = vmatpush3.bf16.msk.msra.mxu0 %vm4676_vm2, %v3643_v55 }
 0xb73   : > { %3817 = vmatprep.subr.mxu0 %v4797_v59 }
 0xb75   : > { %3814 = vmatmul.mubr.msk.bf16.vlgmr.msra.gmra.mxu0 %vm1712_vm5, %v4138_v19 }
 0xb76   : > { %3818 = vmatpush3.msra.mxu0 %v4797_v59  ;;  %3833 = vmatprep.mubr.msk.f32.mxu0 %vm1462_vm0, %v2549_v17  ;;  %v2467_v59 = vpop.permute.xlu1 %2466 }
 0xb77   : > { %3819 = vmatprep.subr.mxu0 %v4795_v58 }
 0xb78   : > { %3820 = vmatpush3.msra.mxu0 %v4795_v58  ;;  %v2550_v58 = vld [vmem:[%s5269_s1 + $0x8] sm:$0xff] }
 0xb79   : > { %3821 = vmatprep.subr.mxu0 %v4791_v57 }
 0xb7a   : > { %3822 = vmatpush3.msra.mxu0 %v4791_v57  ;;  %v2551_v57 = vld [vmem:[%s5269_s1 + $0x10] sm:$0xff]  ;;  %v2560_v7 = vpop.permute.xlu1 %2559 }
 0xb7b   : > { %3823 = vmatprep.subr.mxu0 %v4789_v56 }
 0xb7c   : > { %3824 = vmatpush3.msra.mxu0 %v4789_v56 }
 0xb7d   : > { %3825 = vmatprep.subr.mxu0 %v4781_v53 }
 0xb7e   : > { %3826 = vmatpush3.msra.mxu0 %v4781_v53  ;;  %v2552_v53 = vld [vmem:[%s5269_s1 + $0x18] sm:$0xff]  ;;  %s5270_s1 = sld [smem:[#allocation7_spill]] }
 0xb7f   : > { %3827 = vmatprep.subr.mxu0 %v4783_v54 }
 0xb80   : > { %3828 = vmatpush3.msra.mxu0 %v4783_v54  ;;  %v2472_v54 = vpop.permute.xlu0 %2471 }
 0xb81   : > { %3829 = vmatprep.subr.mxu0 %v4775_v38 }
 0xb82   : > { %3830 = vmatpush3.msra.mxu0 %v4775_v38 }
 0xb83   : > { %3831 = vmatprep.subr.mxu0 %v4777_v46 }
 0xb84   : > { %3832 = vmatpush3.msra.mxu0 %v4777_v46  ;;  %v2565_v38 = vpop.permute.xlu0 %2564  ;;  %v2477_v46 = vpop.permute.xlu1 %2476  ;;  %s1100_s5 = scalar_lea.vmem %s5270_s1, %s3703_s3  ;;  %s5272_s3 = sld [smem:[#allocation22_spill]] }
 0xb85   : > { %3834 = vmatmul.mubr.msk.f32.vlgmr.msra.gmra.mxu0 %vm1462_vm0, %v2550_v58  ;;  %2960 = vmatprep.subr.bf16.mxu0 %v4325_v8  ;;  %v4984_v52 = vld [vmem:[%s1100_s5] sm:$0xff]  ;;  %v4986_v60 = vld [vmem:[%s1100_s5 + $0x8] sm:$0xff]  ;;  %s5271_s5 = sld [smem:[#allocation21_spill]] }
 0xb86   : > { %3836 = vmatprep.mubr.msk.f32.mxu0 %vm1462_vm0, %v2551_v57  ;;  %s5274_s1 = sld [smem:[#allocation23_spill]] }
 0xb88   : > { %v2570_v12 = vpop.permute.xlu0 %2569  ;;  %v2482_v42 = vpop.permute.xlu1 %2481 }
 0xb89   : > { %3837 = vmatmul.mubr.msk.f32.gmra.mxu0 %vm1462_vm0, %v2552_v53 }
 0xb8b   : > { %v2751_v53 = vld [vmem:[%s5271_s5 + $0x18] sm:$0xff] }
 0xb8c   : > { %v2575_v16 = vpop.permute.xlu0 %2574 }
 0xc35   : > { %v3815_v56 = vpop.f32.mrf.mxu0 }
 0xc36   : > { %v2543_v47 = vadd.f32 %v3815_v56, %v2477_v46  ;;  %v2750_v56 = vld [vmem:[%s5271_s5 + $0x10] sm:$0xff]  ;;  %v2753_v46 = vld [vmem:[%s5271_s5 + $0x28] sm:$0xff] }
 0xc37   : > { %v2534_v31 = vpop.f32.mrf.mxu0 }
 0xc38   : > { %v2535_v29 = vadd.f32 %v2534_v31, %v2467_v59  ;;  %v2748_v59 = vld [vmem:[%s5271_s5] sm:$0xff]  ;;  %v2793_v31 = vld [vmem:[%s5272_s3 + $0x18] sm:$0xff] }
 0xc39   : > { %v3816_v6 = vpop.f32.mrf.mxu0 }
 0xc3a   : > { %v2546_v48 = vadd.f32 %v3816_v6, %v2482_v42  ;;  %v2752_v6 = vld [vmem:[%s5271_s5 + $0x20] sm:$0xff] }
 0xc3b   : > { %v2537_v25 = vpop.f32.mrf.mxu0 }
 0xc3c   : > { %v2538_v1 = vadd.f32 %v2537_v25, %v2472_v54  ;;  %v2792_v54 = vld [vmem:[%s5272_s3 + $0x10] sm:$0xff]  ;;  %v2794_v25 = vld [vmem:[%s5272_s3 + $0x20] sm:$0xff] }
 0xc45   : > { %v3835_v30 = vpop.f32.mrf.mxu0 }
 0xc46   : > { %v2661_v3 = vadd.f32 %v3835_v30, %v2565_v38  ;;  %v2790_v38 = vld [vmem:[%s5272_s3] sm:$0xff]  ;;  %v2795_v30 = vld [vmem:[%s5272_s3 + $0x28] sm:$0xff] }
 0xc47   : > { %v2655_v26 = vpop.f32.mrf.mxu0 }
 0xc48   : > { %v4970_v28 = vadd.f32 %v2661_v3, %v2538_v1  ;;  %v2656_v27 = vadd.f32 %v2655_v26, %v2560_v7  ;;  %v2749_v7 = vld [vmem:[%s5271_s5 + $0x8] sm:$0xff] }
 0xc49   : > { %v3838_v33 = vpop.f32.mrf.mxu0 }
 0xc4a   : > { %v4972_v34 = vadd.f32 %v2656_v27, %v2535_v29  ;;  %v2671_v37 = vadd.f32 %v3838_v33, %v2575_v16  ;;  %2682 = vadd.xlane.f32.xlu0 %v4970_v28 }
 0xc4b   : > { %v2665_v44 = vpop.f32.mrf.mxu0 }
 0xc4c   : > { %v2666_v49 = vadd.f32 %v2665_v44, %v2570_v12  ;;  %2680 = vadd.xlane.f32.xlu1 %v4972_v34  ;;  %v4977_v50 = vadd.f32 %v2671_v37, %v2546_v48  ;;  %v2791_v12 = vld [vmem:[%s5272_s3 + $0x8] sm:$0xff]  ;;  %s5276_s3 = sld [smem:[#allocation26_spill]] }
 0xc4e   : > { %v4979_v51 = vadd.f32 %v2666_v49, %v2543_v47 }
 0xc50   : > { %2684 = vadd.xlane.f32.xlu0 %v4979_v51  ;;  %2686 = vadd.xlane.f32.xlu1 %v4977_v50 }
 0xc54   : > { %2688 = vadd.xlane.f32.xlu0 %v4984_v52  ;;  %2690 = vadd.xlane.f32.xlu1 %v4986_v60 }
 0xcd3   : > { %v2683_v61 = vpop.xlane.xlu0 %2682 }
 0xcd5   : > { %v2681_v62 = vpop.xlane.xlu1 %2680 }
 0xcd6   : > { %v2692_v63 = vadd.f32 %v2683_v61, %v2681_v62 }
 0xcd9   : > { %v2685_v0 = vpop.xlane.xlu0 %2684  ;;  %v2687_v9 = vpop.xlane.xlu1 %2686 }
 0xcda   : > { %v2693_v11 = vadd.f32 %v2692_v63, %v2685_v0 }
 0xcdc   : > { %v2694_v40 = vadd.f32 %v2693_v11, %v2687_v9 }
 0xcdd   : > { %v2689_v24 = vpop.xlane.xlu0 %2688  ;;  %v2691_v13 = vpop.xlane.xlu1 %2690 }
 0xcde   : > { %v2695_v5 = vadd.f32 %v2694_v40, %v2689_v24 }
 0xce0   : > { %v2696_v39 = vadd.f32 %v2695_v5, %v2691_v13 }
 0xce2   : > { %v2697_v23 = vrot.slane %v2696_v39, 4 }
 0xce4   : > { %v2698_v36 = vadd.f32 %v2697_v23, %v2696_v39 }
 0xce6   : > { %v2699_v2 = vrot.slane %v2698_v36, 2 }
 0xce8   : > { %v2700_v45 = vadd.f32 %v2699_v2, %v2698_v36 }
 0xcea   : > { %v2701_v15 = vrot.slane %v2700_v45, 1 }
 0xcec   : > { %v2702_v4 = vadd.f32 %v2701_v15, %v2700_v45 }
 0xcee   : > { %v2703_v43 = vmul.f32 0.00016276042, %v2702_v4 }
 0xcf0   : > { %v4991_v10 = vsub.f32 %v4970_v28, %v2703_v43  ;;  %v4994_v18 = vsub.f32 %v4972_v34, %v2703_v43  ;;  %v5001_v20 = vsub.f32 %v4977_v50, %v2703_v43  ;;  %v5004_v32 = vsub.f32 %v4979_v51, %v2703_v43 }
 0xcf1   : > { %v5011_v19 = vsub.f32 %v4986_v60, %v2703_v43  ;;  %v5014_v17 = vsub.f32 %v4984_v52, %v2703_v43 }
 0xcf2   : > { %v2711_v22 = vmul.f32 %v4991_v10, %v4991_v10  ;;  %v2710_v35 = vmul.f32 %v4994_v18, %v4994_v18  ;;  %v2713_v14 = vmul.f32 %v5001_v20, %v5001_v20  ;;  %v2712_v55 = vmul.f32 %v5004_v32, %v5004_v32 }
 0xcf3   : > { %v2715_v58 = vmul.f32 %v5011_v19, %v5011_v19  ;;  %v2714_v57 = vmul.f32 %v5014_v17, %v5014_v17 }
 0xcf4   : > { %2718 = vadd.xlane.f32.xlu1 %v2711_v22  ;;  %2716 = vadd.xlane.f32.xlu0 %v2710_v35 }
 0xcf8   : > { %2722 = vadd.xlane.f32.xlu1 %v2713_v14  ;;  %2720 = vadd.xlane.f32.xlu0 %v2712_v55 }
 0xcfc   : > { %2726 = vadd.xlane.f32.xlu1 %v2715_v58  ;;  %2724 = vadd.xlane.f32.xlu0 %v2714_v57 }
 0xd0d   : > { %2771 = vperm.xlu1 %3952, %v2751_v53  }
 0xd11   : > { %2808 = vperm.xlu1 %3952, %v2792_v54  }
 0xd12   : > { %2766 = vperm.xlu0 %3951, %v2750_v56  }
 0xd15   : > { %2756 = vperm.xlu1 %3952, %v2748_v59  }
 0xd16   : > { %2813 = vperm.xlu0 %3951, %v2793_v31  }
 0xd19   : > { %2798 = vperm.xlu1 %3952, %v2790_v38  }
 0xd1a   : > { %2761 = vperm.xlu0 %3951, %v2749_v7  }
 0xd1d   : > { %2776 = vperm.xlu1 %3952, %v2752_v6  }
 0xd1e   : > { %2803 = vperm.xlu0 %3951, %v2791_v12  }
 0xd21   : > { %2818 = vperm.xlu1 %3952, %v2794_v25  }
 0xd22   : > { %2781 = vperm.xlu0 %3951, %v2753_v46  }
 0xd26   : > { %2823 = vperm.xlu0 %3951, %v2795_v30  }
 0xd7d   : > { %v2719_v1 = vpop.xlane.xlu1 %2718  ;;  %v2717_v3 = vpop.xlane.xlu0 %2716 }
 0xd7e   : > { %v2728_v26 = vadd.f32 %v2719_v1, %v2717_v3 }
 0xd81   : > { %v2723_v29 = vpop.xlane.xlu1 %2722  ;;  %v2721_v27 = vpop.xlane.xlu0 %2720 }
 0xd82   : > { %v2729_v16 = vadd.f32 %v2728_v26, %v2721_v27 }
 0xd84   : > { %v2730_v33 = vadd.f32 %v2729_v16, %v2723_v29 }
 0xd85   : > { %v2725_v37 = vpop.xlane.xlu0 %2724  ;;  %v2727_v44 = vpop.xlane.xlu1 %2726 }
 0xd86   : > { %v2731_v42 = vadd.f32 %v2730_v33, %v2725_v37 }
 0xd88   : > { %v2732_v47 = vadd.f32 %v2731_v42, %v2727_v44 }
 0xd89   : > { %v2772_v62 = vpop.permute.xlu1 %2771 }
 0xd8a   : > { %v2733_v48 = vrot.slane %v2732_v47, 4 }
 0xd8c   : > { %v2734_v49 = vadd.f32 %v2733_v48, %v2732_v47 }
 0xd8d   : > { %v2767_v63 = vpop.permute.xlu0 %2766  ;;  %v2809_v40 = vpop.permute.xlu1 %2808 }
 0xd8e   : > { %v2735_v61 = vrot.slane %v2734_v49, 2 }
 0xd90   : > { %v2736_v0 = vadd.f32 %v2735_v61, %v2734_v49 }
 0xd91   : > { %v2814_v24 = vpop.permute.xlu0 %2813  ;;  %v2757_v39 = vpop.permute.xlu1 %2756 }
 0xd92   : > { %v2737_v9 = vrot.slane %v2736_v0, 1 }
 0xd94   : > { %v2738_v11 = vadd.f32 %v2737_v9, %v2736_v0 }
 0xd95   : > { %v2762_v23 = vpop.permute.xlu0 %2761  ;;  %v2799_v36 = vpop.permute.xlu1 %2798 }
 0xd96   : > { %v2739_v13 = vmul.f32 0.00016276042, %v2738_v11 }
 0xd98   : > { %v2740_v5 = vadd.f32 1e-06, %v2739_v13 }
 0xd99   : > { %v2804_v2 = vpop.permute.xlu0 %2803  ;;  %v2777_v45 = vpop.permute.xlu1 %2776 }
 0xd9a   : > { %4203 = vrsqrt.f32 %v2740_v5 }
 0xd9d   : > { %v2782_v15 = vpop.permute.xlu0 %2781  ;;  %v2819_v12 = vpop.permute.xlu1 %2818 }
 0xda7   : > { %v4204_v4 = vpop.eup %4203 }
 0xda8   : > { %v2745_v43 = vmul.f32 %v4204_v4, %v5001_v20  ;;  %v2744_v22 = vmul.f32 %v4204_v4, %v5004_v32  ;;  %v2742_v35 = vmul.f32 %v4204_v4, %v4994_v18  ;;  %v2743_v14 = vmul.f32 %v4204_v4, %v4991_v10  ;;  %v2824_v32 = vpop.permute.xlu0 %2823 }
 0xda9   : > { %v2746_v55 = vmul.f32 %v4204_v4, %v5014_v17  ;;  %v2747_v58 = vmul.f32 %v4204_v4, %v5011_v19 }
 0xdaa   : > { %v2787_v57 = vmul.f32 %v2772_v62, %v2745_v43  ;;  %v2786_v53 = vmul.f32 %v2767_v63, %v2744_v22  ;;  %v2784_v54 = vmul.f32 %v2757_v39, %v2742_v35  ;;  %v2785_v56 = vmul.f32 %v2762_v23, %v2743_v14  ;;  %v2911_v22 = vld [vmem:[%s5273_s11] sm:$0xff]  ;;  %v2912_v35 = vld [vmem:[%s5273_s11 + $0x8] sm:$0xff]  ;;  %v2913_v14 = vld [vmem:[%s5273_s11 + $0x10] sm:$0xff] }
 0xdab   : > { %v2788_v59 = vmul.f32 %v2777_v45, %v2746_v55  ;;  %v2789_v31 = vmul.f32 %v2782_v15, %v2747_v58  ;;  %v2914_v55 = vld [vmem:[%s5273_s11 + $0x18] sm:$0xff]  ;;  %v4141_v58 = vld [vmem:[%s5274_s1 + $0x4] ss:$8 sps:$4 sm:$0xff]  }
 0xdac   : > { %v2828_v38 = vadd.f32 %v2809_v40, %v2786_v53  ;;  %v2829_v7 = vadd.f32 %v2814_v24, %v2787_v57  ;;  %v2826_v6 = vadd.f32 %v2799_v36, %v2784_v54  ;;  %v2827_v20 = vadd.f32 %v2804_v2, %v2785_v56  ;;  %3673 = vmatprep.mubr.msk.bf16.mxu0 %vm2953_vm6, %v4141_v58 }
 0xdad   : > { %v2830_v25 = vadd.f32 %v2819_v12, %v2788_v59  ;;  %v2831_v18 = vadd.f32 %v2824_v32, %v2789_v31 }
 0xdae   : > { %v2840_v46 = vmul.f32 0.70710677, %v2828_v38  ;;  %v2841_v10 = vmul.f32 0.70710677, %v2829_v7  ;;  %v2838_v30 = vmul.f32 0.70710677, %v2826_v6 }
 0xdaf   : > { %v2839_v17 = vmul.f32 0.70710677, %v2827_v20  ;;  %v2842_v19 = vmul.f32 0.70710677, %v2830_v25  ;;  %v2843_v1 = vmul.f32 0.70710677, %v2831_v18 }
 0xdb0   : > { %4205 = verf.f32 %v2840_v46  ;;  %v2834_v29 = vmul.f32 0.5, %v2828_v38  ;;  %v2835_v33 = vmul.f32 0.5, %v2829_v7  ;;  %v2832_v47 = vmul.f32 0.5, %v2826_v6 }
 0xdb1   : > { %4207 = verf.f32 %v2841_v10  ;;  %v2833_v62 = vmul.f32 0.5, %v2827_v20  ;;  %v2836_v11 = vmul.f32 0.5, %v2830_v25  ;;  %v2837_v13 = vmul.f32 0.5, %v2831_v18 }
 0xdb2   : > { %4209 = verf.f32 %v2838_v30 }
 0xdb3   : > { %4211 = verf.f32 %v2839_v17 }
 0xdb4   : > { %4213 = verf.f32 %v2842_v19 }
 0xdb5   : > { %4215 = verf.f32 %v2843_v1 }
 0xdbd   : > { %v4206_v3 = vpop.eup %4205 }
 0xdbe   : > { %v4208_v26 = vpop.eup %4207  ;;  %v2852_v27 = vadd.f32 1.0, %v4206_v3 }
 0xdbf   : > { %v4210_v16 = vpop.eup %4209  ;;  %v2853_v37 = vadd.f32 1.0, %v4208_v26 }
 0xdc0   : > { %v4212_v42 = vpop.eup %4211  ;;  %v2858_v44 = vmul.f32 %v2852_v27, %v2834_v29  ;;  %v2850_v48 = vadd.f32 1.0, %v4210_v16  ;;  %v4139_v16 = vld [vmem:[%s5274_s1] ss:$8 sps:$4 sm:$0xff]  }
 0xdc1   : > { %v4214_v49 = vpop.eup %4213  ;;  %v2859_v61 = vmul.f32 %v2853_v37, %v2835_v33  ;;  %v2851_v63 = vadd.f32 1.0, %v4212_v42  ;;  %v4142_v33 = vld [vmem:[%s5274_s1 + $0x14] ss:$8 sps:$4 sm:$0xff]   ;;  %v4144_v37 = vld [vmem:[%s5274_s1 + $0x10] ss:$8 sps:$4 sm:$0xff]   ;;  %s5275_s1 = sld [smem:[#allocation25_spill]] }
 0xdc2   : > { %v4216_v0 = vpop.eup %4215  ;;  %v2856_v9 = vmul.f32 %v2850_v48, %v2832_v47  ;;  %v2854_v40 = vadd.f32 1.0, %v4214_v49 }
 0xdc3   : > { %v2857_v24 = vmul.f32 %v2851_v63, %v2833_v62  ;;  %v2855_v5 = vadd.f32 1.0, %v4216_v0  ;;  %v4073_v39 = vpack.i.bf16 %v2859_v61, %v2858_v44  ;;  %v2909_v36 = vpack.c.bf16 %v2859_v61, %v2858_v44 }
 0xdc4   : > { %v2860_v23 = vmul.f32 %v2854_v40, %v2836_v11 }
 0xdc5   : > { %v2861_v2 = vmul.f32 %v2855_v5, %v2837_v13  ;;  %4074 = vrot.lane.b32.xlu1 %v4073_v39, %s5267_s6  ;;  %v4078_v45 = vpack.i.bf16 %v2857_v24, %v2856_v9  ;;  %v2908_v15 = vpack.c.bf16 %v2857_v24, %v2856_v9 }
 0xdc7   : > { %4079 = vrot.lane.b32.xlu0 %v4078_v45, %s5267_s6  ;;  %v4083_v4 = vpack.i.bf16 %v2861_v2, %v2860_v23  ;;  %v2910_v43 = vpack.c.bf16 %v2861_v2, %v2860_v23 }
 0xdc9   : > { %4084 = vrot.lane.b32.xlu1 %v4083_v4, %s5268_s8 }
 0xdcb   : > { %4089 = vrot.lane.b32.xlu0 %v4073_v39, %s5268_s8 }
 0xdcd   : > { %4094 = vrot.lane.b32.xlu1 %v4078_v45, %s5268_s8 }
 0xdcf   : > { %4099 = vrot.lane.b32.xlu0 %v4083_v4, %s5267_s6 }
 0xdd1   : > { %2917 = vperm.xlu1 %3952, %v2911_v22  }
 0xdd3   : > { %2922 = vperm.xlu0 %3951, %v2912_v35  }
 0xdd5   : > { %2927 = vperm.xlu1 %3952, %v2913_v14  }
 0xdd7   : > { %2932 = vperm.xlu0 %3951, %v2914_v55  }
 0xe37   : > { %v4075_v57 = vpop.permute.xlu1 %4074 }
 0xe38   : > { %v4077_v53 = vunpack.i.h.bf16 %v4075_v57  ;;  %v4076_v54 = vunpack.i.l.bf16 %v4075_v57 }
 0xe39   : > { %v4080_v56 = vpop.permute.xlu0 %4079 }
 0xe3a   : > { %v3656_v59 = vpack.c.bf16 %v4077_v53, %v4076_v54  ;;  %v4082_v31 = vunpack.i.h.bf16 %v4080_v56  ;;  %v4081_v38 = vunpack.i.l.bf16 %v4080_v56 }
 0xe3b   : > { %v4085_v6 = vpop.permute.xlu1 %4084 }
 0xe3c   : > { %3657 = vmatpush1.bf16.msk.msra.mxu0 %vm4692_vm4, %v3656_v59  ;;  %v3659_v7 = vpack.c.bf16 %v4082_v31, %v4081_v38  ;;  %v4087_v20 = vunpack.i.h.bf16 %v4085_v6  ;;  %v4086_v12 = vunpack.i.l.bf16 %v4085_v6 }
 0xe3d   : > { %2962 = vmatprep.subr.bf16.mxu0 %v4325_v8  ;;  %v4090_v32 = vpop.permute.xlu0 %4089 }
 0xe3e   : > { %v3662_v25 = vpack.c.bf16 %v4087_v20, %v4086_v12  ;;  %v4092_v18 = vunpack.i.h.bf16 %v4090_v32  ;;  %v4091_v46 = vunpack.i.l.bf16 %v4090_v32  ;;  %v3062_v20 = vld [vmem:[%s5275_s1 + $0x18] sm:$0xff]  ;;  %v3089_v12 = vld [vmem:[%s5276_s3 + $0x10] sm:$0xff] }
 0xe3f   : > { %v4095_v10 = vpop.permute.xlu1 %4094  ;;  %v3061_v32 = vld [vmem:[%s5275_s1 + $0x10] sm:$0xff] }
 0xe40   : > { %3660 = vmatpush1.bf16.msk.msra.mxu0 %vm4692_vm4, %v3659_v7  ;;  %v3665_v30 = vpack.c.bf16 %v4092_v18, %v4091_v46  ;;  %v4097_v17 = vunpack.i.h.bf16 %v4095_v10  ;;  %v4096_v19 = vunpack.i.l.bf16 %v4095_v10  ;;  %v3090_v18 = vld [vmem:[%s5276_s3 + $0x18] sm:$0xff]  ;;  %v3087_v46 = vld [vmem:[%s5276_s3] sm:$0xff]  ;;  %v3060_v10 = vld [vmem:[%s5275_s1 + $0x8] sm:$0xff] }
 0xe41   : > { %2964 = vmatprep.subr.bf16.mxu0 %v4325_v8  ;;  %v4100_v1 = vpop.permute.xlu0 %4099 }
 0xe42   : > { %v3668_v3 = vpack.c.bf16 %v4097_v17, %v4096_v19  ;;  %v4102_v26 = vunpack.i.h.bf16 %v4100_v1  ;;  %v4101_v29 = vunpack.i.l.bf16 %v4100_v1 }
 0xe44   : > { %2965 = vmatpush1.bf16.msra.mxu0 %v2910_v43  ;;  %v3671_v27 = vpack.c.bf16 %v4102_v26, %v4101_v29 }
 0xe45   : > { %2966 = vmatprep.subr.bf16.mxu0 %v4325_v8 }
 0xe48   : > { %2967 = vmatpush1.bf16.msra.mxu0 %v2909_v36 }
 0xe49   : > { %2968 = vmatprep.subr.bf16.mxu0 %v4325_v8 }
 0xe4c   : > { %2969 = vmatpush1.bf16.msra.mxu0 %v2908_v15  ;;  %v2918_v42 = vpop.permute.xlu1 %2917 }
 0xe4d   : > { %2970 = vmatprep.subr.bf16.mxu0 %v4325_v8 }
 0xe4e   : > { %v2923_v49 = vpop.permute.xlu0 %2922 }
 0xe50   : > { %3663 = vmatpush1.bf16.msk.msra.mxu0 %vm4676_vm2, %v3662_v25  ;;  %v2928_v63 = vpop.permute.xlu1 %2927  ;;  %v3059_v25 = vld [vmem:[%s5275_s1] sm:$0xff]  ;;  %s5277_s1 = sld [smem:[#allocation27_spill]] }
 0xe51   : > { %2972 = vmatprep.subr.bf16.mxu0 %v4325_v8 }
 0xe52   : > { %v2933_v40 = vpop.permute.xlu0 %2932 }
 0xe54   : > { %3666 = vmatpush1.bf16.msk.msra.mxu0 %vm4676_vm2, %v3665_v30  ;;  %v3088_v30 = vld [vmem:[%s5276_s3 + $0x8] sm:$0xff] }
 0xe55   : > { %2974 = vmatprep.subr.bf16.mxu0 %v4325_v8 }
 0xe56   : > { %v4146_v41 = vld [vmem:[%s5277_s1 + $0x8] sm:$0xff]  }
 0xe58   : > { %3669 = vmatpush1.bf16.msk.msra.mxu0 %vm4676_vm2, %v3668_v3 }
 0xe59   : > { %2990 = vmatprep.subr.bf16.mxu0 %v4325_v8 }
 0xe5c   : > { %3672 = vmatpush2.bf16.msk.msra.mxu0 %vm4692_vm4, %v3671_v27 }
 0xe5f   : > { %2993 = vmatmul.mubr.bf16.vlgmr.msra.gmra.mxu0 %v4139_v16 }
 0xe60   : > { %3674 = vmatprep.mubr.msk.bf16.mxu0 %vm2953_vm6, %v4142_v33 }
 0xe67   : > { %3001 = vmatmul.mubr.bf16.gmra.mxu0 %v4144_v37 }
 0xf1f   : > { %v2994_v44 = vpop.f32.mrf.mxu0 }
 0xf20   : > { %v2995_v47 = vadd.f32 %v2994_v44, %v2918_v42 }
 0xf21   : > { %v2996_v48 = vpop.f32.mrf.mxu0 }
 0xf22   : > { %3009 = vadd.xlane.f32.xlu1 %v2995_v47 }
 0xf23   : > { %v2997_v61 = vpop.f32.mrf.mxu0 }
 0xf24   : > { %v2998_v62 = vadd.f32 %v2997_v61, %v2923_v49 }
 0xf25   : > { %v2999_v8 = vpop.f32.mrf.mxu0 }
 0xf26   : > { %3011 = vadd.xlane.f32.xlu0 %v2998_v62 }
 0xf27   : > { %v3002_v0 = vpop.f32.mrf.mxu0 }
 0xf28   : > { %v3003_v9 = vadd.f32 %v3002_v0, %v2928_v63 }
 0xf29   : > { %v3004_v11 = vpop.f32.mrf.mxu0 }
 0xf2a   : > { %3013 = vadd.xlane.f32.xlu0 %v3003_v9 }
 0xf2b   : > { %v3005_v24 = vpop.f32.mrf.mxu0 }
 0xf2c   : > { %v3006_v13 = vadd.f32 %v3005_v24, %v2933_v40 }
 0xf2d   : > { %v3007_v5 = vpop.f32.mrf.mxu0 }
 0xf2e   : > { %3015 = vadd.xlane.f32.xlu1 %v3006_v13 }
 0xfab   : > { %v3010_v23 = vpop.xlane.xlu1 %3009 }
 0xfaf   : > { %v3012_v39 = vpop.xlane.xlu0 %3011 }
 0xfb0   : > { %v3017_v2 = vadd.f32 %v3012_v39, %v3010_v23 }
 0xfb3   : > { %v3014_v36 = vpop.xlane.xlu0 %3013 }
 0xfb4   : > { %v3018_v45 = vadd.f32 %v3017_v2, %v3014_v36 }
 0xfb7   : > { %v3016_v15 = vpop.xlane.xlu1 %3015 }
 0xfb8   : > { %v3019_v4 = vadd.f32 %v3018_v45, %v3016_v15 }
 0xfba   : > { %v3020_v43 = vrot.slane %v3019_v4, 4 }
 0xfbc   : > { %v3021_v22 = vadd.f32 %v3020_v43, %v3019_v4 }
 0xfbe   : > { %v3022_v35 = vrot.slane %v3021_v22, 2 }
 0xfc0   : > { %v3023_v14 = vadd.f32 %v3022_v35, %v3021_v22 }
 0xfc2   : > { %v3024_v55 = vrot.slane %v3023_v14, 1 }
 0xfc4   : > { %v3025_v58 = vadd.f32 %v3024_v55, %v3023_v14 }
 0xfc6   : > { %v3026_v57 = vmul.f32 0.00024414063, %v3025_v58 }
 0xfc8   : > { %v3028_v53 = vsub.f32 %v2998_v62, %v3026_v57  ;;  %v3027_v54 = vsub.f32 %v2995_v47, %v3026_v57  ;;  %v3030_v31 = vsub.f32 %v3006_v13, %v3026_v57  ;;  %v3029_v38 = vsub.f32 %v3003_v9, %v3026_v57 }
 0xfca   : > { %v3032_v56 = vmul.f32 %v3028_v53, %v3028_v53  ;;  %v3031_v59 = vmul.f32 %v3027_v54, %v3027_v54  ;;  %v3034_v7 = vmul.f32 %v3030_v31, %v3030_v31  ;;  %v3033_v6 = vmul.f32 %v3029_v38, %v3029_v38 }
 0xfcc   : > { %3037 = vadd.xlane.f32.xlu1 %v3032_v56  ;;  %3035 = vadd.xlane.f32.xlu0 %v3031_v59 }
 0xfd0   : > { %3041 = vadd.xlane.f32.xlu1 %v3034_v7  ;;  %3039 = vadd.xlane.f32.xlu0 %v3033_v6 }
 0xfe1   : > { %3080 = vperm.xlu1 %3952, %v3062_v20  }
 0xfe5   : > { %3103 = vperm.xlu1 %3952, %v3089_v12  }
 0xfe6   : > { %3075 = vperm.xlu0 %3951, %v3061_v32  }
 0xfe9   : > { %3065 = vperm.xlu1 %3952, %v3059_v25  }
 0xfea   : > { %3108 = vperm.xlu0 %3951, %v3090_v18  }
 0xfed   : > { %3093 = vperm.xlu1 %3952, %v3087_v46  }
 0xfee   : > { %3070 = vperm.xlu0 %3951, %v3060_v10  }
 0xff2   : > { %3098 = vperm.xlu0 %3951, %v3088_v30  }
0x1055   : > { %v3038_v17 = vpop.xlane.xlu1 %3037  ;;  %v3036_v19 = vpop.xlane.xlu0 %3035 }
0x1056   : > { %v3043_v1 = vadd.f32 %v3038_v17, %v3036_v19 }
0x1059   : > { %v3040_v3 = vpop.xlane.xlu0 %3039  ;;  %v3042_v29 = vpop.xlane.xlu1 %3041 }
0x105a   : > { %v3044_v26 = vadd.f32 %v3043_v1, %v3040_v3 }
0x105c   : > { %v3045_v27 = vadd.f32 %v3044_v26, %v3042_v29  ;;  %v3169_v26 = vld [vmem:[%s4494_s20] sm:$0xff]  ;;  %v3170_v29 = vld [vmem:[%s4494_s20 + $0x8] sm:$0xff] }
0x105d   : > { %v3081_v61 = vpop.permute.xlu1 %3080 }
0x105e   : > { %v3046_v16 = vrot.slane %v3045_v27, 4 }
0x1060   : > { %v3047_v33 = vadd.f32 %v3046_v16, %v3045_v27  ;;  %v3171_v27 = vld [vmem:[%s4494_s20 + $0x10] sm:$0xff]  ;;  %v3172_v16 = vld [vmem:[%s4494_s20 + $0x18] sm:$0xff] }
0x1061   : > { %v3076_v62 = vpop.permute.xlu0 %3075  ;;  %v3104_v8 = vpop.permute.xlu1 %3103 }
0x1062   : > { %v3048_v37 = vrot.slane %v3047_v33, 2 }
0x1064   : > { %v3049_v42 = vadd.f32 %v3048_v37, %v3047_v33  ;;  %v3262_v33 = vld [vmem:[%s5247_s4] sm:$0xff] }
0x1065   : > { %v3109_v63 = vpop.permute.xlu0 %3108  ;;  %v3066_v0 = vpop.permute.xlu1 %3065  ;;  %v4145_v37 = vld [vmem:[%s5277_s1] sm:$0xff]  }
0x1066   : > { %v3050_v44 = vrot.slane %v3049_v42, 1  ;;  %3851 = vmatprep.mubr.msk.bf16.mxu1 %vm1712_vm5, %v4145_v37 }
0x1068   : > { %v3051_v47 = vadd.f32 %v3050_v44, %v3049_v42  ;;  %v3263_v42 = vld [vmem:[%s5247_s4 + $0x8] sm:$0xff]  ;;  %v3264_v44 = vld [vmem:[%s5247_s4 + $0x10] sm:$0xff] }
0x1069   : > { %v3071_v9 = vpop.permute.xlu0 %3070  ;;  %v3094_v45 = vpop.permute.xlu1 %3093 }
0x106a   : > { %v3052_v48 = vmul.f32 0.00024414063, %v3051_v47  ;;  %v3265_v47 = vld [vmem:[%s5247_s4 + $0x18] sm:$0xff]  ;;  %s5278_s4 = sand.u32 1, %s4281_s16  }
0x106b   : > { %s5145_s5 = scalar_lea.sflag [#allocation3], %s5278_s4 }
0x106c   : > { %v3053_v49 = vadd.f32 1e-06, %v3052_v48 }
0x106d   : > { %v3099_v15 = vpop.permute.xlu0 %3098 }
0x106e   : > { %4217 = vrsqrt.f32 %v3053_v49 }
0x107b   : > { %v4218_v11 = vpop.eup %4217 }
0x107c   : > { %v3058_v40 = vmul.f32 %v4218_v11, %v3030_v31  ;;  %v3057_v24 = vmul.f32 %v4218_v11, %v3029_v38  ;;  %v3055_v13 = vmul.f32 %v4218_v11, %v3027_v54  ;;  %v3056_v5 = vmul.f32 %v4218_v11, %v3028_v53 }
0x107e   : > { %v3086_v39 = vmul.f32 %v3081_v61, %v3058_v40  ;;  %v3085_v23 = vmul.f32 %v3076_v62, %v3057_v24  ;;  %v3083_v36 = vmul.f32 %v3066_v0, %v3055_v13  ;;  %v3084_v2 = vmul.f32 %v3071_v9, %v3056_v5 }
0x1080   : > { %v3113_v4 = vadd.f32 %v3104_v8, %v3085_v23  ;;  %v3114_v43 = vadd.f32 %v3109_v63, %v3086_v39  ;;  %v3111_v22 = vadd.f32 %v3094_v45, %v3083_v36  ;;  %v3112_v35 = vadd.f32 %v3099_v15, %v3084_v2  ;;  %v3258_v2 = vld [vmem:[%s4499_s27] sm:$0xff] }
0x1082   : > { %v3121_v14 = vmul.f32 0.70710677, %v3113_v4  ;;  %v3122_v55 = vmul.f32 0.70710677, %v3114_v43  ;;  %v3119_v58 = vmul.f32 0.70710677, %v3111_v22 }
0x1083   : > { %v3120_v57 = vmul.f32 0.70710677, %v3112_v35  ;;  %v3117_v56 = vmul.f32 0.5, %v3113_v4  ;;  %v3118_v38 = vmul.f32 0.5, %v3114_v43  ;;  %v3115_v12 = vmul.f32 0.5, %v3111_v22 }
0x1084   : > { %4219 = verf.f32 %v3121_v14  ;;  %v3116_v18 = vmul.f32 0.5, %v3112_v35 }
0x1085   : > { %4221 = verf.f32 %v3122_v55 }
0x1086   : > { %4223 = verf.f32 %v3119_v58 }
0x1087   : > { %4225 = verf.f32 %v3120_v57 }
0x1091   : > { %v4220_v54 = vpop.eup %4219 }
0x1092   : > { %v4222_v53 = vpop.eup %4221  ;;  %v3129_v59 = vadd.f32 1.0, %v4220_v54 }
0x1093   : > { %v4224_v31 = vpop.eup %4223  ;;  %v3130_v7 = vadd.f32 1.0, %v4222_v53 }
0x1094   : > { %v4226_v6 = vpop.eup %4225  ;;  %v3133_v20 = vmul.f32 %v3129_v59, %v3117_v56  ;;  %v3127_v32 = vadd.f32 1.0, %v4224_v31 }
0x1095   : > { %v3134_v25 = vmul.f32 %v3130_v7, %v3118_v38  ;;  %v3128_v46 = vadd.f32 1.0, %v4226_v6 }
0x1096   : > { %v3131_v10 = vmul.f32 %v3127_v32, %v3115_v12 }
0x1097   : > { %v3132_v30 = vmul.f32 %v3128_v46, %v3116_v18  ;;  %v4103_v17 = vpack.i.bf16 %v3134_v25, %v3133_v20  ;;  %v3168_v19 = vpack.c.bf16 %v3134_v25, %v3133_v20 }
0x1099   : > { %4104 = vrot.lane.b32.xlu1 %v4103_v17, %s5267_s6  ;;  %v4108_v1 = vpack.i.bf16 %v3132_v30, %v3131_v10  ;;  %v3167_v3 = vpack.c.bf16 %v3132_v30, %v3131_v10 }
0x109b   : > { %4109 = vrot.lane.b32.xlu0 %v4108_v1, %s5267_s6 }
0x109d   : > { %4114 = vrot.lane.b32.xlu1 %v4103_v17, %s5268_s8 }
0x109f   : > { %4119 = vrot.lane.b32.xlu0 %v4108_v1, %s5268_s8  ;;  %s5217_s8 = sand.u32 1, %s4281_s16  }
0x10a0   : > { %s3542_s6 = sshll.u32 %s5217_s8, 5  ;;  %s3704_s8 = sshll.u32 %s4532_s0, 9 }
0x10a1   : > { %3175 = vperm.xlu1 %3952, %v3169_v26   ;;  %s1080_s1 = scalar_lea.vmem [#allocation2], %s3542_s6  ;;  %s5141_s6 = scalar_lea.hbm %s4509_s17, %s3704_s8 }
0x10a2   : > { %s3406_s3 = sshll.u32 %s1080_s1, 4  ;;  %s4328_s0 = smov [#allocation2]   ;;  %s5138_s3 = int_to_ptr.vmem [resolvable:$true] %s3406_s3 }
0x10a3   : > { %3180 = vperm.xlu0 %3951, %v3170_v29   ;;  %s4229_s9 = scalar_lea.vmem %s5138_s3, 512  ;;  %s4233_s11 = sshll.u32 %s4328_s0, 4  ;;  %s4234_s11 = int_to_ptr.vmem [resolvable:$false] %s4233_s11 }
0x10a4   : > { %p4230_p11 = scmp.ne.s32.totalorder %s5138_s3, %s4229_s9  ;;  %s4235_s12 = scalar_lea.vmem %s4234_s11, 1024 }
0x10a5   : > { %3185 = vperm.xlu1 %3952, %v3171_v27   ;;  %p4236_p0 = scmp.lt.s32.totalorder %s5138_s3, %s4234_s11  ;;  %p4237_p1 = scmp.lt.s32.totalorder %s4235_s12, %s4229_s9 }
0x10a6   : > { %p4231_p12 = pnand %p4230_p11, %p4549_p5 }
0x10a7   : > { %3190 = vperm.xlu0 %3951, %v3172_v16   ;;  %p4238_p2 = por %p4237_p1, %p4236_p0 }
0x10a8   : > { %p4232_p13 = pneg %p4231_p12 }
0x10a9   : > { %3268 = vperm.xlu1 %3952, %v3262_v33  }
0x10aa   : > { %p4239_p3 = pnand %p4238_p2, %p4232_p13 }
0x10ab   : > { %3273 = vperm.xlu0 %3951, %v3263_v42  }
0x10ad   : > { %3278 = vperm.xlu1 %3952, %v3264_v44  }
0x10af   : > { %3283 = vperm.xlu0 %3951, %v3265_v47  }
0x110b   : > { %v4105_v48 = vpop.permute.xlu1 %4104 }
0x110c   : > { %v4107_v49 = vunpack.i.h.bf16 %v4105_v48  ;;  %v4106_v61 = vunpack.i.l.bf16 %v4105_v48 }
0x110d   : > { %v4110_v62 = vpop.permute.xlu0 %4109 }
0x110e   : > { %v3678_v8 = vpack.c.bf16 %v4107_v49, %v4106_v61  ;;  %v4112_v63 = vunpack.i.h.bf16 %v4110_v62  ;;  %v4111_v0 = vunpack.i.l.bf16 %v4110_v62 }
0x110f   : > { %v4115_v11 = vpop.permute.xlu1 %4114 }
0x1110   : > { %v3681_v9 = vpack.c.bf16 %v4112_v63, %v4111_v0  ;;  %3839 = vmatprep.subr.msk.bf16.mxu1 %vm4692_vm4, %v3678_v8  ;;  %v4117_v40 = vunpack.i.h.bf16 %v4115_v11  ;;  %v4116_v24 = vunpack.i.l.bf16 %v4115_v11 }
0x1111   : > { %3840 = vmatpush3.bf16.msk.msra.mxu1 %vm4692_vm4, %v3678_v8  ;;  %v4120_v13 = vpop.permute.xlu0 %4119 }
0x1112   : > { %3841 = vmatprep.subr.msk.bf16.mxu1 %vm4692_vm4, %v3681_v9  ;;  %v3684_v5 = vpack.c.bf16 %v4117_v40, %v4116_v24  ;;  %v4122_v39 = vunpack.i.h.bf16 %v4120_v13  ;;  %v4121_v23 = vunpack.i.l.bf16 %v4120_v13 }
0x1114   : > { %v3687_v36 = vpack.c.bf16 %v4122_v39, %v4121_v23 }
0x1115   : > { %3842 = vmatpush3.bf16.msk.msra.mxu1 %vm4692_vm4, %v3681_v9 }
0x1116   : > { %3843 = vmatprep.subr.bf16.mxu1 %v3168_v19 }
0x1119   : > { %3844 = vmatpush3.bf16.msra.mxu1 %v3168_v19 }
0x111a   : > { %3845 = vmatprep.subr.bf16.mxu1 %v3167_v3 }
0x111d   : > { %3846 = vmatpush3.bf16.msra.mxu1 %v3167_v3 }
0x111e   : > { %3847 = vmatprep.subr.msk.bf16.mxu1 %vm4676_vm2, %v3684_v5 }
0x1121   : > { %3848 = vmatpush3.bf16.msk.msra.mxu1 %vm4676_vm2, %v3684_v5 }
0x1122   : > { %3849 = vmatprep.subr.msk.bf16.mxu1 %vm4676_vm2, %v3687_v36 }
0x1125   : > { %3850 = vmatpush3.bf16.msk.msra.mxu1 %vm4676_vm2, %v3687_v36 }
0x1126   : > { %3855 = vmatprep.subr.mxu1 %v4986_v60 }
0x1128   : > { %3852 = vmatmul.mubr.msk.bf16.vlgmr.msra.gmra.mxu1 %vm1712_vm5, %v4146_v41 }
0x1129   : > { %3856 = vmatpush3.msra.mxu1 %v4986_v60  ;;  %3867 = vmatprep.mubr.msk.f32.mxu1 %vm3286_vm7, %v3258_v2  ;;  %v3260_v60 = vld [vmem:[%s4499_s27 + $0x10] sm:$0xff] }
0x112a   : > { %3857 = vmatprep.subr.mxu1 %v4984_v52 }
0x112b   : > { %3858 = vmatpush3.msra.mxu1 %v4984_v52  ;;  %v3176_v52 = vpop.permute.xlu1 %3175 }
0x112c   : > { %3859 = vmatprep.subr.mxu1 %v4977_v50 }
0x112d   : > { %3860 = vmatpush3.msra.mxu1 %v4977_v50  ;;  %v3261_v50 = vld [vmem:[%s4499_s27 + $0x18] sm:$0xff] }
0x112e   : > { %3861 = vmatprep.subr.mxu1 %v4979_v51 }
0x112f   : > { %3862 = vmatpush3.msra.mxu1 %v4979_v51  ;;  %v3181_v51 = vpop.permute.xlu0 %3180  ;;  %v3186_v4 = vpop.permute.xlu1 %3185 }
0x1130   : > { %3863 = vmatprep.subr.mxu1 %v4970_v28 }
0x1131   : > { %3864 = vmatpush3.msra.mxu1 %v4970_v28 }
0x1132   : > { %3865 = vmatprep.subr.mxu1 %v4972_v34 }
0x1133   : > { %3866 = vmatpush3.msra.mxu1 %v4972_v34  ;;  %v3191_v28 = vpop.permute.xlu0 %3190  ;;  %v3269_v34 = vpop.permute.xlu1 %3268 }
0x1134   : > { %3868 = vmatmul.mubr.msk.f32.vlgmr.msra.gmra.mxu1 %vm3286_vm7, %v3259_v21 }
0x1135   : > { %3870 = vmatprep.mubr.msk.f32.mxu1 %vm3286_vm7, %v3260_v60 }
0x1137   : > { %v3274_v22 = vpop.permute.xlu0 %3273  ;;  %v3279_v20 = vpop.permute.xlu1 %3278 }
0x1138   : > { %3871 = vmatmul.mubr.msk.f32.gmra.mxu1 %vm3286_vm7, %v3261_v50 }
0x113b   : > { %v3284_v59 = vpop.permute.xlu0 %3283 }
0x11e8   : > { %v3853_v45 = vpop.f32.mrf.mxu1 }
0x11e9   : > { %v3252_v32 = vadd.f32 %v3853_v45, %v3186_v4 }
0x11ea   : > { %v3243_v15 = vpop.f32.mrf.mxu1 }
0x11eb   : > { %v3244_v54 = vadd.f32 %v3243_v15, %v3176_v52 }
0x11ec   : > { %v3854_v43 = vpop.f32.mrf.mxu1 }
0x11ed   : > { %v3255_v38 = vadd.f32 %v3854_v43, %v3191_v28 }
0x11ee   : > { %v3246_v35 = vpop.f32.mrf.mxu1 }
0x11ef   : > { %v3247_v55 = vadd.f32 %v3246_v35, %v3181_v51 }
0x11f4   : > { %v3869_v14 = vpop.f32.mrf.mxu1 }
0x11f5   : > { %v3371_v58 = vadd.f32 %v3869_v14, %v3274_v22 }
0x11f6   : > { %v3365_v57 = vpop.f32.mrf.mxu1 }
0x11f7   : > { %v3385_v53 = vadd.f32 %v3371_v58, %v3247_v55  ;;  %v3366_v56 = vadd.f32 %v3365_v57, %v3269_v34 }
0x11f8   : > { %v3872_v31 = vpop.f32.mrf.mxu1 }
0x11f9   : > { %3389 = vst [vmem:[%s1080_s1 + $0x8] sm:$0xff] %v3385_v53  ;;  %v3384_v7 = vadd.f32 %v3366_v56, %v3244_v54  ;;  %v3381_v6 = vadd.f32 %v3872_v31, %v3284_v59 }
0x11fa   : > { %v3375_v12 = vpop.f32.mrf.mxu1 }
0x11fb   : > { %3388 = vst [vmem:[%s1080_s1] sm:$0xff] %v3384_v7  ;;  %v3387_v25 = vadd.f32 %v3381_v6, %v3255_v38  ;;  %v3376_v18 = vadd.f32 %v3375_v12, %v3279_v20 }
0x11fd   : > { %3391 = vst [vmem:[%s1080_s1 + $0x18] sm:$0xff] %v3387_v25  ;;  %v3386_v46 = vadd.f32 %v3376_v18, %v3252_v32 }
0x11ff   : > { %3390 = vst [vmem:[%s1080_s1 + $0x10] sm:$0xff] %v3386_v46 }
0x1200   : > { %4242 = shalt.err (!%p4239_p3)
}
0x1201   : > { %s4243_s4 = scalar_lea.hbm %s5141_s6, 512  ;;  %s4247_s1 = scalar_lea.hbm %s4509_s17, 1024 }
0x1202   : > { %p4244_p4 = scmp.ne.s32.totalorder %s5141_s6, %s4243_s4  ;;  %p4248_p9 = scmp.lt.s32.totalorder %s5141_s6, %s4509_s17 }
0x1203   : > { %p4249_p10 = scmp.lt.s32.totalorder %s4247_s1, %s4243_s4 }
0x1204   : > { %p4245_p7 = pnand %p4244_p4, %p4549_p5 }
0x1205   : > { %p4250_p11 = por %p4249_p10, %p4248_p9 }
0x1206   : > { %p4246_p8 = pneg %p4245_p7 }
0x1208   : > { %p4251_p12 = pnand %p4250_p11, %p4246_p8 }
0x120a   : > { %4254 = shalt.err (!%p4251_p12)
}
0x120b   : > { %s4329_s9 = smov 128   ;;  %s4330_s12 = smov 8  }
0x120c   : > { %3873 = dma.vmem_to_hbm [thread:$0]  (%p4549_p5), %s5138_s3, 512, %s5141_s6, %s5145_s5, %s4329_s9, %s4329_s9, %s4330_s12  }
0x120d PF: > { %p3879_p13 = scmp.ge.s32.totalorder %s4289_s22, 2  ;;  %s3421_s11 = sand.u32 1, %s4277_s15  }
0x120e   : > { %s3422_s8 = scalar_lea.sflag [#allocation3], %s3421_s11 }
0x120f   : > { %p3876_p0 = pnand %p3879_p13, %p4553_p6 }
0x1211   : > { %p3877_p1 = pneg %p3876_p0 }
0x1213   : > { %4272 = dma.done.wait (%p3877_p1), %s3422_s8, 512  }
0x1214   : > { %4274 = vsyncadd (%p3877_p1), %s3422_s8, 4294966784  ;;  %p79_p2 = scmp.ge.s32.totalorder %s4536_s26, 4   ;;  %s5279_s15 = smov %s4281_s16 }
0x1215   : > { %s5280_s16 = smov %s4285_s18  ;;  %s5281_s18 = smov %s4547_s2 }
0x1216   : > { %s5282_s22 = smov %s4536_s26  ;;  %81 = sbr.rel (!%p79_p2) target bundleno = 73 (0x49), region = 234 }
0x121b   :  { %3427 = vsyncpa [#allocation3], 1 }
0x121c   :  { %3429 = vsyncpa [#allocation3 + $0x1], 1 }

</bundles_post_ra>
